<compile_context>
chip_gen: v5e
topology: v5e:2x2
jax: 0.10.0
libtpu: 0.0.40
codegen_flags: <defaults>
</compile_context>

<pallas_src>
import jax
import jax.numpy as jnp
import numpy as np
from jax.experimental import pallas as pl
from jax.experimental.pallas import tpu as pltpu

LANE = 128


def _round_up(x, m):
    return ((x + m - 1) // m) * m


K1P = _round_up(3 * 5 * 5, LANE)     # 75  -> 128
K2P = _round_up(32 * 5 * 5, LANE)    # 800 -> 896


# ---------------------------------------------------------------------------
# Pallas kernels
# ---------------------------------------------------------------------------
def conv_bn_relu_kernel(a_ref, w_ref, shift_ref, o_ref):
    # a: (tm, Kp) bf16 patches, w: (Kp, 128) bf16 (BN scale pre-folded),
    # shift: (1, 128) f32.  Lane-dense 128-wide output; padded channels stay 0.
    acc = jnp.dot(a_ref[...], w_ref[...], preferred_element_type=jnp.float32)
    o_ref[...] = jnp.maximum(acc + shift_ref[...], 0.0).astype(o_ref.dtype)


def maxpool_kernel(x_ref, o_ref):
    # x: (tb, 2, W2, 2*C).  Axis 1 holds the two H phases; the last dim packs
    # the two W phases as two 128-aligned lane halves -> no masked/strided ops.
    x = x_ref[...]
    c = o_ref.shape[-1]
    m = jnp.maximum(x[:, 0], x[:, 1])                  # max over H phase
    o_ref[...] = jnp.maximum(m[..., :c], m[..., c:])   # max over W phase


def linear_kernel(x_ref, w_ref, b_ref, o_ref):
    o_ref[...] = (jnp.dot(x_ref[...], w_ref[...],
                          preferred_element_type=jnp.float32) + b_ref[...])


# ---------------------------------------------------------------------------
# Pallas wrappers
# ---------------------------------------------------------------------------
def fused_conv_mm(patches, w, shift, tm=1024):
    """(M, Kp) bf16 @ (Kp, 128) bf16, + shift, ReLU -> (M, 128) bf16."""
    M, Kp = patches.shape
    tm = min(tm, M)
    return pl.pallas_call(
        conv_bn_relu_kernel,
        out_shape=jax.ShapeDtypeStruct((M, LANE), jnp.bfloat16),
        grid=(pl.cdiv(M, tm),),
        in_specs=[
            pl.BlockSpec((tm, Kp), lambda i: (i, 0)),
            pl.BlockSpec((Kp, LANE), lambda i: (0, 0)),
            pl.BlockSpec((1, LANE), lambda i: (0, 0)),
        ],
        out_specs=pl.BlockSpec((tm, LANE), lambda i: (i, 0)),
        compiler_params=pltpu.CompilerParams(dimension_semantics=("parallel",)),
    )(patches, w, shift)


def maxpool2x2(x_nhwc, tb=16):
    """MaxPool2d(kernel_size=2, stride=2), floor semantics, NHWC, C mult of 128."""
    N, H, W, C = x_nhwc.shape
    H2, W2 = H // 2, W // 2
    R = N * H2
    # One contiguous crop+reshape copy (instead of 4 materialized phase slices).
    xr = x_nhwc[:, :2 * H2, :2 * W2, :].reshape(R, 2, W2, 2 * C)
    tb = min(tb, R)
    out = pl.pallas_call(
        maxpool_kernel,
        out_shape=jax.ShapeDtypeStruct((R, W2, C), x_nhwc.dtype),
        grid=(pl.cdiv(R, tb),),
        in_specs=[pl.BlockSpec((tb, 2, W2, 2 * C), lambda i: (i, 0, 0, 0))],
        out_specs=pl.BlockSpec((tb, W2, C), lambda i: (i, 0, 0)),
        compiler_params=pltpu.CompilerParams(dimension_semantics=("parallel",)),
    )(xr)
    return out.reshape(N, H2, W2, C)


def linear(x, w, b, tm=256):
    """(M, K) bf16 @ (K, 128) bf16 + b -> (M, 128) f32 (lane-dense output)."""
    M, K = x.shape
    Np = w.shape[1]
    tm = min(tm, M)
    return pl.pallas_call(
        linear_kernel,
        out_shape=jax.ShapeDtypeStruct((M, Np), jnp.float32),
        grid=(pl.cdiv(M, tm),),
        in_specs=[pl.BlockSpec((tm, K), lambda i: (i, 0)),
                  pl.BlockSpec((K, Np), lambda i: (0, 0)),
                  pl.BlockSpec((1, Np), lambda i: (0, 0))],
        out_specs=pl.BlockSpec((tm, Np), lambda i: (i, 0)),
        compiler_params=pltpu.CompilerParams(dimension_semantics=("parallel",)),
    )(x, w, b)


# ---------------------------------------------------------------------------
# Plain-JAX glue used inside the forward (layout plumbing only, no heavy compute)
# ---------------------------------------------------------------------------
def im2col_nhwc(x, cin, kh, kw, stride, pad, k_pad):
    """NHWC patch extraction, (kh, kw, cin) column order, K zero-padded to
    k_pad and cast to bf16 (fuses into a single XLA copy under jit)."""
    N, H, W, _ = x.shape
    x = x[..., :cin]
    xp = jnp.pad(x, ((0, 0), (pad, pad), (pad, pad), (0, 0)))
    OH = (H + 2 * pad - kh) // stride + 1
    OW = (W + 2 * pad - kw) // stride + 1
    cols = [xp[:, i:i + OH * stride:stride, j:j + OW * stride:stride, :]
            for i in range(kh) for j in range(kw)]
    p = jnp.concatenate(cols, axis=-1).reshape(N * OH * OW, kh * kw * cin)
    if k_pad > p.shape[1]:
        p = jnp.pad(p, ((0, 0), (0, k_pad - p.shape[1])))
    return p.astype(jnp.bfloat16), OH, OW


# ---------------------------------------------------------------------------
# One-time parameter preparation (hoisted OUT of the forward pass)
# ---------------------------------------------------------------------------
def _fold_conv_bn(conv_w, conv_b, gamma, beta, mean, var, k_pad, eps):
    """Fold BN (eval) scale into the weights; pad K->k_pad, Cout->128; bf16."""
    cout, cin, kh, kw = conv_w.shape
    scale = gamma / jnp.sqrt(var + eps)
    # (Cout, Cin, KH, KW) -> (Cout, KH, KW, Cin) to match (kh, kw, cin) patches.
    w = conv_w.transpose(0, 2, 3, 1).reshape(cout, -1) * scale[:, None]
    w = jnp.pad(w.T, ((0, k_pad - cin * kh * kw), (0, LANE - cout)))
    shift = (conv_b - mean) * scale + beta
    shift = jnp.pad(shift, (0, LANE - cout)).reshape(1, LANE)
    return w.astype(jnp.bfloat16), shift.astype(jnp.float32)


def _adaptive_pool_matrix(in_size, out_size):
    """Row-stochastic (out_size, in_size) matrix with AdaptiveAvgPool windows."""
    P = np.zeros((out_size, in_size), np.float32)
    for i in range(out_size):
        s = (i * in_size) // out_size
        e = -(-((i + 1) * in_size) // out_size)   # ceil
        P[i, s:e] = 1.0 / (e - s)
    return jnp.asarray(P)


def _conv_out(size, k=5, pad=1, stride=2):
    return (size + 2 * pad - k) // stride + 1


def prepare_params(params, in_h=64, in_w=64, eps=1e-5):
    """One-time prep: BN fold, layout transposes, lane/K padding, bf16 casts,
    and the AdaptiveAvgPool2d((8,8)) fold into the FC weight."""
    prep = {}
    prep["w1"], prep["shift1"] = _fold_conv_bn(
        params["conv1_w"], params["conv1_b"], params["bn1_gamma"],
        params["bn1_beta"], params["bn1_mean"], params["bn1_var"], K1P, eps)
    prep["w2"], prep["shift2"] = _fold_conv_bn(
        params["conv2_w"], params["conv2_b"], params["bn2_gamma"],
        params["bn2_beta"], params["bn2_mean"], params["bn2_var"], K2P, eps)

    # Spatial size of the second maxpool output (floor semantics).
    ph2 = _conv_out(_conv_out(in_h) // 2) // 2
    pw2 = _conv_out(_conv_out(in_w) // 2) // 2

    # AdaptiveAvgPool2d is linear:  pool(y)[c,h8,w8] = sum Ph[h8,h3] Pw[w8,w3] y[c,h3,w3]
    # Fold it (plus the NCHW-flatten -> NHWC-flatten permutation and the channel
    # lane padding to 128) into the FC weight so the FC kernel consumes the raw
    # (N, ph2*pw2*128) flatten of the pooled activation.
    num_classes = params["fc_w"].shape[0]
    cout2 = params["conv2_w"].shape[0]                              # 64
    fc_w4 = params["fc_w"].reshape(num_classes, cout2, 8, 8)        # [k, c, h8, w8]
    Ph = _adaptive_pool_matrix(ph2, 8)                              # [h8, h3]
    Pw = _adaptive_pool_matrix(pw2, 8)                              # [w8, w3]
    w_eff = jnp.einsum("kchw,hy,wx->kyxc", fc_w4, Ph, Pw)           # (k, ph2, pw2, c)
    w_eff = jnp.pad(w_eff, ((0, 0), (0, 0), (0, 0), (0, LANE - cout2)))
    w_eff = w_eff.reshape(num_classes, ph2 * pw2 * LANE).T          # (K=ph2*pw2*128, k)
    prep["fc_w"] = jnp.pad(
        w_eff, ((0, 0), (0, LANE - num_classes))).astype(jnp.bfloat16)
    prep["fc_b"] = jnp.pad(
        params["fc_b"], (0, LANE - num_classes)).reshape(1, LANE).astype(jnp.float32)
    return prep


# ---------------------------------------------------------------------------
# Parameters (deterministic synthetic init; shapes from CNN.__init__)
# ---------------------------------------------------------------------------
def init_params(key, num_classes=5):
    ks = jax.random.split(key, 16)
    p = {}
    p["conv1_w"] = 0.05 * jax.random.normal(ks[0], (32, 3, 5, 5), jnp.float32)
    p["conv1_b"] = 0.05 * jax.random.normal(ks[1], (32,), jnp.float32)
    p["bn1_gamma"] = 1.0 + 0.1 * jax.random.normal(ks[2], (32,), jnp.float32)
    p["bn1_beta"] = 0.1 * jax.random.normal(ks[3], (32,), jnp.float32)
    p["bn1_mean"] = 0.1 * jax.random.normal(ks[4], (32,), jnp.float32)
    p["bn1_var"] = 0.5 + 0.5 * jnp.abs(jax.random.normal(ks[5], (32,), jnp.float32))
    p["conv2_w"] = 0.05 * jax.random.normal(ks[6], (64, 32, 5, 5), jnp.float32)
    p["conv2_b"] = 0.05 * jax.random.normal(ks[7], (64,), jnp.float32)
    p["bn2_gamma"] = 1.0 + 0.1 * jax.random.normal(ks[8], (64,), jnp.float32)
    p["bn2_beta"] = 0.1 * jax.random.normal(ks[9], (64,), jnp.float32)
    p["bn2_mean"] = 0.1 * jax.random.normal(ks[10], (64,), jnp.float32)
    p["bn2_var"] = 0.5 + 0.5 * jnp.abs(jax.random.normal(ks[11], (64,), jnp.float32))
    p["fc_w"] = 0.02 * jax.random.normal(ks[12], (5, 64 * 8 * 8), jnp.float32)
    p["fc_b"] = 0.02 * jax.random.normal(ks[13], (5,), jnp.float32)
    return p


# ---------------------------------------------------------------------------
# Forward pass (expects PREPARED params; only im2col glue + 5 pallas_calls)
# ---------------------------------------------------------------------------
def cnn_forward(prep, x_nchw, num_classes=5):
    N = x_nchw.shape[0]
    x = x_nchw.transpose(0, 2, 3, 1)                                 # NHWC

    # conv1 + bn1 + relu (fused Pallas matmul), then maxpool (Pallas kernel).
    patches1, oh1, ow1 = im2col_nhwc(x, 3, 5, 5, 2, 1, K1P)
    y = fused_conv_mm(patches1, prep["w1"], prep["shift1"], tm=1024)
    y = maxpool2x2(y.reshape(N, oh1, ow1, LANE), tb=16)

    # conv2 + bn2 + relu (fused Pallas matmul), then maxpool (Pallas kernel).
    patches2, oh2, ow2 = im2col_nhwc(y, 32, 5, 5, 2, 1, K2P)
    y = fused_conv_mm(patches2, prep["w2"], prep["shift2"], tm=1024)
    y = maxpool2x2(y.reshape(N, oh2, ow2, LANE), tb=16)

    # AdaptiveAvgPool2d((8,8)) is folded into prep["fc_w"], Dropout is identity
    # in eval mode, so the FC kernel consumes the raw lane-padded NHWC flatten.
    # TODO(synk): nn.Dropout(p=0.5) is identity in eval mode, so it is omitted.
    flat = y.reshape(N, -1)                                          # (N, ph2*pw2*128) bf16
    out = linear(flat, prep["fc_w"], prep["fc_b"])                   # (N, 128) f32
    return out[:, :num_classes]                                      # (N, 5)


if __name__ == "__main__":
    key = jax.random.PRNGKey(0)
    k_param, k_input = jax.random.split(key)
    params = init_params(k_param, num_classes=5)
    x = jax.random.normal(k_input, (2, 3, 64, 64), jnp.float32)      # NCHW like PyTorch

    # One-time parameter preparation, hoisted out of the jitted forward graph.
    prep = prepare_params(params, in_h=64, in_w=64)
    prep = jax.block_until_ready(prep)

    fwd = jax.jit(cnn_forward)
    out = fwd(prep, x)
    out = jax.block_until_ready(out)
    assert out.shape == (2, 5), out.shape
    print("KERNEL_OK")
</pallas_src>

<mosaic_0001>
module attributes {stable_mosaic.version = 11 : i64} {
  func.func @conv_bn_relu_kernel(%arg0: i32, %arg1: memref<1024x128xbf16, #tpu.memory_space<vmem>>, %arg2: memref<128x128xbf16, #tpu.memory_space<vmem>>, %arg3: memref<1x128xf32, #tpu.memory_space<vmem>>, %arg4: memref<1024x128xbf16, #tpu.memory_space<vmem>>) attributes {dimension_semantics = [#tpu.dimension_semantics<parallel>], iteration_bounds = array<i64: 2>, scalar_prefetch = 0 : i64, scratch_operands = 0 : i64, tpu.core_type = #tpu.core_type<tc>, window_params = [{transform_indices = @transform_0, window_bounds = array<i64: 1024, 128>}, {pipeline_mode = #tpu.pipeline_mode<synchronous>, transform_indices = @transform_1, window_bounds = array<i64: 128, 128>}, {pipeline_mode = #tpu.pipeline_mode<synchronous>, transform_indices = @transform_2, window_bounds = array<i64: 1, 128>}, {transform_indices = @transform_3, window_bounds = array<i64: 1024, 128>}]} {
    %c0 = arith.constant 0 : index
    %c0_0 = arith.constant 0 : index
    %0 = vector.load %arg1[%c0, %c0_0] : memref<1024x128xbf16, #tpu.memory_space<vmem>>, vector<1024x128xbf16>
    %c0_1 = arith.constant 0 : index
    %c0_2 = arith.constant 0 : index
    %1 = vector.load %arg2[%c0_1, %c0_2] : memref<128x128xbf16, #tpu.memory_space<vmem>>, vector<128x128xbf16>
    %cst = arith.constant dense<0.000000e+00> : vector<1024x128xf32>
    %2 = tpu.matmul %0, %1, %cst {dimension_numbers = #tpu.dot_dimension_numbers<[1], [0], [0], [1], [0, 0, 1, 1], [], []>} : vector<1024x128xbf16>, vector<128x128xbf16>, vector<1024x128xf32> -> vector<1024x128xf32>
    %c0_3 = arith.constant 0 : index
    %c0_4 = arith.constant 0 : index
    %3 = vector.load %arg3[%c0_3, %c0_4] : memref<1x128xf32, #tpu.memory_space<vmem>>, vector<1x128xf32>
    %4 = vector.broadcast %3 : vector<1x128xf32> to vector<1024x128xf32>
    %5 = arith.addf %2, %4 : vector<1024x128xf32>
    %cst_5 = arith.constant 0.000000e+00 : f32
    %6 = vector.broadcast %cst_5 : f32 to vector<1024x128xf32>
    %7 = arith.maximumf %5, %6 : vector<1024x128xf32>
    %8 = arith.truncf %7 : vector<1024x128xf32> to vector<1024x128xbf16>
    %c0_6 = arith.constant 0 : index
    %c0_7 = arith.constant 0 : index
    %9 = vector.load %arg4[%c0_6, %c0_7] : memref<1024x128xbf16, #tpu.memory_space<vmem>>, vector<1024x128xbf16>
    tpu.vector_store %arg4[%c0_6, %c0_7], %8 {strides = array<i32>} : memref<1024x128xbf16, #tpu.memory_space<vmem>>, vector<1024x128xbf16>,
    return
  }
  func.func @transform_0(%arg0: i32) -> (i32, i32) {
    %c0_i32 = arith.constant 0 : i32
    %c0_i32_0 = arith.constant 0 : i32
    return %arg0, %c0_i32 : i32, i32
  }
  func.func @transform_1(%arg0: i32) -> (i32, i32) {
    %c0_i32 = arith.constant 0 : i32
    %c0_i32_0 = arith.constant 0 : i32
    %c0_i32_1 = arith.constant 0 : i32
    return %c0_i32, %c0_i32_0 : i32, i32
  }
  func.func @transform_2(%arg0: i32) -> (i32, i32) {
    %c0_i32 = arith.constant 0 : i32
    %c0_i32_0 = arith.constant 0 : i32
    %c0_i32_1 = arith.constant 0 : i32
    return %c0_i32, %c0_i32_0 : i32, i32
  }
  func.func @transform_3(%arg0: i32) -> (i32, i32) {
    %c0_i32 = arith.constant 0 : i32
    %c0_i32_0 = arith.constant 0 : i32
    return %arg0, %c0_i32 : i32, i32
  }
}

module attributes {stable_mosaic.version = 11 : i64} {
  func.func @maxpool_kernel(%arg0: i32, %arg1: memref<16x2x15x256xbf16, #tpu.memory_space<vmem>>, %arg2: memref<16x15x128xbf16, #tpu.memory_space<vmem>>) attributes {dimension_semantics = [#tpu.dimension_semantics<parallel>], iteration_bounds = array<i64: 2>, scalar_prefetch = 0 : i64, scratch_operands = 0 : i64, tpu.core_type = #tpu.core_type<tc>, window_params = [{transform_indices = @transform_0, window_bounds = array<i64: 16, 2, 15, 256>}, {transform_indices = @transform_1, window_bounds = array<i64: 16, 15, 128>}]} {
    %c0 = arith.constant 0 : index
    %c0_0 = arith.constant 0 : index
    %c0_1 = arith.constant 0 : index
    %c0_2 = arith.constant 0 : index
    %0 = vector.load %arg1[%c0, %c0_0, %c0_1, %c0_2] : memref<16x2x15x256xbf16, #tpu.memory_space<vmem>>, vector<16x2x15x256xbf16>
    %1 = vector.extract_strided_slice %0 {offsets = [0, 0, 0, 0], sizes = [16, 1, 15, 256], strides = [1, 1, 1, 1]} : vector<16x2x15x256xbf16> to vector<16x1x15x256xbf16>
    %2 = vector.shape_cast %1 : vector<16x1x15x256xbf16> to vector<16x15x256xbf16>
    %3 = vector.extract_strided_slice %0 {offsets = [0, 1, 0, 0], sizes = [16, 1, 15, 256], strides = [1, 1, 1, 1]} : vector<16x2x15x256xbf16> to vector<16x1x15x256xbf16>
    %4 = vector.shape_cast %3 : vector<16x1x15x256xbf16> to vector<16x15x256xbf16>
    %5 = arith.maximumf %2, %4 : vector<16x15x256xbf16>
    %6 = vector.extract_strided_slice %5 {offsets = [0, 0, 0], sizes = [16, 15, 128], strides = [1, 1, 1]} : vector<16x15x256xbf16> to vector<16x15x128xbf16>
    %7 = vector.extract_strided_slice %5 {offsets = [0, 0, 128], sizes = [16, 15, 128], strides = [1, 1, 1]} : vector<16x15x256xbf16> to vector<16x15x128xbf16>
    %8 = arith.maximumf %6, %7 : vector<16x15x128xbf16>
    %c0_3 = arith.constant 0 : index
    %c0_4 = arith.constant 0 : index
    %c0_5 = arith.constant 0 : index
    %9 = vector.load %arg2[%c0_3, %c0_4, %c0_5] : memref<16x15x128xbf16, #tpu.memory_space<vmem>>, vector<16x15x128xbf16>
    tpu.vector_store %arg2[%c0_3, %c0_4, %c0_5], %8 {strides = array<i32>} : memref<16x15x128xbf16, #tpu.memory_space<vmem>>, vector<16x15x128xbf16>,
    return
  }
  func.func @transform_0(%arg0: i32) -> (i32, i32, i32, i32) {
    %c0_i32 = arith.constant 0 : i32
    %c0_i32_0 = arith.constant 0 : i32
    %c0_i32_1 = arith.constant 0 : i32
    %c0_i32_2 = arith.constant 0 : i32
    return %arg0, %c0_i32, %c0_i32_0, %c0_i32_1 : i32, i32, i32, i32
  }
  func.func @transform_1(%arg0: i32) -> (i32, i32, i32) {
    %c0_i32 = arith.constant 0 : i32
    %c0_i32_0 = arith.constant 0 : i32
    %c0_i32_1 = arith.constant 0 : i32
    return %arg0, %c0_i32, %c0_i32_0 : i32, i32, i32
  }
}

module attributes {stable_mosaic.version = 11 : i64} {
  func.func @conv_bn_relu_kernel(%arg0: i32, %arg1: memref<98x896xbf16, #tpu.memory_space<vmem>>, %arg2: memref<896x128xbf16, #tpu.memory_space<vmem>>, %arg3: memref<1x128xf32, #tpu.memory_space<vmem>>, %arg4: memref<98x128xbf16, #tpu.memory_space<vmem>>) attributes {dimension_semantics = [#tpu.dimension_semantics<parallel>], iteration_bounds = array<i64: 1>, scalar_prefetch = 0 : i64, scratch_operands = 0 : i64, tpu.core_type = #tpu.core_type<tc>, window_params = [{transform_indices = @transform_0, window_bounds = array<i64: 98, 896>}, {pipeline_mode = #tpu.pipeline_mode<synchronous>, transform_indices = @transform_1, window_bounds = array<i64: 896, 128>}, {pipeline_mode = #tpu.pipeline_mode<synchronous>, transform_indices = @transform_2, window_bounds = array<i64: 1, 128>}, {transform_indices = @transform_3, window_bounds = array<i64: 98, 128>}]} {
    %c0 = arith.constant 0 : index
    %c0_0 = arith.constant 0 : index
    %0 = vector.load %arg1[%c0, %c0_0] : memref<98x896xbf16, #tpu.memory_space<vmem>>, vector<98x896xbf16>
    %c0_1 = arith.constant 0 : index
    %c0_2 = arith.constant 0 : index
    %1 = vector.load %arg2[%c0_1, %c0_2] : memref<896x128xbf16, #tpu.memory_space<vmem>>, vector<896x128xbf16>
    %cst = arith.constant dense<0.000000e+00> : vector<98x128xf32>
    %2 = tpu.matmul %0, %1, %cst {dimension_numbers = #tpu.dot_dimension_numbers<[1], [0], [0], [1], [0, 0, 1, 1], [], []>} : vector<98x896xbf16>, vector<896x128xbf16>, vector<98x128xf32> -> vector<98x128xf32>
    %c0_3 = arith.constant 0 : index
    %c0_4 = arith.constant 0 : index
    %3 = vector.load %arg3[%c0_3, %c0_4] : memref<1x128xf32, #tpu.memory_space<vmem>>, vector<1x128xf32>
    %4 = vector.broadcast %3 : vector<1x128xf32> to vector<98x128xf32>
    %5 = arith.addf %2, %4 : vector<98x128xf32>
    %cst_5 = arith.constant 0.000000e+00 : f32
    %6 = vector.broadcast %cst_5 : f32 to vector<98x128xf32>
    %7 = arith.maximumf %5, %6 : vector<98x128xf32>
    %8 = arith.truncf %7 : vector<98x128xf32> to vector<98x128xbf16>
    %c0_6 = arith.constant 0 : index
    %c0_7 = arith.constant 0 : index
    %9 = vector.load %arg4[%c0_6, %c0_7] : memref<98x128xbf16, #tpu.memory_space<vmem>>, vector<98x128xbf16>
    tpu.vector_store %arg4[%c0_6, %c0_7], %8 {strides = array<i32>} : memref<98x128xbf16, #tpu.memory_space<vmem>>, vector<98x128xbf16>,
    return
  }
  func.func @transform_0(%arg0: i32) -> (i32, i32) {
    %c0_i32 = arith.constant 0 : i32
    %c0_i32_0 = arith.constant 0 : i32
    return %arg0, %c0_i32 : i32, i32
  }
  func.func @transform_1(%arg0: i32) -> (i32, i32) {
    %c0_i32 = arith.constant 0 : i32
    %c0_i32_0 = arith.constant 0 : i32
    %c0_i32_1 = arith.constant 0 : i32
    return %c0_i32, %c0_i32_0 : i32, i32
  }
  func.func @transform_2(%arg0: i32) -> (i32, i32) {
    %c0_i32 = arith.constant 0 : i32
    %c0_i32_0 = arith.constant 0 : i32
    %c0_i32_1 = arith.constant 0 : i32
    return %c0_i32, %c0_i32_0 : i32, i32
  }
  func.func @transform_3(%arg0: i32) -> (i32, i32) {
    %c0_i32 = arith.constant 0 : i32
    %c0_i32_0 = arith.constant 0 : i32
    return %arg0, %c0_i32 : i32, i32
  }
}

module attributes {stable_mosaic.version = 11 : i64} {
  func.func @maxpool_kernel(%arg0: i32, %arg1: memref<6x2x3x256xbf16, #tpu.memory_space<vmem>>, %arg2: memref<6x3x128xbf16, #tpu.memory_space<vmem>>) attributes {dimension_semantics = [#tpu.dimension_semantics<parallel>], iteration_bounds = array<i64: 1>, scalar_prefetch = 0 : i64, scratch_operands = 0 : i64, tpu.core_type = #tpu.core_type<tc>, window_params = [{transform_indices = @transform_0, window_bounds = array<i64: 6, 2, 3, 256>}, {transform_indices = @transform_1, window_bounds = array<i64: 6, 3, 128>}]} {
    %c0 = arith.constant 0 : index
    %c0_0 = arith.constant 0 : index
    %c0_1 = arith.constant 0 : index
    %c0_2 = arith.constant 0 : index
    %0 = vector.load %arg1[%c0, %c0_0, %c0_1, %c0_2] : memref<6x2x3x256xbf16, #tpu.memory_space<vmem>>, vector<6x2x3x256xbf16>
    %1 = vector.extract_strided_slice %0 {offsets = [0, 0, 0, 0], sizes = [6, 1, 3, 256], strides = [1, 1, 1, 1]} : vector<6x2x3x256xbf16> to vector<6x1x3x256xbf16>
    %2 = vector.shape_cast %1 : vector<6x1x3x256xbf16> to vector<6x3x256xbf16>
    %3 = vector.extract_strided_slice %0 {offsets = [0, 1, 0, 0], sizes = [6, 1, 3, 256], strides = [1, 1, 1, 1]} : vector<6x2x3x256xbf16> to vector<6x1x3x256xbf16>
    %4 = vector.shape_cast %3 : vector<6x1x3x256xbf16> to vector<6x3x256xbf16>
    %5 = arith.maximumf %2, %4 : vector<6x3x256xbf16>
    %6 = vector.extract_strided_slice %5 {offsets = [0, 0, 0], sizes = [6, 3, 128], strides = [1, 1, 1]} : vector<6x3x256xbf16> to vector<6x3x128xbf16>
    %7 = vector.extract_strided_slice %5 {offsets = [0, 0, 128], sizes = [6, 3, 128], strides = [1, 1, 1]} : vector<6x3x256xbf16> to vector<6x3x128xbf16>
    %8 = arith.maximumf %6, %7 : vector<6x3x128xbf16>
    %c0_3 = arith.constant 0 : index
    %c0_4 = arith.constant 0 : index
    %c0_5 = arith.constant 0 : index
    %9 = vector.load %arg2[%c0_3, %c0_4, %c0_5] : memref<6x3x128xbf16, #tpu.memory_space<vmem>>, vector<6x3x128xbf16>
    tpu.vector_store %arg2[%c0_3, %c0_4, %c0_5], %8 {strides = array<i32>} : memref<6x3x128xbf16, #tpu.memory_space<vmem>>, vector<6x3x128xbf16>,
    return
  }
  func.func @transform_0(%arg0: i32) -> (i32, i32, i32, i32) {
    %c0_i32 = arith.constant 0 : i32
    %c0_i32_0 = arith.constant 0 : i32
    %c0_i32_1 = arith.constant 0 : i32
    %c0_i32_2 = arith.constant 0 : i32
    return %arg0, %c0_i32, %c0_i32_0, %c0_i32_1 : i32, i32, i32, i32
  }
  func.func @transform_1(%arg0: i32) -> (i32, i32, i32) {
    %c0_i32 = arith.constant 0 : i32
    %c0_i32_0 = arith.constant 0 : i32
    %c0_i32_1 = arith.constant 0 : i32
    return %arg0, %c0_i32, %c0_i32_0 : i32, i32, i32
  }
}

module attributes {stable_mosaic.version = 11 : i64} {
  func.func @linear_kernel(%arg0: i32, %arg1: memref<2x1152xbf16, #tpu.memory_space<vmem>>, %arg2: memref<1152x128xbf16, #tpu.memory_space<vmem>>, %arg3: memref<1x128xf32, #tpu.memory_space<vmem>>, %arg4: memref<2x128xf32, #tpu.memory_space<vmem>>) attributes {dimension_semantics = [#tpu.dimension_semantics<parallel>], iteration_bounds = array<i64: 1>, scalar_prefetch = 0 : i64, scratch_operands = 0 : i64, tpu.core_type = #tpu.core_type<tc>, window_params = [{transform_indices = @transform_0, window_bounds = array<i64: 2, 1152>}, {pipeline_mode = #tpu.pipeline_mode<synchronous>, transform_indices = @transform_1, window_bounds = array<i64: 1152, 128>}, {pipeline_mode = #tpu.pipeline_mode<synchronous>, transform_indices = @transform_2, window_bounds = array<i64: 1, 128>}, {transform_indices = @transform_3, window_bounds = array<i64: 2, 128>}]} {
    %c0 = arith.constant 0 : index
    %c0_0 = arith.constant 0 : index
    %0 = vector.load %arg1[%c0, %c0_0] : memref<2x1152xbf16, #tpu.memory_space<vmem>>, vector<2x1152xbf16>
    %c0_1 = arith.constant 0 : index
    %c0_2 = arith.constant 0 : index
    %1 = vector.load %arg2[%c0_1, %c0_2] : memref<1152x128xbf16, #tpu.memory_space<vmem>>, vector<1152x128xbf16>
    %cst = arith.constant dense<0.000000e+00> : vector<2x128xf32>
    %2 = tpu.matmul %0, %1, %cst {dimension_numbers = #tpu.dot_dimension_numbers<[1], [0], [0], [1], [0, 0, 1, 1], [], []>} : vector<2x1152xbf16>, vector<1152x128xbf16>, vector<2x128xf32> -> vector<2x128xf32>
    %c0_3 = arith.constant 0 : index
    %c0_4 = arith.constant 0 : index
    %3 = vector.load %arg3[%c0_3, %c0_4] : memref<1x128xf32, #tpu.memory_space<vmem>>, vector<1x128xf32>
    %4 = vector.broadcast %3 : vector<1x128xf32> to vector<2x128xf32>
    %5 = arith.addf %2, %4 : vector<2x128xf32>
    %c0_5 = arith.constant 0 : index
    %c0_6 = arith.constant 0 : index
    %6 = vector.load %arg4[%c0_5, %c0_6] : memref<2x128xf32, #tpu.memory_space<vmem>>, vector<2x128xf32>
    tpu.vector_store %arg4[%c0_5, %c0_6], %5 {strides = array<i32>} : memref<2x128xf32, #tpu.memory_space<vmem>>, vector<2x128xf32>,
    return
  }
  func.func @transform_0(%arg0: i32) -> (i32, i32) {
    %c0_i32 = arith.constant 0 : i32
    %c0_i32_0 = arith.constant 0 : i32
    return %arg0, %c0_i32 : i32, i32
  }
  func.func @transform_1(%arg0: i32) -> (i32, i32) {
    %c0_i32 = arith.constant 0 : i32
    %c0_i32_0 = arith.constant 0 : i32
    %c0_i32_1 = arith.constant 0 : i32
    return %c0_i32, %c0_i32_0 : i32, i32
  }
  func.func @transform_2(%arg0: i32) -> (i32, i32) {
    %c0_i32 = arith.constant 0 : i32
    %c0_i32_0 = arith.constant 0 : i32
    %c0_i32_1 = arith.constant 0 : i32
    return %c0_i32, %c0_i32_0 : i32, i32
  }
  func.func @transform_3(%arg0: i32) -> (i32, i32) {
    %c0_i32 = arith.constant 0 : i32
    %c0_i32_0 = arith.constant 0 : i32
    return %arg0, %c0_i32 : i32, i32
  }
}

</mosaic_0001>

<bundles_post_ra>
// kernel: cnn_forward.5
= control target key start
LH: loop header
LB: loop body
LE: loop exit
PB: predicated region body
PF: predicated region fallthrough
CT: control target
= control target key end

     0   :  { %s2817_s12 = smov 0   ;;  %s2819_s13 = smov 0   ;;  %s3273_s0 = inlined_call_operand.vmem [shape: bf16[1922,128], index: 0, kind: input, shape index: {}]   ;;  %s3274_s1 = inlined_call_operand.vmem [shape: bf16[128,128], index: 1, kind: input, shape index: {}]   ;;  %s3275_s2 = inlined_call_operand.vmem [shape: f32[1,128], index: 2, kind: input, shape index: {}]   ;;  %s3276_s3 = inlined_call_operand.vmem [shape: bf16[1922,128], index: 3, kind: output, shape index: {}]  }
   0x1   :  { %s2821_s14 = smov 0  }
   0x2 LB: > { %s2830_s15 = sadd.s32 4294967295, %s2763_s14   ;;  %s2832_s16 = sadd.s32 1, %s2763_s14   ;;  %s2763_s14 = sphi %s2821_s14, %s3285_s14   ;;  %s2759_s13 = sphi %s2819_s13, %s3284_s13   ;;  %s2755_s12 = sphi %s2817_s12, %s3283_s12  }
   0x3   : > { %s85_s17 = ssub.s32 %s2763_s14, %s2832_s16  ;;  %s88_s18 = sadd.s32 1, %s2759_s13 }
   0x4   : > { %p86_p0 = scmp.eq.s32.totalorder %s85_s17, 0  ;;  %p98_p1 = scmp.ne.s32.totalorder %s2759_s13, %s2755_s12 }
   0x5   : > { %p99_p2 = scmp.eq.s32.totalorder %s2830_s15, 1  ;;  %p1828_p3 = scmp.ge.s32.totalorder %s2763_s14, 1 }
   0x6   : > { %s2840_s19 = scalar_select %p86_p0, %s2759_s13, %s88_s18  }
   0x7   : > { %p2842_p4 = por %p99_p2, %p98_p1  ;;  %p146_p5 = scmp.lt.s32.totalorder %s2763_s14, 3 }
   0x9   : > { %p147_p6 = pnand %p1828_p3, %p146_p5 }
   0xa   : > { %s2859_s29 = sshll.u32 (!%p147_p6), %s2830_s15, 7  ;;  %s170_s24 = sand.u32 (!%p147_p6), 1, %s2755_s12  }
   0xb   : > { %150 = sbr.rel (%p147_p6) target bundleno = 501 (0x1f5), region = 32  ;;  %p178_p7 = scmp.lt.s32.totalorder (!%p147_p6), %s2859_s29, 240 }
   0xc   : > { %s1829_s25 = sshll.u32 (!%p147_p6), %s170_s24, 9 }
   0xd   : > { %s2928_s12 = scalar_lea.vmem (!%p147_p6), [#allocation2], %s1829_s25  }
  0x10   : > { %v2208_v0 = vld [vmem:[%s3274_s1 + $0x38] sm:$0xff]  ;;  %v2207_v1 = vld [vmem:[%s3274_s1 + $0x30] sm:$0xff]  ;;  %v2206_v2 = vld [vmem:[%s3274_s1 + $0x28] sm:$0xff]  ;;  %s179_s7 = scalar_select %p178_p7, %s2859_s29, 240 }
  0x11   : > { %772 = vmatpush.bf16.msra.mxu0 %v2208_v0  ;;  %2595 = vmatpush.bf16.msra.mxu1 %v2208_v0  ;;  %v2205_v3 = vld [vmem:[%s3274_s1 + $0x20] sm:$0xff]  ;;  %v2204_v4 = vld [vmem:[%s3274_s1 + $0x18] sm:$0xff]  ;;  %v2203_v5 = vld [vmem:[%s3274_s1 + $0x10] sm:$0xff]  ;;  %s1493_s28 = ssub.s32 (%p2842_p4), 241, %s2859_s29  ;;  %s2209_s30 = sshll.u32 (%p2842_p4), %s2830_s15, 9 }
  0x12   : > { %2596 = vmatpush.bf16.msra.mxu2 %v2208_v0  ;;  %2597 = vmatpush.bf16.msra.mxu3 %v2208_v0  ;;  %v2202_v6 = vld [vmem:[%s3274_s1 + $0x8] sm:$0xff]  ;;  %s1831_s10 = sshll.u32 %s179_s7, 2  ;;  %v2201_v7 = vld [vmem:[%s3274_s1] sm:$0xff]  ;;  %p1494_p8 = scmp.lt.s32.totalorder (%p2842_p4), %s1493_s28, 128 }
  0x13   : > { %s2878_s21 = scalar_lea.vmem %s3273_s0, %s1831_s10  ;;  %v2919_v46 = vld [vmem:[%s3275_s2] ss:$0 sm:$0xff]  ;;  %s3138_s6 = scalar_lea.vmem (%p2842_p4), %s3276_s3, %s2209_s30  }
  0x14   : > { %v2137_v8 = vld [vmem:[%s2878_s21] sm:$0xff]  ;;  %v2138_v12 = vld [vmem:[%s2878_s21 + $0x8] sm:$0xff]  ;;  %v2139_v16 = vld [vmem:[%s2878_s21 + $0x10] sm:$0xff] }
  0x15   : > { %773 = vmatpush.bf16.msra.mxu0 %v2207_v1  ;;  %2598 = vmatpush.bf16.msra.mxu1 %v2207_v1  ;;  %v2153_v9 = vld [vmem:[%s2878_s21 + $0x80] sm:$0xff]  ;;  %v2154_v13 = vld [vmem:[%s2878_s21 + $0x88] sm:$0xff]  ;;  %v2155_v17 = vld [vmem:[%s2878_s21 + $0x90] sm:$0xff] }
  0x16   : > { %2599 = vmatpush.bf16.msra.mxu2 %v2207_v1  ;;  %2600 = vmatpush.bf16.msra.mxu3 %v2207_v1  ;;  %v2169_v10 = vld [vmem:[%s2878_s21 + $0x100] sm:$0xff]  ;;  %v2170_v14 = vld [vmem:[%s2878_s21 + $0x108] sm:$0xff]  ;;  %v2171_v18 = vld [vmem:[%s2878_s21 + $0x110] sm:$0xff] }
  0x17   : > { %v2185_v11 = vld [vmem:[%s2878_s21 + $0x180] sm:$0xff]  ;;  %v2186_v15 = vld [vmem:[%s2878_s21 + $0x188] sm:$0xff]  ;;  %v2187_v19 = vld [vmem:[%s2878_s21 + $0x190] sm:$0xff] }
  0x18   : > { %v2140_v20 = vld [vmem:[%s2878_s21 + $0x18] sm:$0xff]  ;;  %v2141_v24 = vld [vmem:[%s2878_s21 + $0x20] sm:$0xff]  ;;  %v2142_v28 = vld [vmem:[%s2878_s21 + $0x28] sm:$0xff] }
  0x19   : > { %774 = vmatpush.bf16.msra.mxu0 %v2206_v2  ;;  %2601 = vmatpush.bf16.msra.mxu1 %v2206_v2  ;;  %v2156_v21 = vld [vmem:[%s2878_s21 + $0x98] sm:$0xff]  ;;  %v2157_v25 = vld [vmem:[%s2878_s21 + $0xa0] sm:$0xff]  ;;  %v2158_v29 = vld [vmem:[%s2878_s21 + $0xa8] sm:$0xff] }
  0x1a   : > { %2602 = vmatpush.bf16.msra.mxu2 %v2206_v2  ;;  %2603 = vmatpush.bf16.msra.mxu3 %v2206_v2  ;;  %v2172_v22 = vld [vmem:[%s2878_s21 + $0x118] sm:$0xff]  ;;  %v2173_v26 = vld [vmem:[%s2878_s21 + $0x120] sm:$0xff]  ;;  %v2174_v30 = vld [vmem:[%s2878_s21 + $0x128] sm:$0xff] }
  0x1b   : > { %v2188_v23 = vld [vmem:[%s2878_s21 + $0x198] sm:$0xff]  ;;  %v2189_v27 = vld [vmem:[%s2878_s21 + $0x1a0] sm:$0xff]  ;;  %v2190_v31 = vld [vmem:[%s2878_s21 + $0x1a8] sm:$0xff] }
  0x1c   : > { %v2143_v32 = vld [vmem:[%s2878_s21 + $0x30] sm:$0xff]  ;;  %v2144_v36 = vld [vmem:[%s2878_s21 + $0x38] sm:$0xff]  ;;  %v2145_v40 = vld [vmem:[%s2878_s21 + $0x40] sm:$0xff] }
  0x1d   : > { %775 = vmatpush.bf16.msra.mxu0 %v2205_v3  ;;  %2604 = vmatpush.bf16.msra.mxu1 %v2205_v3  ;;  %v2159_v33 = vld [vmem:[%s2878_s21 + $0xb0] sm:$0xff]  ;;  %v2160_v37 = vld [vmem:[%s2878_s21 + $0xb8] sm:$0xff]  ;;  %v2161_v41 = vld [vmem:[%s2878_s21 + $0xc0] sm:$0xff] }
  0x1e   : > { %2605 = vmatpush.bf16.msra.mxu2 %v2205_v3  ;;  %2606 = vmatpush.bf16.msra.mxu3 %v2205_v3  ;;  %v2175_v34 = vld [vmem:[%s2878_s21 + $0x130] sm:$0xff]  ;;  %v2176_v38 = vld [vmem:[%s2878_s21 + $0x138] sm:$0xff]  ;;  %v2177_v44 = vld [vmem:[%s2878_s21 + $0x140] sm:$0xff] }
  0x1f   : > { %v2191_v35 = vld [vmem:[%s2878_s21 + $0x1b0] sm:$0xff]  ;;  %v2192_v39 = vld [vmem:[%s2878_s21 + $0x1b8] sm:$0xff]  ;;  %v2193_v45 = vld [vmem:[%s2878_s21 + $0x1c0] sm:$0xff] }
  0x20   : > { %v2146_v1 = vld [vmem:[%s2878_s21 + $0x48] sm:$0xff] }
  0x21   : > { %776 = vmatpush.bf16.msra.mxu0 %v2204_v4  ;;  %2607 = vmatpush.bf16.msra.mxu1 %v2204_v4  ;;  %v2162_v2 = vld [vmem:[%s2878_s21 + $0xc8] sm:$0xff] }
  0x22   : > { %2608 = vmatpush.bf16.msra.mxu2 %v2204_v4  ;;  %2609 = vmatpush.bf16.msra.mxu3 %v2204_v4 }
  0x25   : > { %777 = vmatpush.bf16.msra.mxu0 %v2203_v5  ;;  %2610 = vmatpush.bf16.msra.mxu1 %v2203_v5 }
  0x26   : > { %2611 = vmatpush.bf16.msra.mxu2 %v2203_v5  ;;  %2612 = vmatpush.bf16.msra.mxu3 %v2203_v5 }
  0x29   : > { %778 = vmatpush.bf16.msra.mxu0 %v2202_v6  ;;  %2613 = vmatpush.bf16.msra.mxu1 %v2202_v6 }
  0x2a   : > { %2614 = vmatpush.bf16.msra.mxu2 %v2202_v6  ;;  %2615 = vmatpush.bf16.msra.mxu3 %v2202_v6 }
  0x2d   : > { %779 = vmatpush.bf16.msra.mxu0 %v2201_v7  ;;  %2616 = vmatpush.bf16.msra.mxu1 %v2201_v7 }
  0x2e   : > { %2617 = vmatpush.bf16.msra.mxu2 %v2201_v7  ;;  %2618 = vmatpush.bf16.msra.mxu3 %v2201_v7  ;;  %v2178_v7 = vld [vmem:[%s2878_s21 + $0x148] sm:$0xff] }
  0x30   : > { %780 = vmatmul.bf16.vlgmr.msra.gmra.mxu0 %v2137_v8  ;;  %860 = vmatmul.bf16.vlgmr.msra.gmra.mxu1 %v2153_v9  ;;  %v2194_v8 = vld [vmem:[%s2878_s21 + $0x1c8] sm:$0xff] }
  0x31   : > { %940 = vmatmul.bf16.vlgmr.msra.gmra.mxu2 %v2169_v10  ;;  %1020 = vmatmul.bf16.vlgmr.msra.gmra.mxu3 %v2185_v11 }
  0x40   : > { %785 = vmatmul.bf16.gmra.mxu0 %v2138_v12  ;;  %865 = vmatmul.bf16.gmra.mxu1 %v2154_v13 }
  0x41   : > { %945 = vmatmul.bf16.gmra.mxu2 %v2170_v14  ;;  %1025 = vmatmul.bf16.gmra.mxu3 %v2186_v15 }
  0x50   : > { %790 = vmatmul.bf16.gmra.mxu0 %v2139_v16  ;;  %870 = vmatmul.bf16.gmra.mxu1 %v2155_v17 }
  0x51   : > { %950 = vmatmul.bf16.gmra.mxu2 %v2171_v18  ;;  %1030 = vmatmul.bf16.gmra.mxu3 %v2187_v19 }
  0x60   : > { %795 = vmatmul.bf16.gmra.mxu0 %v2140_v20  ;;  %875 = vmatmul.bf16.gmra.mxu1 %v2156_v21 }
  0x61   : > { %955 = vmatmul.bf16.gmra.mxu2 %v2172_v22  ;;  %1035 = vmatmul.bf16.gmra.mxu3 %v2188_v23 }
  0x70   : > { %800 = vmatmul.bf16.gmra.mxu0 %v2141_v24  ;;  %880 = vmatmul.bf16.gmra.mxu1 %v2157_v25 }
  0x71   : > { %960 = vmatmul.bf16.gmra.mxu2 %v2173_v26  ;;  %1040 = vmatmul.bf16.gmra.mxu3 %v2189_v27 }
  0x80   : > { %805 = vmatmul.bf16.gmra.mxu0 %v2142_v28  ;;  %885 = vmatmul.bf16.gmra.mxu1 %v2158_v29 }
  0x81   : > { %965 = vmatmul.bf16.gmra.mxu2 %v2174_v30  ;;  %1045 = vmatmul.bf16.gmra.mxu3 %v2190_v31 }
  0x90   : > { %810 = vmatmul.bf16.gmra.mxu0 %v2143_v32  ;;  %890 = vmatmul.bf16.gmra.mxu1 %v2159_v33  ;;  %v2147_v33 = vld [vmem:[%s2878_s21 + $0x50] sm:$0xff] }
  0x91   : > { %970 = vmatmul.bf16.gmra.mxu2 %v2175_v34  ;;  %1050 = vmatmul.bf16.gmra.mxu3 %v2191_v35  ;;  %v2163_v34 = vld [vmem:[%s2878_s21 + $0xd0] sm:$0xff] }
  0xa0   : > { %815 = vmatmul.bf16.gmra.mxu0 %v2144_v36  ;;  %895 = vmatmul.bf16.gmra.mxu1 %v2160_v37 }
  0xa1   : > { %975 = vmatmul.bf16.gmra.mxu2 %v2176_v38  ;;  %1055 = vmatmul.bf16.gmra.mxu3 %v2192_v39  ;;  %v2179_v39 = vld [vmem:[%s2878_s21 + $0x150] sm:$0xff] }
  0xad   : > { %v781_v42 = vpop.f32.mrf.mxu0  ;;  %v861_v43 = vpop.f32.mrf.mxu1 }
  0xae   : > { %v782_v47 = vadd.f32 %v2919_v46, %v781_v42  ;;  %v862_v48 = vadd.f32 %v2919_v46, %v861_v43 }
  0xb0   : > { %820 = vmatmul.bf16.gmra.mxu0 %v2145_v40  ;;  %900 = vmatmul.bf16.gmra.mxu1 %v2161_v41  ;;  %v1101_v55 = vmax.f32 %v782_v47, 0.0  ;;  %v1133_v56 = vmax.f32 %v862_v48, 0.0  ;;  %v2195_v40 = vld [vmem:[%s2878_s21 + $0x1d0] sm:$0xff] }
  0xb1   : > { %980 = vmatmul.bf16.gmra.mxu2 %v2177_v44  ;;  %1060 = vmatmul.bf16.gmra.mxu3 %v2193_v45 }
  0xb4   : > { %v941_v49 = vpop.f32.mrf.mxu2  ;;  %v1021_v50 = vpop.f32.mrf.mxu3 }
  0xb5   : > { %v783_v51 = vpop.f32.mrf.mxu0  ;;  %v863_v52 = vpop.f32.mrf.mxu1  ;;  %v942_v61 = vadd.f32 %v2919_v46, %v941_v49  ;;  %v1022_v62 = vadd.f32 %v2919_v46, %v1021_v50 }
  0xb6   : > { %v784_v53 = vadd.f32 %v2919_v46, %v783_v51  ;;  %v864_v54 = vadd.f32 %v2919_v46, %v863_v52 }
  0xb7   : > { %v1165_v9 = vmax.f32 %v942_v61, 0.0  ;;  %v1197_v10 = vmax.f32 %v1022_v62, 0.0 }
  0xb8   : > { %v1102_v57 = vmax.f32 %v784_v53, 0.0  ;;  %v1134_v58 = vmax.f32 %v864_v54, 0.0 }
  0xba   : > { %v2215_v59 = vpack.c.bf16 %v1102_v57, %v1101_v55  ;;  %v2295_v60 = vpack.c.bf16 %v1134_v58, %v1133_v56 }
  0xbc   : > { %2216 = vst [vmem:[%s2928_s12] sm:$0xff] %v2215_v59   ;;  %v943_v63 = vpop.f32.mrf.mxu2  ;;  %v1023_v0 = vpop.f32.mrf.mxu3 }
  0xbd   : > { %2547 = vst [vmem:[%s2928_s12 + $0x80] sm:$0xff] %v2295_v60   ;;  %v944_v3 = vadd.f32 %v2919_v46, %v943_v63  ;;  %v1024_v4 = vadd.f32 %v2919_v46, %v1023_v0  ;;  %v786_v5 = vpop.f32.mrf.mxu0  ;;  %v866_v6 = vpop.f32.mrf.mxu1 }
  0xbe   : > { %v787_v15 = vadd.f32 %v2919_v46, %v786_v5  ;;  %v867_v16 = vadd.f32 %v2919_v46, %v866_v6 }
  0xbf   : > { %v1166_v11 = vmax.f32 %v944_v3, 0.0  ;;  %v1198_v12 = vmax.f32 %v1024_v4, 0.0  ;;  %v2164_v3 = vld [vmem:[%s2878_s21 + $0xd8] sm:$0xff] }
  0xc0   : > { %825 = vmatmul.bf16.gmra.mxu0 %v2146_v1  ;;  %905 = vmatmul.bf16.gmra.mxu1 %v2162_v2  ;;  %v1103_v23 = vmax.f32 %v787_v15, 0.0  ;;  %v1135_v24 = vmax.f32 %v867_v16, 0.0  ;;  %v2148_v2 = vld [vmem:[%s2878_s21 + $0x58] sm:$0xff] }
  0xc1   : > { %v2375_v13 = vpack.c.bf16 %v1166_v11, %v1165_v9  ;;  %v2455_v14 = vpack.c.bf16 %v1198_v12, %v1197_v10  ;;  %985 = vmatmul.bf16.gmra.mxu2 %v2178_v7  ;;  %1065 = vmatmul.bf16.gmra.mxu3 %v2194_v8  ;;  %v2180_v8 = vld [vmem:[%s2878_s21 + $0x158] sm:$0xff] }
  0xc2   : > { %v2196_v9 = vld [vmem:[%s2878_s21 + $0x1d8] sm:$0xff] }
  0xc3   : > { %2563 = vst [vmem:[%s2928_s12 + $0x100] sm:$0xff] %v2375_v13  }
  0xc4   : > { %2579 = vst [vmem:[%s2928_s12 + $0x180] sm:$0xff] %v2455_v14   ;;  %v946_v17 = vpop.f32.mrf.mxu2  ;;  %v1026_v18 = vpop.f32.mrf.mxu3 }
  0xc5   : > { %v788_v19 = vpop.f32.mrf.mxu0  ;;  %v868_v20 = vpop.f32.mrf.mxu1  ;;  %v947_v29 = vadd.f32 %v2919_v46, %v946_v17  ;;  %v1027_v30 = vadd.f32 %v2919_v46, %v1026_v18 }
  0xc6   : > { %v789_v21 = vadd.f32 %v2919_v46, %v788_v19  ;;  %v869_v22 = vadd.f32 %v2919_v46, %v868_v20 }
  0xc7   : > { %v1167_v41 = vmax.f32 %v947_v29, 0.0  ;;  %v1199_v42 = vmax.f32 %v1027_v30, 0.0 }
  0xc8   : > { %v1104_v25 = vmax.f32 %v789_v21, 0.0  ;;  %v1136_v26 = vmax.f32 %v869_v22, 0.0 }
  0xca   : > { %v2220_v27 = vpack.c.bf16 %v1104_v25, %v1103_v23  ;;  %v2300_v28 = vpack.c.bf16 %v1136_v26, %v1135_v24 }
  0xcc   : > { %2532 = vst [vmem:[%s2928_s12 + $0x8] sm:$0xff] %v2220_v27   ;;  %v948_v31 = vpop.f32.mrf.mxu2  ;;  %v1028_v32 = vpop.f32.mrf.mxu3 }
  0xcd   : > { %2548 = vst [vmem:[%s2928_s12 + $0x88] sm:$0xff] %v2300_v28   ;;  %v949_v35 = vadd.f32 %v2919_v46, %v948_v31  ;;  %v1029_v36 = vadd.f32 %v2919_v46, %v1028_v32  ;;  %v791_v37 = vpop.f32.mrf.mxu0  ;;  %v871_v38 = vpop.f32.mrf.mxu1 }
  0xce   : > { %v792_v48 = vadd.f32 %v2919_v46, %v791_v37  ;;  %v872_v49 = vadd.f32 %v2919_v46, %v871_v38 }
  0xcf   : > { %v1168_v43 = vmax.f32 %v949_v35, 0.0  ;;  %v1200_v44 = vmax.f32 %v1029_v36, 0.0  ;;  %v2165_v35 = vld [vmem:[%s2878_s21 + $0xe0] sm:$0xff] }
  0xd0   : > { %830 = vmatmul.bf16.gmra.mxu0 %v2147_v33  ;;  %910 = vmatmul.bf16.gmra.mxu1 %v2163_v34  ;;  %v1105_v56 = vmax.f32 %v792_v48, 0.0  ;;  %v1137_v57 = vmax.f32 %v872_v49, 0.0  ;;  %v2149_v34 = vld [vmem:[%s2878_s21 + $0x60] sm:$0xff] }
  0xd1   : > { %v2380_v45 = vpack.c.bf16 %v1168_v43, %v1167_v41  ;;  %v2460_v47 = vpack.c.bf16 %v1200_v44, %v1199_v42  ;;  %990 = vmatmul.bf16.gmra.mxu2 %v2179_v39  ;;  %1070 = vmatmul.bf16.gmra.mxu3 %v2195_v40  ;;  %v2181_v40 = vld [vmem:[%s2878_s21 + $0x160] sm:$0xff] }
  0xd2   : > { %v2197_v41 = vld [vmem:[%s2878_s21 + $0x1e0] sm:$0xff] }
  0xd3   : > { %2564 = vst [vmem:[%s2928_s12 + $0x108] sm:$0xff] %v2380_v45  }
  0xd4   : > { %2580 = vst [vmem:[%s2928_s12 + $0x188] sm:$0xff] %v2460_v47   ;;  %v951_v50 = vpop.f32.mrf.mxu2  ;;  %v1031_v51 = vpop.f32.mrf.mxu3 }
  0xd5   : > { %v793_v52 = vpop.f32.mrf.mxu0  ;;  %v873_v53 = vpop.f32.mrf.mxu1  ;;  %v952_v62 = vadd.f32 %v2919_v46, %v951_v50  ;;  %v1032_v63 = vadd.f32 %v2919_v46, %v1031_v51 }
  0xd6   : > { %v794_v54 = vadd.f32 %v2919_v46, %v793_v52  ;;  %v874_v55 = vadd.f32 %v2919_v46, %v873_v53 }
  0xd7   : > { %v1169_v10 = vmax.f32 %v952_v62, 0.0  ;;  %v1201_v11 = vmax.f32 %v1032_v63, 0.0 }
  0xd8   : > { %v1106_v58 = vmax.f32 %v794_v54, 0.0  ;;  %v1138_v59 = vmax.f32 %v874_v55, 0.0 }
  0xda   : > { %v2225_v60 = vpack.c.bf16 %v1106_v58, %v1105_v56  ;;  %v2305_v61 = vpack.c.bf16 %v1138_v59, %v1137_v57 }
  0xdc   : > { %2533 = vst [vmem:[%s2928_s12 + $0x10] sm:$0xff] %v2225_v60   ;;  %v953_v0 = vpop.f32.mrf.mxu2  ;;  %v1033_v1 = vpop.f32.mrf.mxu3 }
  0xdd   : > { %2549 = vst [vmem:[%s2928_s12 + $0x90] sm:$0xff] %v2305_v61   ;;  %v954_v4 = vadd.f32 %v2919_v46, %v953_v0  ;;  %v1034_v5 = vadd.f32 %v2919_v46, %v1033_v1  ;;  %v796_v6 = vpop.f32.mrf.mxu0  ;;  %v876_v7 = vpop.f32.mrf.mxu1 }
  0xde   : > { %v797_v16 = vadd.f32 %v2919_v46, %v796_v6  ;;  %v877_v17 = vadd.f32 %v2919_v46, %v876_v7 }
  0xdf   : > { %v1170_v12 = vmax.f32 %v954_v4, 0.0  ;;  %v1202_v13 = vmax.f32 %v1034_v5, 0.0  ;;  %v2166_v4 = vld [vmem:[%s2878_s21 + $0xe8] sm:$0xff] }
  0xe0   : > { %835 = vmatmul.bf16.gmra.mxu0 %v2148_v2  ;;  %915 = vmatmul.bf16.gmra.mxu1 %v2164_v3  ;;  %v1107_v24 = vmax.f32 %v797_v16, 0.0  ;;  %v1139_v25 = vmax.f32 %v877_v17, 0.0  ;;  %v2150_v3 = vld [vmem:[%s2878_s21 + $0x68] sm:$0xff] }
  0xe1   : > { %v2385_v14 = vpack.c.bf16 %v1170_v12, %v1169_v10  ;;  %v2465_v15 = vpack.c.bf16 %v1202_v13, %v1201_v11  ;;  %995 = vmatmul.bf16.gmra.mxu2 %v2180_v8  ;;  %1075 = vmatmul.bf16.gmra.mxu3 %v2196_v9  ;;  %v2182_v9 = vld [vmem:[%s2878_s21 + $0x168] sm:$0xff] }
  0xe2   : > { %v2198_v10 = vld [vmem:[%s2878_s21 + $0x1e8] sm:$0xff] }
  0xe3   : > { %2565 = vst [vmem:[%s2928_s12 + $0x110] sm:$0xff] %v2385_v14  }
  0xe4   : > { %2581 = vst [vmem:[%s2928_s12 + $0x190] sm:$0xff] %v2465_v15   ;;  %v956_v18 = vpop.f32.mrf.mxu2  ;;  %v1036_v19 = vpop.f32.mrf.mxu3 }
  0xe5   : > { %v798_v20 = vpop.f32.mrf.mxu0  ;;  %v878_v21 = vpop.f32.mrf.mxu1  ;;  %v957_v30 = vadd.f32 %v2919_v46, %v956_v18  ;;  %v1037_v31 = vadd.f32 %v2919_v46, %v1036_v19 }
  0xe6   : > { %v799_v22 = vadd.f32 %v2919_v46, %v798_v20  ;;  %v879_v23 = vadd.f32 %v2919_v46, %v878_v21 }
  0xe7   : > { %v1171_v42 = vmax.f32 %v957_v30, 0.0  ;;  %v1203_v43 = vmax.f32 %v1037_v31, 0.0 }
  0xe8   : > { %v1108_v26 = vmax.f32 %v799_v22, 0.0  ;;  %v1140_v27 = vmax.f32 %v879_v23, 0.0 }
  0xea   : > { %v2230_v28 = vpack.c.bf16 %v1108_v26, %v1107_v24  ;;  %v2310_v29 = vpack.c.bf16 %v1140_v27, %v1139_v25 }
  0xec   : > { %2534 = vst [vmem:[%s2928_s12 + $0x18] sm:$0xff] %v2230_v28   ;;  %v958_v32 = vpop.f32.mrf.mxu2  ;;  %v1038_v33 = vpop.f32.mrf.mxu3 }
  0xed   : > { %2550 = vst [vmem:[%s2928_s12 + $0x98] sm:$0xff] %v2310_v29   ;;  %v959_v36 = vadd.f32 %v2919_v46, %v958_v32  ;;  %v1039_v37 = vadd.f32 %v2919_v46, %v1038_v33  ;;  %v801_v38 = vpop.f32.mrf.mxu0  ;;  %v881_v39 = vpop.f32.mrf.mxu1 }
  0xee   : > { %v802_v49 = vadd.f32 %v2919_v46, %v801_v38  ;;  %v882_v50 = vadd.f32 %v2919_v46, %v881_v39 }
  0xef   : > { %v1172_v44 = vmax.f32 %v959_v36, 0.0  ;;  %v1204_v45 = vmax.f32 %v1039_v37, 0.0  ;;  %v2167_v36 = vld [vmem:[%s2878_s21 + $0xf0] sm:$0xff] }
  0xf0   : > { %840 = vmatmul.bf16.gmra.mxu0 %v2149_v34  ;;  %920 = vmatmul.bf16.gmra.mxu1 %v2165_v35  ;;  %v1109_v57 = vmax.f32 %v802_v49, 0.0  ;;  %v1141_v58 = vmax.f32 %v882_v50, 0.0  ;;  %v2151_v35 = vld [vmem:[%s2878_s21 + $0x70] sm:$0xff] }
  0xf1   : > { %v2390_v47 = vpack.c.bf16 %v1172_v44, %v1171_v42  ;;  %v2470_v48 = vpack.c.bf16 %v1204_v45, %v1203_v43  ;;  %1000 = vmatmul.bf16.gmra.mxu2 %v2181_v40  ;;  %1080 = vmatmul.bf16.gmra.mxu3 %v2197_v41  ;;  %v2183_v41 = vld [vmem:[%s2878_s21 + $0x170] sm:$0xff] }
  0xf2   : > { %v2199_v42 = vld [vmem:[%s2878_s21 + $0x1f0] sm:$0xff] }
  0xf3   : > { %2566 = vst [vmem:[%s2928_s12 + $0x118] sm:$0xff] %v2390_v47  }
  0xf4   : > { %2582 = vst [vmem:[%s2928_s12 + $0x198] sm:$0xff] %v2470_v48   ;;  %v961_v51 = vpop.f32.mrf.mxu2  ;;  %v1041_v52 = vpop.f32.mrf.mxu3 }
  0xf5   : > { %v803_v53 = vpop.f32.mrf.mxu0  ;;  %v883_v54 = vpop.f32.mrf.mxu1  ;;  %v962_v63 = vadd.f32 %v2919_v46, %v961_v51  ;;  %v1042_v0 = vadd.f32 %v2919_v46, %v1041_v52 }
  0xf6   : > { %v804_v55 = vadd.f32 %v2919_v46, %v803_v53  ;;  %v884_v56 = vadd.f32 %v2919_v46, %v883_v54 }
  0xf7   : > { %v1173_v11 = vmax.f32 %v962_v63, 0.0  ;;  %v1205_v12 = vmax.f32 %v1042_v0, 0.0 }
  0xf8   : > { %v1110_v59 = vmax.f32 %v804_v55, 0.0  ;;  %v1142_v60 = vmax.f32 %v884_v56, 0.0 }
  0xfa   : > { %v2235_v61 = vpack.c.bf16 %v1110_v59, %v1109_v57  ;;  %v2315_v62 = vpack.c.bf16 %v1142_v60, %v1141_v58 }
  0xfc   : > { %2535 = vst [vmem:[%s2928_s12 + $0x20] sm:$0xff] %v2235_v61   ;;  %v963_v1 = vpop.f32.mrf.mxu2  ;;  %v1043_v2 = vpop.f32.mrf.mxu3 }
  0xfd   : > { %2551 = vst [vmem:[%s2928_s12 + $0xa0] sm:$0xff] %v2315_v62   ;;  %v964_v5 = vadd.f32 %v2919_v46, %v963_v1  ;;  %v1044_v6 = vadd.f32 %v2919_v46, %v1043_v2  ;;  %v806_v7 = vpop.f32.mrf.mxu0  ;;  %v886_v8 = vpop.f32.mrf.mxu1 }
  0xfe   : > { %v807_v17 = vadd.f32 %v2919_v46, %v806_v7  ;;  %v887_v18 = vadd.f32 %v2919_v46, %v886_v8 }
  0xff   : > { %v1174_v13 = vmax.f32 %v964_v5, 0.0  ;;  %v1206_v14 = vmax.f32 %v1044_v6, 0.0  ;;  %v2168_v5 = vld [vmem:[%s2878_s21 + $0xf8] sm:$0xff] }
 0x100   : > { %845 = vmatmul.bf16.gmra.mxu0 %v2150_v3  ;;  %925 = vmatmul.bf16.gmra.mxu1 %v2166_v4  ;;  %v1111_v25 = vmax.f32 %v807_v17, 0.0  ;;  %v1143_v26 = vmax.f32 %v887_v18, 0.0  ;;  %v2152_v4 = vld [vmem:[%s2878_s21 + $0x78] sm:$0xff] }
 0x101   : > { %v2395_v15 = vpack.c.bf16 %v1174_v13, %v1173_v11  ;;  %v2475_v16 = vpack.c.bf16 %v1206_v14, %v1205_v12  ;;  %1005 = vmatmul.bf16.gmra.mxu2 %v2182_v9  ;;  %1085 = vmatmul.bf16.gmra.mxu3 %v2198_v10  ;;  %v2184_v10 = vld [vmem:[%s2878_s21 + $0x178] sm:$0xff] }
 0x102   : > { %v2200_v11 = vld [vmem:[%s2878_s21 + $0x1f8] sm:$0xff] }
 0x103   : > { %2567 = vst [vmem:[%s2928_s12 + $0x120] sm:$0xff] %v2395_v15  }
 0x104   : > { %2583 = vst [vmem:[%s2928_s12 + $0x1a0] sm:$0xff] %v2475_v16   ;;  %v966_v19 = vpop.f32.mrf.mxu2  ;;  %v1046_v20 = vpop.f32.mrf.mxu3 }
 0x105   : > { %v808_v21 = vpop.f32.mrf.mxu0  ;;  %v888_v22 = vpop.f32.mrf.mxu1  ;;  %v967_v31 = vadd.f32 %v2919_v46, %v966_v19  ;;  %v1047_v32 = vadd.f32 %v2919_v46, %v1046_v20 }
 0x106   : > { %v809_v23 = vadd.f32 %v2919_v46, %v808_v21  ;;  %v889_v24 = vadd.f32 %v2919_v46, %v888_v22 }
 0x107   : > { %v1175_v43 = vmax.f32 %v967_v31, 0.0  ;;  %v1207_v44 = vmax.f32 %v1047_v32, 0.0 }
 0x108   : > { %v1112_v27 = vmax.f32 %v809_v23, 0.0  ;;  %v1144_v28 = vmax.f32 %v889_v24, 0.0 }
 0x10a   : > { %v2240_v29 = vpack.c.bf16 %v1112_v27, %v1111_v25  ;;  %v2320_v30 = vpack.c.bf16 %v1144_v28, %v1143_v26 }
 0x10c   : > { %2536 = vst [vmem:[%s2928_s12 + $0x28] sm:$0xff] %v2240_v29   ;;  %v968_v33 = vpop.f32.mrf.mxu2  ;;  %v1048_v34 = vpop.f32.mrf.mxu3 }
 0x10d   : > { %2552 = vst [vmem:[%s2928_s12 + $0xa8] sm:$0xff] %v2320_v30   ;;  %v969_v37 = vadd.f32 %v2919_v46, %v968_v33  ;;  %v1049_v38 = vadd.f32 %v2919_v46, %v1048_v34  ;;  %v811_v39 = vpop.f32.mrf.mxu0  ;;  %v891_v40 = vpop.f32.mrf.mxu1 }
 0x10e   : > { %v812_v50 = vadd.f32 %v2919_v46, %v811_v39  ;;  %v892_v51 = vadd.f32 %v2919_v46, %v891_v40 }
 0x10f   : > { %v1176_v45 = vmax.f32 %v969_v37, 0.0  ;;  %v1208_v47 = vmax.f32 %v1049_v38, 0.0 }
 0x110   : > { %850 = vmatmul.bf16.gmra.mxu0 %v2151_v35  ;;  %930 = vmatmul.bf16.gmra.mxu1 %v2167_v36  ;;  %v1113_v58 = vmax.f32 %v812_v50, 0.0  ;;  %v1145_v59 = vmax.f32 %v892_v51, 0.0 }
 0x111   : > { %v2400_v48 = vpack.c.bf16 %v1176_v45, %v1175_v43  ;;  %v2480_v49 = vpack.c.bf16 %v1208_v47, %v1207_v44  ;;  %1010 = vmatmul.bf16.gmra.mxu2 %v2183_v41  ;;  %1090 = vmatmul.bf16.gmra.mxu3 %v2199_v42 }
 0x113   : > { %2568 = vst [vmem:[%s2928_s12 + $0x128] sm:$0xff] %v2400_v48  }
 0x114   : > { %2584 = vst [vmem:[%s2928_s12 + $0x1a8] sm:$0xff] %v2480_v49   ;;  %v971_v52 = vpop.f32.mrf.mxu2  ;;  %v1051_v53 = vpop.f32.mrf.mxu3 }
 0x115   : > { %v813_v54 = vpop.f32.mrf.mxu0  ;;  %v893_v55 = vpop.f32.mrf.mxu1  ;;  %v972_v0 = vadd.f32 %v2919_v46, %v971_v52  ;;  %v1052_v1 = vadd.f32 %v2919_v46, %v1051_v53 }
 0x116   : > { %v814_v56 = vadd.f32 %v2919_v46, %v813_v54  ;;  %v894_v57 = vadd.f32 %v2919_v46, %v893_v55 }
 0x117   : > { %v1177_v12 = vmax.f32 %v972_v0, 0.0  ;;  %v1209_v13 = vmax.f32 %v1052_v1, 0.0 }
 0x118   : > { %v1114_v60 = vmax.f32 %v814_v56, 0.0  ;;  %v1146_v61 = vmax.f32 %v894_v57, 0.0 }
 0x11a   : > { %v2245_v62 = vpack.c.bf16 %v1114_v60, %v1113_v58  ;;  %v2325_v63 = vpack.c.bf16 %v1146_v61, %v1145_v59 }
 0x11c   : > { %2537 = vst [vmem:[%s2928_s12 + $0x30] sm:$0xff] %v2245_v62   ;;  %v973_v2 = vpop.f32.mrf.mxu2  ;;  %v1053_v3 = vpop.f32.mrf.mxu3 }
 0x11d   : > { %2553 = vst [vmem:[%s2928_s12 + $0xb0] sm:$0xff] %v2325_v63   ;;  %v974_v6 = vadd.f32 %v2919_v46, %v973_v2  ;;  %v1054_v7 = vadd.f32 %v2919_v46, %v1053_v3  ;;  %v816_v8 = vpop.f32.mrf.mxu0  ;;  %v896_v9 = vpop.f32.mrf.mxu1 }
 0x11e   : > { %v817_v18 = vadd.f32 %v2919_v46, %v816_v8  ;;  %v897_v19 = vadd.f32 %v2919_v46, %v896_v9 }
 0x11f   : > { %v1178_v14 = vmax.f32 %v974_v6, 0.0  ;;  %v1210_v15 = vmax.f32 %v1054_v7, 0.0 }
 0x120   : > { %855 = vmatmul.bf16.gmra.mxu0 %v2152_v4  ;;  %935 = vmatmul.bf16.gmra.mxu1 %v2168_v5  ;;  %v1115_v26 = vmax.f32 %v817_v18, 0.0  ;;  %v1147_v27 = vmax.f32 %v897_v19, 0.0 }
 0x121   : > { %v2405_v16 = vpack.c.bf16 %v1178_v14, %v1177_v12  ;;  %v2485_v17 = vpack.c.bf16 %v1210_v15, %v1209_v13  ;;  %1015 = vmatmul.bf16.gmra.mxu2 %v2184_v10  ;;  %1095 = vmatmul.bf16.gmra.mxu3 %v2200_v11 }
 0x123   : > { %2569 = vst [vmem:[%s2928_s12 + $0x130] sm:$0xff] %v2405_v16  }
 0x124   : > { %2585 = vst [vmem:[%s2928_s12 + $0x1b0] sm:$0xff] %v2485_v17   ;;  %v976_v20 = vpop.f32.mrf.mxu2  ;;  %v1056_v21 = vpop.f32.mrf.mxu3 }
 0x125   : > { %v818_v22 = vpop.f32.mrf.mxu0  ;;  %v898_v23 = vpop.f32.mrf.mxu1  ;;  %v977_v32 = vadd.f32 %v2919_v46, %v976_v20  ;;  %v1057_v33 = vadd.f32 %v2919_v46, %v1056_v21 }
 0x126   : > { %v819_v24 = vadd.f32 %v2919_v46, %v818_v22  ;;  %v899_v25 = vadd.f32 %v2919_v46, %v898_v23 }
 0x127   : > { %v1179_v40 = vmax.f32 %v977_v32, 0.0  ;;  %v1211_v41 = vmax.f32 %v1057_v33, 0.0 }
 0x128   : > { %v1116_v28 = vmax.f32 %v819_v24, 0.0  ;;  %v1148_v29 = vmax.f32 %v899_v25, 0.0 }
 0x12a   : > { %v2250_v30 = vpack.c.bf16 %v1116_v28, %v1115_v26  ;;  %v2330_v31 = vpack.c.bf16 %v1148_v29, %v1147_v27 }
 0x12c   : > { %2538 = vst [vmem:[%s2928_s12 + $0x38] sm:$0xff] %v2250_v30   ;;  %v978_v34 = vpop.f32.mrf.mxu2  ;;  %v1058_v35 = vpop.f32.mrf.mxu3 }
 0x12d   : > { %2554 = vst [vmem:[%s2928_s12 + $0xb8] sm:$0xff] %v2330_v31   ;;  %v979_v36 = vadd.f32 %v2919_v46, %v978_v34  ;;  %v1059_v37 = vadd.f32 %v2919_v46, %v1058_v35  ;;  %v821_v38 = vpop.f32.mrf.mxu0  ;;  %v901_v39 = vpop.f32.mrf.mxu1 }
 0x12e   : > { %v822_v47 = vadd.f32 %v2919_v46, %v821_v38  ;;  %v902_v48 = vadd.f32 %v2919_v46, %v901_v39 }
 0x12f   : > { %v1180_v42 = vmax.f32 %v979_v36, 0.0  ;;  %v1212_v43 = vmax.f32 %v1059_v37, 0.0 }
 0x130   : > { %v1117_v55 = vmax.f32 %v822_v47, 0.0  ;;  %v1149_v56 = vmax.f32 %v902_v48, 0.0 }
 0x131   : > { %v2410_v44 = vpack.c.bf16 %v1180_v42, %v1179_v40  ;;  %v2490_v45 = vpack.c.bf16 %v1212_v43, %v1211_v41 }
 0x133   : > { %2570 = vst [vmem:[%s2928_s12 + $0x138] sm:$0xff] %v2410_v44  }
 0x134   : > { %2586 = vst [vmem:[%s2928_s12 + $0x1b8] sm:$0xff] %v2490_v45   ;;  %v981_v49 = vpop.f32.mrf.mxu2  ;;  %v1061_v50 = vpop.f32.mrf.mxu3 }
 0x135   : > { %v823_v51 = vpop.f32.mrf.mxu0  ;;  %v903_v52 = vpop.f32.mrf.mxu1  ;;  %v982_v61 = vadd.f32 %v2919_v46, %v981_v49  ;;  %v1062_v62 = vadd.f32 %v2919_v46, %v1061_v50 }
 0x136   : > { %v824_v53 = vadd.f32 %v2919_v46, %v823_v51  ;;  %v904_v54 = vadd.f32 %v2919_v46, %v903_v52 }
 0x137   : > { %v1181_v5 = vmax.f32 %v982_v61, 0.0  ;;  %v1213_v6 = vmax.f32 %v1062_v62, 0.0 }
 0x138   : > { %v1118_v57 = vmax.f32 %v824_v53, 0.0  ;;  %v1150_v58 = vmax.f32 %v904_v54, 0.0 }
 0x13a   : > { %v2255_v59 = vpack.c.bf16 %v1118_v57, %v1117_v55  ;;  %v2335_v60 = vpack.c.bf16 %v1150_v58, %v1149_v56 }
 0x13c   : > { %2539 = vst [vmem:[%s2928_s12 + $0x40] sm:$0xff] %v2255_v59   ;;  %v983_v63 = vpop.f32.mrf.mxu2  ;;  %v1063_v0 = vpop.f32.mrf.mxu3 }
 0x13d   : > { %2555 = vst [vmem:[%s2928_s12 + $0xc0] sm:$0xff] %v2335_v60   ;;  %v984_v1 = vadd.f32 %v2919_v46, %v983_v63  ;;  %v1064_v2 = vadd.f32 %v2919_v46, %v1063_v0  ;;  %v826_v3 = vpop.f32.mrf.mxu0  ;;  %v906_v4 = vpop.f32.mrf.mxu1 }
 0x13e   : > { %v827_v11 = vadd.f32 %v2919_v46, %v826_v3  ;;  %v907_v12 = vadd.f32 %v2919_v46, %v906_v4 }
 0x13f   : > { %v1182_v7 = vmax.f32 %v984_v1, 0.0  ;;  %v1214_v8 = vmax.f32 %v1064_v2, 0.0 }
 0x140   : > { %v1119_v19 = vmax.f32 %v827_v11, 0.0  ;;  %v1151_v20 = vmax.f32 %v907_v12, 0.0 }
 0x141   : > { %v2415_v9 = vpack.c.bf16 %v1182_v7, %v1181_v5  ;;  %v2495_v10 = vpack.c.bf16 %v1214_v8, %v1213_v6 }
 0x143   : > { %2571 = vst [vmem:[%s2928_s12 + $0x140] sm:$0xff] %v2415_v9  }
 0x144   : > { %2587 = vst [vmem:[%s2928_s12 + $0x1c0] sm:$0xff] %v2495_v10   ;;  %v986_v13 = vpop.f32.mrf.mxu2  ;;  %v1066_v14 = vpop.f32.mrf.mxu3 }
 0x145   : > { %v828_v15 = vpop.f32.mrf.mxu0  ;;  %v908_v16 = vpop.f32.mrf.mxu1  ;;  %v987_v25 = vadd.f32 %v2919_v46, %v986_v13  ;;  %v1067_v26 = vadd.f32 %v2919_v46, %v1066_v14 }
 0x146   : > { %v829_v17 = vadd.f32 %v2919_v46, %v828_v15  ;;  %v909_v18 = vadd.f32 %v2919_v46, %v908_v16 }
 0x147   : > { %v1183_v33 = vmax.f32 %v987_v25, 0.0  ;;  %v1215_v34 = vmax.f32 %v1067_v26, 0.0 }
 0x148   : > { %v1120_v21 = vmax.f32 %v829_v17, 0.0  ;;  %v1152_v22 = vmax.f32 %v909_v18, 0.0 }
 0x14a   : > { %v2260_v23 = vpack.c.bf16 %v1120_v21, %v1119_v19  ;;  %v2340_v24 = vpack.c.bf16 %v1152_v22, %v1151_v20 }
 0x14c   : > { %2540 = vst [vmem:[%s2928_s12 + $0x48] sm:$0xff] %v2260_v23   ;;  %v988_v27 = vpop.f32.mrf.mxu2  ;;  %v1068_v28 = vpop.f32.mrf.mxu3 }
 0x14d   : > { %2556 = vst [vmem:[%s2928_s12 + $0xc8] sm:$0xff] %v2340_v24   ;;  %v989_v29 = vadd.f32 %v2919_v46, %v988_v27  ;;  %v1069_v30 = vadd.f32 %v2919_v46, %v1068_v28  ;;  %v831_v31 = vpop.f32.mrf.mxu0  ;;  %v911_v32 = vpop.f32.mrf.mxu1 }
 0x14e   : > { %v832_v39 = vadd.f32 %v2919_v46, %v831_v31  ;;  %v912_v40 = vadd.f32 %v2919_v46, %v911_v32 }
 0x14f   : > { %v1184_v35 = vmax.f32 %v989_v29, 0.0  ;;  %v1216_v36 = vmax.f32 %v1069_v30, 0.0 }
 0x150   : > { %v1121_v48 = vmax.f32 %v832_v39, 0.0  ;;  %v1153_v49 = vmax.f32 %v912_v40, 0.0 }
 0x151   : > { %v2420_v37 = vpack.c.bf16 %v1184_v35, %v1183_v33  ;;  %v2500_v38 = vpack.c.bf16 %v1216_v36, %v1215_v34 }
 0x153   : > { %2572 = vst [vmem:[%s2928_s12 + $0x148] sm:$0xff] %v2420_v37  }
 0x154   : > { %2588 = vst [vmem:[%s2928_s12 + $0x1c8] sm:$0xff] %v2500_v38   ;;  %v991_v41 = vpop.f32.mrf.mxu2  ;;  %v1071_v42 = vpop.f32.mrf.mxu3 }
 0x155   : > { %v833_v43 = vpop.f32.mrf.mxu0  ;;  %v913_v44 = vpop.f32.mrf.mxu1  ;;  %v992_v54 = vadd.f32 %v2919_v46, %v991_v41  ;;  %v1072_v55 = vadd.f32 %v2919_v46, %v1071_v42 }
 0x156   : > { %v834_v45 = vadd.f32 %v2919_v46, %v833_v43  ;;  %v914_v47 = vadd.f32 %v2919_v46, %v913_v44 }
 0x157   : > { %v1185_v62 = vmax.f32 %v992_v54, 0.0  ;;  %v1217_v63 = vmax.f32 %v1072_v55, 0.0 }
 0x158   : > { %v1122_v50 = vmax.f32 %v834_v45, 0.0  ;;  %v1154_v51 = vmax.f32 %v914_v47, 0.0 }
 0x15a   : > { %v2265_v52 = vpack.c.bf16 %v1122_v50, %v1121_v48  ;;  %v2345_v53 = vpack.c.bf16 %v1154_v51, %v1153_v49 }
 0x15c   : > { %2541 = vst [vmem:[%s2928_s12 + $0x50] sm:$0xff] %v2265_v52   ;;  %v993_v56 = vpop.f32.mrf.mxu2  ;;  %v1073_v57 = vpop.f32.mrf.mxu3 }
 0x15d   : > { %2557 = vst [vmem:[%s2928_s12 + $0xd0] sm:$0xff] %v2345_v53   ;;  %v994_v58 = vadd.f32 %v2919_v46, %v993_v56  ;;  %v1074_v59 = vadd.f32 %v2919_v46, %v1073_v57  ;;  %v836_v60 = vpop.f32.mrf.mxu0  ;;  %v916_v61 = vpop.f32.mrf.mxu1 }
 0x15e   : > { %v837_v4 = vadd.f32 %v2919_v46, %v836_v60  ;;  %v917_v5 = vadd.f32 %v2919_v46, %v916_v61 }
 0x15f   : > { %v1186_v0 = vmax.f32 %v994_v58, 0.0  ;;  %v1218_v1 = vmax.f32 %v1074_v59, 0.0 }
 0x160   : > { %v1123_v12 = vmax.f32 %v837_v4, 0.0  ;;  %v1155_v13 = vmax.f32 %v917_v5, 0.0 }
 0x161   : > { %v2425_v2 = vpack.c.bf16 %v1186_v0, %v1185_v62  ;;  %v2505_v3 = vpack.c.bf16 %v1218_v1, %v1217_v63 }
 0x163   : > { %2573 = vst [vmem:[%s2928_s12 + $0x150] sm:$0xff] %v2425_v2  }
 0x164   : > { %2589 = vst [vmem:[%s2928_s12 + $0x1d0] sm:$0xff] %v2505_v3   ;;  %v996_v6 = vpop.f32.mrf.mxu2  ;;  %v1076_v7 = vpop.f32.mrf.mxu3 }
 0x165   : > { %v838_v8 = vpop.f32.mrf.mxu0  ;;  %v918_v9 = vpop.f32.mrf.mxu1  ;;  %v997_v18 = vadd.f32 %v2919_v46, %v996_v6  ;;  %v1077_v19 = vadd.f32 %v2919_v46, %v1076_v7 }
 0x166   : > { %v839_v10 = vadd.f32 %v2919_v46, %v838_v8  ;;  %v919_v11 = vadd.f32 %v2919_v46, %v918_v9 }
 0x167   : > { %v1187_v26 = vmax.f32 %v997_v18, 0.0  ;;  %v1219_v27 = vmax.f32 %v1077_v19, 0.0 }
 0x168   : > { %v1124_v14 = vmax.f32 %v839_v10, 0.0  ;;  %v1156_v15 = vmax.f32 %v919_v11, 0.0 }
 0x16a   : > { %v2270_v16 = vpack.c.bf16 %v1124_v14, %v1123_v12  ;;  %v2350_v17 = vpack.c.bf16 %v1156_v15, %v1155_v13 }
 0x16c   : > { %2542 = vst [vmem:[%s2928_s12 + $0x58] sm:$0xff] %v2270_v16   ;;  %v998_v20 = vpop.f32.mrf.mxu2  ;;  %v1078_v21 = vpop.f32.mrf.mxu3 }
 0x16d   : > { %2558 = vst [vmem:[%s2928_s12 + $0xd8] sm:$0xff] %v2350_v17   ;;  %v999_v22 = vadd.f32 %v2919_v46, %v998_v20  ;;  %v1079_v23 = vadd.f32 %v2919_v46, %v1078_v21  ;;  %v841_v24 = vpop.f32.mrf.mxu0  ;;  %v921_v25 = vpop.f32.mrf.mxu1 }
 0x16e   : > { %v842_v32 = vadd.f32 %v2919_v46, %v841_v24  ;;  %v922_v33 = vadd.f32 %v2919_v46, %v921_v25  ;;  %v2708_v25 = vld [vmem:[%s3275_s2] ss:$0 sm:$0xff] }
 0x16f   : > { %v1188_v28 = vmax.f32 %v999_v22, 0.0  ;;  %v1220_v29 = vmax.f32 %v1079_v23, 0.0 }
 0x170   : > { %v1125_v40 = vmax.f32 %v842_v32, 0.0  ;;  %v1157_v41 = vmax.f32 %v922_v33, 0.0 }
 0x171   : > { %v2430_v30 = vpack.c.bf16 %v1188_v28, %v1187_v26  ;;  %v2510_v31 = vpack.c.bf16 %v1220_v29, %v1219_v27 }
 0x173   : > { %2574 = vst [vmem:[%s2928_s12 + $0x158] sm:$0xff] %v2430_v30  }
 0x174   : > { %2590 = vst [vmem:[%s2928_s12 + $0x1d8] sm:$0xff] %v2510_v31   ;;  %v1001_v34 = vpop.f32.mrf.mxu2  ;;  %v1081_v35 = vpop.f32.mrf.mxu3 }
 0x175   : > { %v843_v36 = vpop.f32.mrf.mxu0  ;;  %v923_v37 = vpop.f32.mrf.mxu1  ;;  %v1002_v47 = vadd.f32 %v2919_v46, %v1001_v34  ;;  %v1082_v48 = vadd.f32 %v2919_v46, %v1081_v35 }
 0x176   : > { %v844_v38 = vadd.f32 %v2919_v46, %v843_v36  ;;  %v924_v39 = vadd.f32 %v2919_v46, %v923_v37 }
 0x177   : > { %v1189_v55 = vmax.f32 %v1002_v47, 0.0  ;;  %v1221_v56 = vmax.f32 %v1082_v48, 0.0 }
 0x178   : > { %v1126_v42 = vmax.f32 %v844_v38, 0.0  ;;  %v1158_v43 = vmax.f32 %v924_v39, 0.0 }
 0x17a   : > { %v2275_v44 = vpack.c.bf16 %v1126_v42, %v1125_v40  ;;  %v2355_v45 = vpack.c.bf16 %v1158_v43, %v1157_v41 }
 0x17c   : > { %2543 = vst [vmem:[%s2928_s12 + $0x60] sm:$0xff] %v2275_v44   ;;  %v1003_v49 = vpop.f32.mrf.mxu2  ;;  %v1083_v50 = vpop.f32.mrf.mxu3 }
 0x17d   : > { %2559 = vst [vmem:[%s2928_s12 + $0xe0] sm:$0xff] %v2355_v45   ;;  %v1004_v51 = vadd.f32 %v2919_v46, %v1003_v49  ;;  %v1084_v52 = vadd.f32 %v2919_v46, %v1083_v50  ;;  %v846_v53 = vpop.f32.mrf.mxu0  ;;  %v926_v54 = vpop.f32.mrf.mxu1 }
 0x17e   : > { %v847_v61 = vadd.f32 %v2919_v46, %v846_v53  ;;  %v927_v62 = vadd.f32 %v2919_v46, %v926_v54 }
 0x17f   : > { %v1190_v57 = vmax.f32 %v1004_v51, 0.0  ;;  %v1222_v58 = vmax.f32 %v1084_v52, 0.0 }
 0x180   : > { %v1127_v5 = vmax.f32 %v847_v61, 0.0  ;;  %v1159_v6 = vmax.f32 %v927_v62, 0.0 }
 0x181   : > { %v2435_v59 = vpack.c.bf16 %v1190_v57, %v1189_v55  ;;  %v2515_v60 = vpack.c.bf16 %v1222_v58, %v1221_v56 }
 0x183   : > { %2575 = vst [vmem:[%s2928_s12 + $0x160] sm:$0xff] %v2435_v59  }
 0x184   : > { %2591 = vst [vmem:[%s2928_s12 + $0x1e0] sm:$0xff] %v2515_v60   ;;  %v1006_v63 = vpop.f32.mrf.mxu2  ;;  %v1086_v0 = vpop.f32.mrf.mxu3 }
 0x185   : > { %v848_v1 = vpop.f32.mrf.mxu0  ;;  %v928_v2 = vpop.f32.mrf.mxu1  ;;  %v1007_v11 = vadd.f32 %v2919_v46, %v1006_v63  ;;  %v1087_v12 = vadd.f32 %v2919_v46, %v1086_v0 }
 0x186   : > { %v849_v3 = vadd.f32 %v2919_v46, %v848_v1  ;;  %v929_v4 = vadd.f32 %v2919_v46, %v928_v2 }
 0x187   : > { %v1191_v19 = vmax.f32 %v1007_v11, 0.0  ;;  %v1223_v20 = vmax.f32 %v1087_v12, 0.0 }
 0x188   : > { %v1128_v7 = vmax.f32 %v849_v3, 0.0  ;;  %v1160_v8 = vmax.f32 %v929_v4, 0.0 }
 0x18a   : > { %v2280_v9 = vpack.c.bf16 %v1128_v7, %v1127_v5  ;;  %v2360_v10 = vpack.c.bf16 %v1160_v8, %v1159_v6 }
 0x18c   : > { %2544 = vst [vmem:[%s2928_s12 + $0x68] sm:$0xff] %v2280_v9   ;;  %v1008_v13 = vpop.f32.mrf.mxu2  ;;  %v1088_v14 = vpop.f32.mrf.mxu3 }
 0x18d   : > { %2560 = vst [vmem:[%s2928_s12 + $0xe8] sm:$0xff] %v2360_v10   ;;  %v1009_v15 = vadd.f32 %v2919_v46, %v1008_v13  ;;  %v1089_v16 = vadd.f32 %v2919_v46, %v1088_v14  ;;  %v851_v17 = vpop.f32.mrf.mxu0  ;;  %v931_v18 = vpop.f32.mrf.mxu1 }
 0x18e   : > { %v852_v26 = vadd.f32 %v2708_v25, %v851_v17  ;;  %v932_v27 = vadd.f32 %v2708_v25, %v931_v18 }
 0x18f   : > { %v1192_v21 = vmax.f32 %v1009_v15, 0.0  ;;  %v1224_v22 = vmax.f32 %v1089_v16, 0.0 }
 0x190   : > { %v1129_v33 = vmax.f32 %v852_v26, 0.0  ;;  %v1161_v34 = vmax.f32 %v932_v27, 0.0 }
 0x191   : > { %v2440_v23 = vpack.c.bf16 %v1192_v21, %v1191_v19  ;;  %v2520_v24 = vpack.c.bf16 %v1224_v22, %v1223_v20 }
 0x193   : > { %2576 = vst [vmem:[%s2928_s12 + $0x168] sm:$0xff] %v2440_v23  }
 0x194   : > { %2592 = vst [vmem:[%s2928_s12 + $0x1e8] sm:$0xff] %v2520_v24   ;;  %v1011_v28 = vpop.f32.mrf.mxu2  ;;  %v1091_v29 = vpop.f32.mrf.mxu3 }
 0x195   : > { %v853_v46 = vpop.f32.mrf.mxu0  ;;  %v933_v30 = vpop.f32.mrf.mxu1  ;;  %v1012_v39 = vadd.f32 %v2708_v25, %v1011_v28  ;;  %v1092_v40 = vadd.f32 %v2708_v25, %v1091_v29 }
 0x196   : > { %v854_v31 = vadd.f32 %v2708_v25, %v853_v46  ;;  %v934_v32 = vadd.f32 %v2708_v25, %v933_v30 }
 0x197   : > { %v1193_v48 = vmax.f32 %v1012_v39, 0.0  ;;  %v1225_v49 = vmax.f32 %v1092_v40, 0.0 }
 0x198   : > { %v1130_v35 = vmax.f32 %v854_v31, 0.0  ;;  %v1162_v36 = vmax.f32 %v934_v32, 0.0 }
 0x19a   : > { %v2285_v37 = vpack.c.bf16 %v1130_v35, %v1129_v33  ;;  %v2365_v38 = vpack.c.bf16 %v1162_v36, %v1161_v34 }
 0x19c   : > { %2545 = vst [vmem:[%s2928_s12 + $0x70] sm:$0xff] %v2285_v37   ;;  %v1013_v41 = vpop.f32.mrf.mxu2  ;;  %v1093_v42 = vpop.f32.mrf.mxu3 }
 0x19d   : > { %2561 = vst [vmem:[%s2928_s12 + $0xf0] sm:$0xff] %v2365_v38   ;;  %v1014_v43 = vadd.f32 %v2708_v25, %v1013_v41  ;;  %v1094_v44 = vadd.f32 %v2708_v25, %v1093_v42  ;;  %v856_v45 = vpop.f32.mrf.mxu0  ;;  %v936_v47 = vpop.f32.mrf.mxu1 }
 0x19e   : > { %v857_v54 = vadd.f32 %v2708_v25, %v856_v45  ;;  %v937_v55 = vadd.f32 %v2708_v25, %v936_v47 }
 0x19f   : > { %v1194_v50 = vmax.f32 %v1014_v43, 0.0  ;;  %v1226_v51 = vmax.f32 %v1094_v44, 0.0 }
 0x1a0   : > { %v1131_v62 = vmax.f32 %v857_v54, 0.0  ;;  %v1163_v63 = vmax.f32 %v937_v55, 0.0 }
 0x1a1   : > { %v2445_v52 = vpack.c.bf16 %v1194_v50, %v1193_v48  ;;  %v2525_v53 = vpack.c.bf16 %v1226_v51, %v1225_v49 }
 0x1a3   : > { %2577 = vst [vmem:[%s2928_s12 + $0x170] sm:$0xff] %v2445_v52  }
 0x1a4   : > { %2593 = vst [vmem:[%s2928_s12 + $0x1f0] sm:$0xff] %v2525_v53   ;;  %v1016_v56 = vpop.f32.mrf.mxu2  ;;  %v1096_v57 = vpop.f32.mrf.mxu3 }
 0x1a5   : > { %v858_v58 = vpop.f32.mrf.mxu0  ;;  %v938_v59 = vpop.f32.mrf.mxu1  ;;  %v1017_v4 = vadd.f32 %v2708_v25, %v1016_v56  ;;  %v1097_v5 = vadd.f32 %v2708_v25, %v1096_v57 }
 0x1a6   : > { %v859_v60 = vadd.f32 %v2708_v25, %v858_v58  ;;  %v939_v61 = vadd.f32 %v2708_v25, %v938_v59 }
 0x1a7   : > { %v1195_v10 = vmax.f32 %v1017_v4, 0.0  ;;  %v1227_v11 = vmax.f32 %v1097_v5, 0.0 }
 0x1a8   : > { %v1132_v0 = vmax.f32 %v859_v60, 0.0  ;;  %v1164_v1 = vmax.f32 %v939_v61, 0.0 }
 0x1aa   : > { %v2290_v2 = vpack.c.bf16 %v1132_v0, %v1131_v62  ;;  %v2370_v3 = vpack.c.bf16 %v1164_v1, %v1163_v63 }
 0x1ac   : > { %2546 = vst [vmem:[%s2928_s12 + $0x78] sm:$0xff] %v2290_v2   ;;  %v1018_v6 = vpop.f32.mrf.mxu2  ;;  %v1098_v7 = vpop.f32.mrf.mxu3 }
 0x1ad   : > { %2562 = vst [vmem:[%s2928_s12 + $0xf8] sm:$0xff] %v2370_v3   ;;  %v1019_v8 = vadd.f32 %v2708_v25, %v1018_v6  ;;  %v1099_v9 = vadd.f32 %v2708_v25, %v1098_v7 }
 0x1af   : > { %v1196_v12 = vmax.f32 %v1019_v8, 0.0  ;;  %v1228_v13 = vmax.f32 %v1099_v9, 0.0 }
 0x1b0   : > { %1491 = sbr.rel (!%p2842_p4) target bundleno = 501 (0x1f5), region = 36 }
 0x1b1   : > { %v2450_v14 = vpack.c.bf16 %v1196_v12, %v1195_v10  ;;  %v2530_v15 = vpack.c.bf16 %v1228_v13, %v1227_v11 }
 0x1b3   : > { %2578 = vst [vmem:[%s2928_s12 + $0x178] sm:$0xff] %v2450_v14  }
 0x1b4   : > { %2594 = vst [vmem:[%s2928_s12 + $0x1f8] sm:$0xff] %v2530_v15  }
 0x1b5   : > { %s3287_s28 = smov (!%p1494_p8, %s1493_s28), 128 }
 0x1b6   : > { %s2122_s7 = sshll.u32 %s3287_s28, 2 }
 0x1b7   : > { %p2125_p9 = scmp.eq.s32.totalorder %s2122_s7, 0 }
 0x1b8   : > { %s3144_s8 = sshrl.u32 (!%p2125_p9), %s3287_s28, 5 }
 0x1b9   : > { %1502 = sbr.rel (%p2125_p9) target bundleno = 501 (0x1f5), region = 40  ;;  %p2126_p10 = scmp.le.s32.totalorder (!%p2125_p9), %s3144_s8, 0 }
 0x1be   : > { %1781 = sbr.rel (%p2126_p10) target bundleno = 484 (0x1e4), region = 112  ;;  %s3278_s15 = smov (!%p2126_p10), %s3138_s6 }
 0x1bf   : > { %s3279_s20 = smov (!%p2126_p10), %s2928_s12  ;;  %s3153_s29 = smov (!%p2126_p10), 0  }
 0x1c0   : > { %s3155_s9 = smov (!%p2126_p10), 0  }
 0x1c3 LB: >> { %v1519_v16 = vld [vmem:[%s2771_s20] sm:$0xf]  ;;  %v1521_v17 = vld [vmem:[%s2771_s20 + $0x4] sm:$0xf]  ;;  %v1523_v18 = vld [vmem:[%s2771_s20 + $0x8] sm:$0xf]  ;;  %s2779_s9 = sphi %s3155_s9, %s1513_s9   ;;  %s2775_s29 = sphi %s3153_s29, %s3282_s29   ;;  %s2771_s20 = sphi %s3279_s20, %s3281_s20   ;;  %s2767_s15 = sphi %s3278_s15, %s3280_s15  }
 0x1c4   : >> { %1520 = vst [vmem:[%s2767_s15] sm:$0xf] %v1519_v16  ;;  %v1525_v19 = vld [vmem:[%s2771_s20 + $0xc] sm:$0xf]  ;;  %v1527_v20 = vld [vmem:[%s2771_s20 + $0x10] sm:$0xf]  ;;  %s1583_s10 = sadd.s32 1, %s2775_s29 }
 0x1c5   : >> { %1522 = vst [vmem:[%s2767_s15 + $0x4] sm:$0xf] %v1521_v17  ;;  %v1529_v21 = vld [vmem:[%s2771_s20 + $0x14] sm:$0xf]  ;;  %v1531_v22 = vld [vmem:[%s2771_s20 + $0x18] sm:$0xf]  ;;  %p1584_p11 = scmp.ge.s32.totalorder %s1583_s10, %s3144_s8 }
 0x1c6   : >> { %1524 = vst [vmem:[%s2767_s15 + $0x8] sm:$0xf] %v1523_v18  ;;  %v1533_v23 = vld [vmem:[%s2771_s20 + $0x1c] sm:$0xf]  ;;  %v1535_v24 = vld [vmem:[%s2771_s20 + $0x20] sm:$0xf] }
 0x1c7   : >> { %1526 = vst [vmem:[%s2767_s15 + $0xc] sm:$0xf] %v1525_v19  ;;  %v1537_v25 = vld [vmem:[%s2771_s20 + $0x24] sm:$0xf]  ;;  %v1539_v26 = vld [vmem:[%s2771_s20 + $0x28] sm:$0xf] }
 0x1c8   : >> { %1528 = vst [vmem:[%s2767_s15 + $0x10] sm:$0xf] %v1527_v20  ;;  %v1541_v27 = vld [vmem:[%s2771_s20 + $0x2c] sm:$0xf]  ;;  %v1543_v28 = vld [vmem:[%s2771_s20 + $0x30] sm:$0xf] }
 0x1c9   : >> { %1530 = vst [vmem:[%s2767_s15 + $0x14] sm:$0xf] %v1529_v21  ;;  %v1545_v29 = vld [vmem:[%s2771_s20 + $0x34] sm:$0xf]  ;;  %v1547_v46 = vld [vmem:[%s2771_s20 + $0x38] sm:$0xf] }
 0x1ca   : >> { %1532 = vst [vmem:[%s2767_s15 + $0x18] sm:$0xf] %v1531_v22  ;;  %v1549_v30 = vld [vmem:[%s2771_s20 + $0x3c] sm:$0xf]  ;;  %v1551_v31 = vld [vmem:[%s2771_s20 + $0x40] sm:$0xf] }
 0x1cb   : >> { %1534 = vst [vmem:[%s2767_s15 + $0x1c] sm:$0xf] %v1533_v23  ;;  %v1553_v32 = vld [vmem:[%s2771_s20 + $0x44] sm:$0xf]  ;;  %s3289_s10 = smov (%p1584_p11, %s1583_s10), 0  ;;  %s1513_s9 = sadd.s32 1, %s2779_s9  }
 0x1cc   : >> { %1536 = vst [vmem:[%s2767_s15 + $0x20] sm:$0xf] %v1535_v24  ;;  %v1555_v33 = vld [vmem:[%s2771_s20 + $0x48] sm:$0xf]  ;;  %v1557_v34 = vld [vmem:[%s2771_s20 + $0x4c] sm:$0xf]  ;;  %p1512_p12 = scmp.ge.s32.totalorder %s1513_s9, %s3144_s8  ;;  %s3282_s29 = smov %s3289_s10 }
 0x1cd   : >> { %1538 = vst [vmem:[%s2767_s15 + $0x24] sm:$0xf] %v1537_v25  ;;  %s2127_s11 = sshll.u32 %s3289_s10, 7  ;;  %v1559_v35 = vld [vmem:[%s2771_s20 + $0x50] sm:$0xf] }
 0x1ce   : >> { %1540 = vst [vmem:[%s2767_s15 + $0x28] sm:$0xf] %v1539_v26  ;;  %s3214_s14 = scalar_lea.vmem %s2928_s12, %s2127_s11 [#allocation2]   ;;  %s1589_s17 = scalar_lea.vmem %s3138_s6, %s2127_s11   ;;  %v1561_v36 = vld [vmem:[%s2771_s20 + $0x54] sm:$0xf]  ;;  %v1563_v37 = vld [vmem:[%s2771_s20 + $0x58] sm:$0xf] }
 0x1cf   : >> { %1542 = vst [vmem:[%s2767_s15 + $0x2c] sm:$0xf] %v1541_v27  ;;  %v1565_v38 = vld [vmem:[%s2771_s20 + $0x5c] sm:$0xf]  ;;  %v1567_v39 = vld [vmem:[%s2771_s20 + $0x60] sm:$0xf] }
 0x1d0   : >> { %1544 = vst [vmem:[%s2767_s15 + $0x30] sm:$0xf] %v1543_v28  ;;  %v1569_v40 = vld [vmem:[%s2771_s20 + $0x64] sm:$0xf]  ;;  %v1571_v41 = vld [vmem:[%s2771_s20 + $0x68] sm:$0xf] }
 0x1d1   : >> { %1546 = vst [vmem:[%s2767_s15 + $0x34] sm:$0xf] %v1545_v29  ;;  %v1573_v42 = vld [vmem:[%s2771_s20 + $0x6c] sm:$0xf]  ;;  %v1575_v43 = vld [vmem:[%s2771_s20 + $0x70] sm:$0xf] }
 0x1d2   : >> { %1548 = vst [vmem:[%s2767_s15 + $0x38] sm:$0xf] %v1547_v46  ;;  %v1577_v44 = vld [vmem:[%s2771_s20 + $0x74] sm:$0xf]  ;;  %v1579_v45 = vld [vmem:[%s2771_s20 + $0x78] sm:$0xf] }
 0x1d3   : >> { %1550 = vst [vmem:[%s2767_s15 + $0x3c] sm:$0xf] %v1549_v30  ;;  %v1581_v47 = vld [vmem:[%s2771_s20 + $0x7c] sm:$0xf]  ;;  %s3281_s20 = smov %s3214_s14 }
 0x1d4   : >> { %1552 = vst [vmem:[%s2767_s15 + $0x40] sm:$0xf] %v1551_v31 }
 0x1d5   : >> { %1554 = vst [vmem:[%s2767_s15 + $0x44] sm:$0xf] %v1553_v32 }
 0x1d6   : >> { %1556 = vst [vmem:[%s2767_s15 + $0x48] sm:$0xf] %v1555_v33 }
 0x1d7   : >> { %1558 = vst [vmem:[%s2767_s15 + $0x4c] sm:$0xf] %v1557_v34 }
 0x1d8   : >> { %1560 = vst [vmem:[%s2767_s15 + $0x50] sm:$0xf] %v1559_v35 }
 0x1d9   : >> { %1562 = vst [vmem:[%s2767_s15 + $0x54] sm:$0xf] %v1561_v36 }
 0x1da   : >> { %1564 = vst [vmem:[%s2767_s15 + $0x58] sm:$0xf] %v1563_v37 }
 0x1db   : >> { %1566 = vst [vmem:[%s2767_s15 + $0x5c] sm:$0xf] %v1565_v38 }
 0x1dc   : >> { %1568 = vst [vmem:[%s2767_s15 + $0x60] sm:$0xf] %v1567_v39 }
 0x1dd   : >> { %1570 = vst [vmem:[%s2767_s15 + $0x64] sm:$0xf] %v1569_v40 }
 0x1de   : >> { %1572 = vst [vmem:[%s2767_s15 + $0x68] sm:$0xf] %v1571_v41 }
 0x1df   : >> { %1574 = vst [vmem:[%s2767_s15 + $0x6c] sm:$0xf] %v1573_v42  ;;  %1515 = sbr.rel (!%p1512_p12) target bundleno = 451 (0x1c3), region = 118 }
 0x1e0   : >> { %1576 = vst [vmem:[%s2767_s15 + $0x70] sm:$0xf] %v1575_v43 }
 0x1e1   : >> { %1578 = vst [vmem:[%s2767_s15 + $0x74] sm:$0xf] %v1577_v44 }
 0x1e2   : >> { %1580 = vst [vmem:[%s2767_s15 + $0x78] sm:$0xf] %v1579_v45 }
 0x1e3   : >> { %1582 = vst [vmem:[%s2767_s15 + $0x7c] sm:$0xf] %v1581_v47  ;;  %s3280_s15 = smov %s1589_s17 }
 0x1e4 PF: > { %s3255_s18 = sand.u32 31, %s3287_s28   ;;  %s2210_s21 = sshll.u32 %s3144_s8, 7 }
 0x1e5   : > { %s1594_s22 = scalar_lea.vmem %s2928_s12, %s2210_s21 [#allocation2]   ;;  %s1596_s23 = scalar_lea.vmem %s3138_s6, %s2210_s21  }
 0x1e6   : > { %p2132_p13 = scmp.le.s32.totalorder %s3255_s18, 0 }
 0x1e7   : > { %s2781_s24 = smov (!%p2132_p13), %s1596_s23   ;;  %s2785_s25 = smov (!%p2132_p13), %s1594_s22  }
 0x1e8   : > { %1795 = sbr.rel (%p2132_p13) target bundleno = 501 (0x1f5), region = 123  ;;  %s2789_s26 = smov (!%p2132_p13), 0  }
 0x1e9   : > { %s2793_s27 = smov (!%p2132_p13), 0  }
 0x1ed LB: >> { %v1606_v48 = vld [vmem:[%s2787_s25] sm:$0xf]  ;;  %s1608_s28 = sadd.s32 1, %s2791_s26  ;;  %s1600_s27 = sadd.s32 1, %s2795_s27   ;;  %s2795_s27 = sphi %s2793_s27, %s1600_s27   ;;  %s2791_s26 = sphi %s2789_s26, %s2790_s26   ;;  %s2787_s25 = sphi %s2785_s25, %s1613_s25   ;;  %s2783_s24 = sphi %s2781_s24, %s1614_s24  }
 0x1ee   : >> { %1607 = vst [vmem:[%s2783_s24] sm:$0xf] %v1606_v48  ;;  %p1609_p0 = scmp.ge.s32.totalorder %s1608_s28, %s3255_s18  ;;  %p1599_p1 = scmp.ge.s32.totalorder %s1600_s27, %s3255_s18 }
 0x1f0   : >> { %s3291_s28 = smov (%p1609_p0, %s1608_s28), 0  ;;  %1602 = sbr.rel (!%p1599_p1) target bundleno = 493 (0x1ed), region = 129 }
 0x1f1   : >> { %s2133_s12 = sshll.u32 %s3291_s28, 2  ;;  %s2790_s26 = smov %s3291_s28  }
 0x1f2   : >> { %s1613_s25 = scalar_lea.vmem %s1594_s22, %s2133_s12 [#allocation2]   ;;  %s1614_s24 = scalar_lea.vmem %s1596_s23, %s2133_s12  }
 0x1f5 PF: > { %p10_p2 = scmp.ge.s32.totalorder %s2832_s16, 4   ;;  %s3283_s12 = smov %s2759_s13 }
 0x1f6   : > { %s3284_s13 = smov %s2840_s19  ;;  %s3285_s14 = smov %s2832_s16 }
 0x1f7   :  { %12 = sbr.rel (!%p10_p2) target bundleno = 2 (0x2), region = 140 }

// kernel: cnn_forward.6
= control target key start
LH: loop header
LB: loop body
LE: loop exit
PB: predicated region body
PF: predicated region fallthrough
CT: control target
= control target key end

     0   :  { %s1299_s6 = smov 0   ;;  %s1301_s7 = smov 0   ;;  %s1636_s0 = inlined_call_operand.vmem [shape: bf16[30,2,15,256], index: 0, kind: input, shape index: {}]   ;;  %s1637_s1 = inlined_call_operand.vmem [shape: bf16[30,15,128], index: 1, kind: output, shape index: {}]  }
   0x1   :  { %s1303_s8 = smov 0  }
   0x2 LB: > { %s1312_s9 = sadd.s32 4294967295, %s1255_s8   ;;  %s1314_s10 = sadd.s32 1, %s1255_s8   ;;  %s1255_s8 = sphi %s1303_s8, %s1648_s8   ;;  %s1251_s7 = sphi %s1301_s7, %s1647_s7   ;;  %s1247_s6 = sphi %s1299_s6, %s1646_s6  }
   0x3   : > { %s41_s11 = ssub.s32 %s1255_s8, %s1314_s10  ;;  %s44_s12 = sadd.s32 1, %s1251_s7 }
   0x4   : > { %p42_p0 = scmp.eq.s32.totalorder %s41_s11, 0  ;;  %p54_p1 = scmp.ne.s32.totalorder %s1251_s7, %s1247_s6 }
   0x5   : > { %p55_p2 = scmp.eq.s32.totalorder %s1312_s9, 1  ;;  %p1082_p3 = scmp.ge.s32.totalorder %s1255_s8, 1 }
   0x6   : > { %s1322_s13 = scalar_select %p42_p0, %s1251_s7, %s44_s12  }
   0x7   : > { %p1324_p4 = por %p55_p2, %p54_p1  ;;  %p103_p5 = scmp.lt.s32.totalorder %s1255_s8, 3 }
   0x9   : > { %p104_p6 = pnand %p1082_p3, %p103_p5 }
   0xa   : > { %s1329_s15 = sshll.u32 (!%p104_p6), %s1312_s9, 4  ;;  %s127_s21 = sand.u32 (!%p104_p6), 1, %s1247_s6  }
   0xb   : > { %107 = sbr.rel (%p104_p6) target bundleno = 187 (0xbb), region = 24  ;;  %p138_p7 = scmp.lt.s32.totalorder (!%p104_p6), %s1329_s15, 29 }
   0xc   : > { %s1083_s22 = sshll.u32 (!%p104_p6), %s127_s21, 7 }
   0xd   : > { %s1359_s23 = scalar_lea.vmem (!%p104_p6), [#allocation2], %s1083_s22  }
  0x10   : > { %s139_s16 = scalar_select %p138_p7, %s1329_s15, 29  ;;  %vm670_vm0 = vcmask 1043456   ;;  %vm671_vm1 = vsmask.f32 3328 }
  0x11   : > { %vm1355_vm2 = vmand %vm670_vm0, %vm671_vm1  ;;  %s744_s24 = ssub.s32 (%p1324_p4), 30, %s1329_s15  ;;  %s1110_s25 = sshll.u32 (%p1324_p4), %s1312_s9, 7 }
  0x12   : > { %s1107_s17 = sshll.u32 %s139_s16, 5  ;;  %p745_p8 = scmp.lt.s32.totalorder (%p1324_p4), %s744_s24, 16 }
  0x13   : > { %s1336_s20 = scalar_lea.vmem %s1636_s0, %s1107_s17  ;;  %s1498_s28 = scalar_lea.vmem (%p1324_p4), %s1637_s1, %s1110_s25  }
  0x14   : > { %v157_v0 = vld [vmem:[%s1336_s20] sm:$0xff]  ;;  %v159_v1 = vld [vmem:[%s1336_s20 + $0x10] sm:$0xff]  ;;  %v158_v2 = vld [vmem:[%s1336_s20 + $0x8] sm:$0xff] }
  0x15   : > { %v221_v3 = vunpack.c.l.bf16 %v157_v0  ;;  %v222_v4 = vunpack.c.h.bf16 %v157_v0  ;;  %v285_v5 = vunpack.c.l.bf16 %v159_v1  ;;  %v286_v6 = vunpack.c.h.bf16 %v159_v1  ;;  %v160_v7 = vld [vmem:[%s1336_s20 + $0x18] sm:$0xff]  ;;  %v161_v8 = vld [vmem:[%s1336_s20 + $0x20] sm:$0xff]  ;;  %v163_v9 = vld [vmem:[%s1336_s20 + $0x30] sm:$0xff] }
  0x16   : > { %v223_v10 = vunpack.c.l.bf16 %v158_v2  ;;  %v224_v11 = vunpack.c.h.bf16 %v158_v2  ;;  %v287_v12 = vunpack.c.l.bf16 %v160_v7  ;;  %v288_v13 = vunpack.c.h.bf16 %v160_v7  ;;  %v162_v14 = vld [vmem:[%s1336_s20 + $0x28] sm:$0xff]  ;;  %v164_v15 = vld [vmem:[%s1336_s20 + $0x38] sm:$0xff]  ;;  %v165_v24 = vld [vmem:[%s1336_s20 + $0x40] sm:$0xff] }
  0x17   : > { %v349_v16 = vmax.f32 %v221_v3, %v285_v5  ;;  %v350_v17 = vmax.f32 %v222_v4, %v286_v6  ;;  %v225_v18 = vunpack.c.l.bf16 %v161_v8  ;;  %v226_v19 = vunpack.c.h.bf16 %v161_v8  ;;  %v167_v29 = vld [vmem:[%s1336_s20 + $0x50] sm:$0xff]  ;;  %v166_v34 = vld [vmem:[%s1336_s20 + $0x48] sm:$0xff]  ;;  %v168_v43 = vld [vmem:[%s1336_s20 + $0x58] sm:$0xff] }
  0x18   : > { %v351_v20 = vmax.f32 %v223_v10, %v287_v12  ;;  %v352_v21 = vmax.f32 %v224_v11, %v288_v13  ;;  %v289_v22 = vunpack.c.l.bf16 %v163_v9  ;;  %v290_v23 = vunpack.c.h.bf16 %v163_v9  ;;  %v169_v48 = vld [vmem:[%s1336_s20 + $0x60] sm:$0xff]  ;;  %v171_v60 = vld [vmem:[%s1336_s20 + $0x70] sm:$0xff]  ;;  %v170_v4 = vld [vmem:[%s1336_s20 + $0x68] sm:$0xff] }
  0x19   : > { %v413_v25 = vpack.c.bf16 %v350_v17, %v349_v16  ;;  %v227_v26 = vunpack.c.l.bf16 %v162_v14  ;;  %v228_v27 = vunpack.c.h.bf16 %v162_v14  ;;  %v291_v28 = vunpack.c.l.bf16 %v164_v15  ;;  %v673_v0 = vld [vmem:[%s1359_s23 + $0x4] sm:$0xf]  ;;  %v172_v13 = vld [vmem:[%s1336_s20 + $0x78] sm:$0xff] }
  0x1a   : > { %v414_v30 = vpack.c.bf16 %v352_v21, %v351_v20  ;;  %v353_v31 = vmax.f32 %v225_v18, %v289_v22  ;;  %v354_v32 = vmax.f32 %v226_v19, %v290_v23  ;;  %v292_v33 = vunpack.c.h.bf16 %v164_v15  ;;  %v173_v18 = vld [vmem:[%s1336_s20 + $0x80] sm:$0xff]  ;;  %v677_v19 = vld [vmem:[%s1359_s23 + $0xc] sm:$0xf] }
  0x1b   : > { %v509_v35 = vrot.slane %v413_v25, 4  ;;  %v355_v36 = vmax.f32 %v227_v26, %v291_v28  ;;  %v229_v37 = vunpack.c.l.bf16 %v165_v24  ;;  %v230_v38 = vunpack.c.h.bf16 %v165_v24  ;;  %v175_v28 = vld [vmem:[%s1336_s20 + $0x90] sm:$0xff] }
  0x1c   : > { %v510_v39 = vrot.slane %v414_v30, 4  ;;  %v415_v40 = vpack.c.bf16 %v354_v32, %v353_v31  ;;  %v356_v41 = vmax.f32 %v228_v27, %v292_v33  ;;  %v293_v42 = vunpack.c.l.bf16 %v167_v29  ;;  %v174_v33 = vld [vmem:[%s1336_s20 + $0x88] sm:$0xff] }
  0x1d   : > { %v573_v44 = vunpack.c.l.bf16 %v509_v35  ;;  %v294_v45 = vunpack.c.h.bf16 %v167_v29  ;;  %v231_v46 = vunpack.c.l.bf16 %v166_v34  ;;  %v232_v47 = vunpack.c.h.bf16 %v166_v34 }
  0x1e   : > { %v574_v49 = vunpack.c.l.bf16 %v510_v39  ;;  %v511_v50 = vrot.slane %v415_v40, 4  ;;  %v416_v51 = vpack.c.bf16 %v356_v41, %v355_v36  ;;  %v357_v52 = vmax.f32 %v229_v37, %v293_v42 }
  0x1f   : > { %v605_v53 = vmax.f32 %v349_v16, %v573_v44  ;;  %v358_v54 = vmax.f32 %v230_v38, %v294_v45  ;;  %v295_v55 = vunpack.c.l.bf16 %v168_v43  ;;  %v296_v56 = vunpack.c.h.bf16 %v168_v43  ;;  %v176_v38 = vld [vmem:[%s1336_s20 + $0x98] sm:$0xff]  ;;  %v177_v43 = vld [vmem:[%s1336_s20 + $0xa0] sm:$0xff]  ;;  %v681_v44 = vld [vmem:[%s1359_s23 + $0x14] sm:$0xf] }
  0x20   : > { %v606_v57 = vmax.f32 %v351_v20, %v574_v49  ;;  %v575_v58 = vunpack.c.l.bf16 %v511_v50  ;;  %v512_v59 = vrot.slane %v416_v51, 4  ;;  %v233_v61 = vunpack.c.l.bf16 %v169_v48 }
  0x21   : > { %v637_v62 = vpack.c.bf16 %v605_v53, %v605_v53  ;;  %v417_v1 = vpack.c.bf16 %v358_v54, %v357_v52  ;;  %v359_v2 = vmax.f32 %v231_v46, %v295_v55  ;;  %v360_v3 = vmax.f32 %v232_v47, %v296_v56  ;;  %v179_v53 = vld [vmem:[%s1336_s20 + $0xb0] sm:$0xff] }
  0x22   : > { %v638_v5 = vpack.c.bf16 %v606_v57, %v606_v57  ;;  %v607_v6 = vmax.f32 %v353_v31, %v575_v58  ;;  %v576_v7 = vunpack.c.l.bf16 %v512_v59  ;;  %v234_v8 = vunpack.c.h.bf16 %v169_v48  ;;  %v178_v58 = vld [vmem:[%s1336_s20 + $0xa8] sm:$0xff] }
  0x23   : > { %669 = vst [vmem:[%s1359_s23] sm:$0xf] %v637_v62  ;;  %v513_v9 = vrot.slane %v417_v1, 4  ;;  %v418_v10 = vpack.c.bf16 %v360_v3, %v359_v2  ;;  %v297_v11 = vunpack.c.l.bf16 %v171_v60  ;;  %v298_v12 = vunpack.c.h.bf16 %v171_v60 }
  0x24   : > { %v674_v14 = vsel %vm1355_vm2, %v638_v5, %v673_v0  ;;  %v639_v15 = vpack.c.bf16 %v607_v6, %v607_v6  ;;  %v608_v16 = vmax.f32 %v355_v36, %v576_v7  ;;  %v235_v17 = vunpack.c.l.bf16 %v170_v4  ;;  %v181_v5 = vld [vmem:[%s1336_s20 + $0xc0] sm:$0xff] }
  0x25   : > { %675 = vst [vmem:[%s1359_s23 + $0x4] sm:$0xf] %v674_v14  ;;  %v577_v20 = vunpack.c.l.bf16 %v513_v9  ;;  %v514_v21 = vrot.slane %v418_v10, 4  ;;  %v361_v22 = vmax.f32 %v233_v61, %v297_v11  ;;  %v362_v23 = vmax.f32 %v234_v8, %v298_v12  ;;  %v183_v14 = vld [vmem:[%s1336_s20 + $0xd0] sm:$0xff] }
  0x26   : > { %676 = vst [vmem:[%s1359_s23 + $0x8] sm:$0xf] %v639_v15  ;;  %v640_v24 = vpack.c.bf16 %v608_v16, %v608_v16  ;;  %v236_v25 = vunpack.c.h.bf16 %v170_v4  ;;  %v299_v26 = vunpack.c.l.bf16 %v172_v13  ;;  %v300_v27 = vunpack.c.h.bf16 %v172_v13  ;;  %v180_v4 = vld [vmem:[%s1336_s20 + $0xb8] sm:$0xff] }
  0x27   : > { %v609_v29 = vmax.f32 %v357_v52, %v577_v20  ;;  %v578_v30 = vunpack.c.l.bf16 %v514_v21  ;;  %v419_v31 = vpack.c.bf16 %v362_v23, %v361_v22  ;;  %v237_v32 = vunpack.c.l.bf16 %v173_v18  ;;  %v685_v15 = vld [vmem:[%s1359_s23 + $0x1c] sm:$0xf] }
  0x28   : > { %v678_v34 = vsel %vm1355_vm2, %v640_v24, %v677_v19  ;;  %v363_v35 = vmax.f32 %v235_v17, %v299_v26  ;;  %v364_v36 = vmax.f32 %v236_v25, %v300_v27  ;;  %v238_v37 = vunpack.c.h.bf16 %v173_v18  ;;  %v182_v24 = vld [vmem:[%s1336_s20 + $0xc8] sm:$0xff] }
  0x29   : > { %679 = vst [vmem:[%s1359_s23 + $0xc] sm:$0xf] %v678_v34  ;;  %v641_v39 = vpack.c.bf16 %v609_v29, %v609_v29  ;;  %v610_v40 = vmax.f32 %v359_v2, %v578_v30  ;;  %v515_v41 = vrot.slane %v419_v31, 4  ;;  %v301_v42 = vunpack.c.l.bf16 %v175_v28 }
  0x2a   : > { %v420_v45 = vpack.c.bf16 %v364_v36, %v363_v35  ;;  %v302_v46 = vunpack.c.h.bf16 %v175_v28  ;;  %v239_v47 = vunpack.c.l.bf16 %v174_v33  ;;  %v240_v48 = vunpack.c.h.bf16 %v174_v33  ;;  %v184_v33 = vld [vmem:[%s1336_s20 + $0xd8] sm:$0xff] }
  0x2b   : > { %680 = vst [vmem:[%s1359_s23 + $0x10] sm:$0xf] %v641_v39  ;;  %v642_v49 = vpack.c.bf16 %v610_v40, %v610_v40  ;;  %v579_v50 = vunpack.c.l.bf16 %v515_v41  ;;  %v365_v51 = vmax.f32 %v237_v32, %v301_v42  ;;  %v303_v52 = vunpack.c.l.bf16 %v176_v38 }
  0x2c   : > { %v516_v54 = vrot.slane %v420_v45, 4  ;;  %v366_v55 = vmax.f32 %v238_v37, %v302_v46  ;;  %v304_v56 = vunpack.c.h.bf16 %v176_v38  ;;  %v241_v57 = vunpack.c.l.bf16 %v177_v43  ;;  %v185_v38 = vld [vmem:[%s1336_s20 + $0xe0] sm:$0xff] }
  0x2d   : > { %v682_v59 = vsel %vm1355_vm2, %v642_v49, %v681_v44  ;;  %v611_v60 = vmax.f32 %v361_v22, %v579_v50  ;;  %v367_v61 = vmax.f32 %v239_v47, %v303_v52  ;;  %v242_v62 = vunpack.c.h.bf16 %v177_v43  ;;  %v689_v43 = vld [vmem:[%s1359_s23 + $0x24] sm:$0xf] }
  0x2e   : > { %683 = vst [vmem:[%s1359_s23 + $0x14] sm:$0xf] %v682_v59  ;;  %v580_v0 = vunpack.c.l.bf16 %v516_v54  ;;  %v421_v1 = vpack.c.bf16 %v366_v55, %v365_v51  ;;  %v368_v2 = vmax.f32 %v240_v48, %v304_v56  ;;  %v305_v3 = vunpack.c.l.bf16 %v179_v53  ;;  %v187_v48 = vld [vmem:[%s1336_s20 + $0xf0] sm:$0xff] }
  0x2f   : > { %v643_v6 = vpack.c.bf16 %v611_v60, %v611_v60  ;;  %v306_v7 = vunpack.c.h.bf16 %v179_v53  ;;  %v243_v8 = vunpack.c.l.bf16 %v178_v58  ;;  %v244_v9 = vunpack.c.h.bf16 %v178_v58  ;;  %v186_v53 = vld [vmem:[%s1336_s20 + $0xe8] sm:$0xff] }
  0x30   : > { %v612_v10 = vmax.f32 %v363_v35, %v580_v0  ;;  %v517_v11 = vrot.slane %v421_v1, 4  ;;  %v422_v12 = vpack.c.bf16 %v368_v2, %v367_v61  ;;  %v369_v13 = vmax.f32 %v241_v57, %v305_v3 }
  0x31   : > { %684 = vst [vmem:[%s1359_s23 + $0x18] sm:$0xf] %v643_v6  ;;  %v370_v16 = vmax.f32 %v242_v62, %v306_v7  ;;  %v307_v17 = vunpack.c.l.bf16 %v180_v4  ;;  %v308_v18 = vunpack.c.h.bf16 %v180_v4  ;;  %v245_v19 = vunpack.c.l.bf16 %v181_v5  ;;  %v188_v62 = vld [vmem:[%s1336_s20 + $0xf8] sm:$0xff]  ;;  %v189_v4 = vld [vmem:[%s1336_s20 + $0x100] sm:$0xff] }
  0x32   : > { %v644_v20 = vpack.c.bf16 %v612_v10, %v612_v10  ;;  %v581_v21 = vunpack.c.l.bf16 %v517_v11  ;;  %v518_v22 = vrot.slane %v422_v12, 4  ;;  %v246_v23 = vunpack.c.h.bf16 %v181_v5  ;;  %v693_v5 = vld [vmem:[%s1359_s23 + $0x2c] sm:$0xf] }
  0x33   : > { %v423_v25 = vpack.c.bf16 %v370_v16, %v369_v13  ;;  %v371_v26 = vmax.f32 %v243_v8, %v307_v17  ;;  %v372_v27 = vmax.f32 %v244_v9, %v308_v18  ;;  %v309_v28 = vunpack.c.l.bf16 %v183_v14 }
  0x34   : > { %v686_v29 = vsel %vm1355_vm2, %v644_v20, %v685_v15  ;;  %v613_v30 = vmax.f32 %v365_v51, %v581_v21  ;;  %v582_v31 = vunpack.c.l.bf16 %v518_v22  ;;  %v310_v32 = vunpack.c.h.bf16 %v183_v14  ;;  %v191_v14 = vld [vmem:[%s1336_s20 + $0x110] sm:$0xff] }
  0x35   : > { %687 = vst [vmem:[%s1359_s23 + $0x1c] sm:$0xf] %v686_v29  ;;  %v519_v34 = vrot.slane %v423_v25, 4  ;;  %v424_v35 = vpack.c.bf16 %v372_v27, %v371_v26  ;;  %v373_v36 = vmax.f32 %v245_v19, %v309_v28  ;;  %v247_v37 = vunpack.c.l.bf16 %v182_v24  ;;  %v190_v19 = vld [vmem:[%s1336_s20 + $0x108] sm:$0xff]  ;;  %v193_v29 = vld [vmem:[%s1336_s20 + $0x120] sm:$0xff] }
  0x36   : > { %v645_v39 = vpack.c.bf16 %v613_v30, %v613_v30  ;;  %v614_v40 = vmax.f32 %v367_v61, %v582_v31  ;;  %v374_v41 = vmax.f32 %v246_v23, %v310_v32  ;;  %v248_v42 = vunpack.c.h.bf16 %v182_v24  ;;  %v192_v24 = vld [vmem:[%s1336_s20 + $0x118] sm:$0xff] }
  0x37   : > { %v583_v44 = vunpack.c.l.bf16 %v519_v34  ;;  %v520_v45 = vrot.slane %v424_v35, 4  ;;  %v311_v46 = vunpack.c.l.bf16 %v184_v33  ;;  %v312_v47 = vunpack.c.h.bf16 %v184_v33  ;;  %v697_v34 = vld [vmem:[%s1359_s23 + $0x34] sm:$0xf] }
  0x38   : > { %688 = vst [vmem:[%s1359_s23 + $0x20] sm:$0xf] %v645_v39  ;;  %v646_v49 = vpack.c.bf16 %v614_v40, %v614_v40  ;;  %v425_v50 = vpack.c.bf16 %v374_v41, %v373_v36  ;;  %v249_v51 = vunpack.c.l.bf16 %v185_v38  ;;  %v250_v52 = vunpack.c.h.bf16 %v185_v38  ;;  %v195_v39 = vld [vmem:[%s1336_s20 + $0x130] sm:$0xff] }
  0x39   : > { %v615_v54 = vmax.f32 %v369_v13, %v583_v44  ;;  %v584_v55 = vunpack.c.l.bf16 %v520_v45  ;;  %v375_v56 = vmax.f32 %v247_v37, %v311_v46  ;;  %v376_v57 = vmax.f32 %v248_v42, %v312_v47  ;;  %v194_v44 = vld [vmem:[%s1336_s20 + $0x128] sm:$0xff] }
  0x3a   : > { %v690_v58 = vsel %vm1355_vm2, %v646_v49, %v689_v43  ;;  %v521_v59 = vrot.slane %v425_v50, 4  ;;  %v313_v60 = vunpack.c.l.bf16 %v187_v48  ;;  %v314_v61 = vunpack.c.h.bf16 %v187_v48 }
  0x3b   : > { %691 = vst [vmem:[%s1359_s23 + $0x24] sm:$0xf] %v690_v58  ;;  %v647_v0 = vpack.c.bf16 %v615_v54, %v615_v54  ;;  %v616_v1 = vmax.f32 %v371_v26, %v584_v55  ;;  %v426_v2 = vpack.c.bf16 %v376_v57, %v375_v56  ;;  %v251_v3 = vunpack.c.l.bf16 %v186_v53  ;;  %v197_v58 = vld [vmem:[%s1336_s20 + $0x140] sm:$0xff] }
  0x3c   : > { %v585_v6 = vunpack.c.l.bf16 %v521_v59  ;;  %v377_v7 = vmax.f32 %v249_v51, %v313_v60  ;;  %v378_v8 = vmax.f32 %v250_v52, %v314_v61  ;;  %v252_v9 = vunpack.c.h.bf16 %v186_v53  ;;  %v196_v53 = vld [vmem:[%s1336_s20 + $0x138] sm:$0xff] }
  0x3d   : > { %692 = vst [vmem:[%s1359_s23 + $0x28] sm:$0xf] %v647_v0  ;;  %v648_v10 = vpack.c.bf16 %v616_v1, %v616_v1  ;;  %v522_v11 = vrot.slane %v426_v2, 4  ;;  %v315_v12 = vunpack.c.l.bf16 %v188_v62  ;;  %v316_v13 = vunpack.c.h.bf16 %v188_v62  ;;  %v701_v0 = vld [vmem:[%s1359_s23 + $0x3c] sm:$0xf] }
  0x3e   : > { %v617_v15 = vmax.f32 %v373_v36, %v585_v6  ;;  %v427_v16 = vpack.c.bf16 %v378_v8, %v377_v7  ;;  %v253_v17 = vunpack.c.l.bf16 %v189_v4  ;;  %v254_v18 = vunpack.c.h.bf16 %v189_v4 }
  0x3f   : > { %v694_v20 = vsel %vm1355_vm2, %v648_v10, %v693_v5  ;;  %v586_v21 = vunpack.c.l.bf16 %v522_v11  ;;  %v379_v22 = vmax.f32 %v251_v3, %v315_v12  ;;  %v380_v23 = vmax.f32 %v252_v9, %v316_v13  ;;  %v199_v5 = vld [vmem:[%s1336_s20 + $0x150] sm:$0xff]  ;;  %v198_v10 = vld [vmem:[%s1336_s20 + $0x148] sm:$0xff] }
  0x40   : > { %695 = vst [vmem:[%s1359_s23 + $0x2c] sm:$0xf] %v694_v20  ;;  %v649_v25 = vpack.c.bf16 %v617_v15, %v617_v15  ;;  %v523_v26 = vrot.slane %v427_v16, 4  ;;  %v317_v27 = vunpack.c.l.bf16 %v191_v14  ;;  %v318_v28 = vunpack.c.h.bf16 %v191_v14 }
  0x41   : > { %v618_v30 = vmax.f32 %v375_v56, %v586_v21  ;;  %v428_v31 = vpack.c.bf16 %v380_v23, %v379_v22  ;;  %v255_v32 = vunpack.c.l.bf16 %v190_v19  ;;  %v256_v33 = vunpack.c.h.bf16 %v190_v19  ;;  %v200_v19 = vld [vmem:[%s1336_s20 + $0x158] sm:$0xff] }
  0x42   : > { %696 = vst [vmem:[%s1359_s23 + $0x30] sm:$0xf] %v649_v25  ;;  %v587_v35 = vunpack.c.l.bf16 %v523_v26  ;;  %v381_v36 = vmax.f32 %v253_v17, %v317_v27  ;;  %v382_v37 = vmax.f32 %v254_v18, %v318_v28  ;;  %v319_v38 = vunpack.c.l.bf16 %v192_v24 }
  0x43   : > { %v650_v40 = vpack.c.bf16 %v618_v30, %v618_v30  ;;  %v524_v41 = vrot.slane %v428_v31, 4  ;;  %v320_v42 = vunpack.c.h.bf16 %v192_v24  ;;  %v257_v43 = vunpack.c.l.bf16 %v193_v29  ;;  %v201_v24 = vld [vmem:[%s1336_s20 + $0x160] sm:$0xff] }
  0x44   : > { %v619_v45 = vmax.f32 %v377_v7, %v587_v35  ;;  %v429_v46 = vpack.c.bf16 %v382_v37, %v381_v36  ;;  %v383_v47 = vmax.f32 %v255_v32, %v319_v38  ;;  %v258_v48 = vunpack.c.h.bf16 %v193_v29  ;;  %v705_v29 = vld [vmem:[%s1359_s23 + $0x44] sm:$0xf] }
  0x45   : > { %v698_v49 = vsel %vm1355_vm2, %v650_v40, %v697_v34  ;;  %v588_v50 = vunpack.c.l.bf16 %v524_v41  ;;  %v384_v51 = vmax.f32 %v256_v33, %v320_v42  ;;  %v321_v52 = vunpack.c.l.bf16 %v195_v39  ;;  %v203_v34 = vld [vmem:[%s1336_s20 + $0x170] sm:$0xff] }
  0x46   : > { %699 = vst [vmem:[%s1359_s23 + $0x34] sm:$0xf] %v698_v49  ;;  %v651_v54 = vpack.c.bf16 %v619_v45, %v619_v45  ;;  %v525_v55 = vrot.slane %v429_v46, 4  ;;  %v322_v56 = vunpack.c.h.bf16 %v195_v39  ;;  %v259_v57 = vunpack.c.l.bf16 %v194_v44  ;;  %v202_v39 = vld [vmem:[%s1336_s20 + $0x168] sm:$0xff] }
  0x47   : > { %v620_v59 = vmax.f32 %v379_v22, %v588_v50  ;;  %v430_v60 = vpack.c.bf16 %v384_v51, %v383_v47  ;;  %v385_v61 = vmax.f32 %v257_v43, %v321_v52  ;;  %v260_v62 = vunpack.c.h.bf16 %v194_v44 }
  0x48   : > { %700 = vst [vmem:[%s1359_s23 + $0x38] sm:$0xf] %v651_v54  ;;  %v589_v1 = vunpack.c.l.bf16 %v525_v55  ;;  %v386_v2 = vmax.f32 %v258_v48, %v322_v56  ;;  %v323_v3 = vunpack.c.l.bf16 %v196_v53  ;;  %v324_v4 = vunpack.c.h.bf16 %v196_v53  ;;  %v204_v48 = vld [vmem:[%s1336_s20 + $0x178] sm:$0xff]  ;;  %v205_v53 = vld [vmem:[%s1336_s20 + $0x180] sm:$0xff]  ;;  %v709_v54 = vld [vmem:[%s1359_s23 + $0x4c] sm:$0xf] }
  0x49   : > { %v652_v6 = vpack.c.bf16 %v620_v59, %v620_v59  ;;  %v526_v7 = vrot.slane %v430_v60, 4  ;;  %v261_v8 = vunpack.c.l.bf16 %v197_v58  ;;  %v262_v9 = vunpack.c.h.bf16 %v197_v58 }
  0x4a   : > { %v621_v11 = vmax.f32 %v381_v36, %v589_v1  ;;  %v431_v12 = vpack.c.bf16 %v386_v2, %v385_v61  ;;  %v387_v13 = vmax.f32 %v259_v57, %v323_v3  ;;  %v388_v14 = vmax.f32 %v260_v62, %v324_v4 }
  0x4b   : > { %v702_v15 = vsel %vm1355_vm2, %v652_v6, %v701_v0  ;;  %v590_v16 = vunpack.c.l.bf16 %v526_v7  ;;  %v325_v17 = vunpack.c.l.bf16 %v199_v5  ;;  %v326_v18 = vunpack.c.h.bf16 %v199_v5  ;;  %v207_v0 = vld [vmem:[%s1336_s20 + $0x190] sm:$0xff]  ;;  %v206_v5 = vld [vmem:[%s1336_s20 + $0x188] sm:$0xff] }
  0x4c   : > { %703 = vst [vmem:[%s1359_s23 + $0x3c] sm:$0xf] %v702_v15  ;;  %v653_v20 = vpack.c.bf16 %v621_v11, %v621_v11  ;;  %v527_v21 = vrot.slane %v431_v12, 4  ;;  %v432_v22 = vpack.c.bf16 %v388_v14, %v387_v13  ;;  %v263_v23 = vunpack.c.l.bf16 %v198_v10  ;;  %v209_v15 = vld [vmem:[%s1336_s20 + $0x1a0] sm:$0xff] }
  0x4d   : > { %v622_v25 = vmax.f32 %v383_v47, %v590_v16  ;;  %v389_v26 = vmax.f32 %v261_v8, %v325_v17  ;;  %v390_v27 = vmax.f32 %v262_v9, %v326_v18  ;;  %v264_v28 = vunpack.c.h.bf16 %v198_v10  ;;  %v208_v10 = vld [vmem:[%s1336_s20 + $0x198] sm:$0xff] }
  0x4e   : > { %704 = vst [vmem:[%s1359_s23 + $0x40] sm:$0xf] %v653_v20  ;;  %v591_v30 = vunpack.c.l.bf16 %v527_v21  ;;  %v528_v31 = vrot.slane %v432_v22, 4  ;;  %v327_v32 = vunpack.c.l.bf16 %v200_v19  ;;  %v328_v33 = vunpack.c.h.bf16 %v200_v19  ;;  %v713_v20 = vld [vmem:[%s1359_s23 + $0x54] sm:$0xf] }
  0x4f   : > { %v654_v35 = vpack.c.bf16 %v622_v25, %v622_v25  ;;  %v433_v36 = vpack.c.bf16 %v390_v27, %v389_v26  ;;  %v265_v37 = vunpack.c.l.bf16 %v201_v24  ;;  %v266_v38 = vunpack.c.h.bf16 %v201_v24  ;;  %v211_v25 = vld [vmem:[%s1336_s20 + $0x1b0] sm:$0xff] }
  0x50   : > { %v623_v40 = vmax.f32 %v385_v61, %v591_v30  ;;  %v592_v41 = vunpack.c.l.bf16 %v528_v31  ;;  %v391_v42 = vmax.f32 %v263_v23, %v327_v32  ;;  %v392_v43 = vmax.f32 %v264_v28, %v328_v33  ;;  %v210_v30 = vld [vmem:[%s1336_s20 + $0x1a8] sm:$0xff] }
  0x51   : > { %v706_v44 = vsel %vm1355_vm2, %v654_v35, %v705_v29  ;;  %v529_v45 = vrot.slane %v433_v36, 4  ;;  %v329_v46 = vunpack.c.l.bf16 %v203_v34  ;;  %v330_v47 = vunpack.c.h.bf16 %v203_v34 }
  0x52   : > { %707 = vst [vmem:[%s1359_s23 + $0x44] sm:$0xf] %v706_v44  ;;  %v655_v49 = vpack.c.bf16 %v623_v40, %v623_v40  ;;  %v624_v50 = vmax.f32 %v387_v13, %v592_v41  ;;  %v434_v51 = vpack.c.bf16 %v392_v43, %v391_v42  ;;  %v267_v52 = vunpack.c.l.bf16 %v202_v39  ;;  %v213_v44 = vld [vmem:[%s1336_s20 + $0x1c0] sm:$0xff] }
  0x53   : > { %v593_v55 = vunpack.c.l.bf16 %v529_v45  ;;  %v393_v56 = vmax.f32 %v265_v37, %v329_v46  ;;  %v394_v57 = vmax.f32 %v266_v38, %v330_v47  ;;  %v268_v58 = vunpack.c.h.bf16 %v202_v39  ;;  %v212_v39 = vld [vmem:[%s1336_s20 + $0x1b8] sm:$0xff] }
  0x54   : > { %708 = vst [vmem:[%s1359_s23 + $0x48] sm:$0xf] %v655_v49  ;;  %v656_v59 = vpack.c.bf16 %v624_v50, %v624_v50  ;;  %v530_v60 = vrot.slane %v434_v51, 4  ;;  %v331_v61 = vunpack.c.l.bf16 %v204_v48  ;;  %v332_v62 = vunpack.c.h.bf16 %v204_v48  ;;  %v717_v49 = vld [vmem:[%s1359_s23 + $0x5c] sm:$0xf] }
  0x55   : > { %v625_v1 = vmax.f32 %v389_v26, %v593_v55  ;;  %v435_v2 = vpack.c.bf16 %v394_v57, %v393_v56  ;;  %v269_v3 = vunpack.c.l.bf16 %v205_v53  ;;  %v270_v4 = vunpack.c.h.bf16 %v205_v53 }
  0x56   : > { %v710_v6 = vsel %vm1355_vm2, %v656_v59, %v709_v54  ;;  %v594_v7 = vunpack.c.l.bf16 %v530_v60  ;;  %v395_v8 = vmax.f32 %v267_v52, %v331_v61  ;;  %v396_v9 = vmax.f32 %v268_v58, %v332_v62  ;;  %v215_v54 = vld [vmem:[%s1336_s20 + $0x1d0] sm:$0xff]  ;;  %v214_v59 = vld [vmem:[%s1336_s20 + $0x1c8] sm:$0xff] }
  0x57   : > { %711 = vst [vmem:[%s1359_s23 + $0x4c] sm:$0xf] %v710_v6  ;;  %v657_v11 = vpack.c.bf16 %v625_v1, %v625_v1  ;;  %v531_v12 = vrot.slane %v435_v2, 4  ;;  %v333_v13 = vunpack.c.l.bf16 %v207_v0  ;;  %v334_v14 = vunpack.c.h.bf16 %v207_v0 }
  0x58   : > { %v626_v16 = vmax.f32 %v391_v42, %v594_v7  ;;  %v436_v17 = vpack.c.bf16 %v396_v9, %v395_v8  ;;  %v271_v18 = vunpack.c.l.bf16 %v206_v5  ;;  %v272_v19 = vunpack.c.h.bf16 %v206_v5  ;;  %v216_v5 = vld [vmem:[%s1336_s20 + $0x1d8] sm:$0xff] }
  0x59   : > { %712 = vst [vmem:[%s1359_s23 + $0x50] sm:$0xf] %v657_v11  ;;  %v595_v21 = vunpack.c.l.bf16 %v531_v12  ;;  %v397_v22 = vmax.f32 %v269_v3, %v333_v13  ;;  %v398_v23 = vmax.f32 %v270_v4, %v334_v14  ;;  %v335_v24 = vunpack.c.l.bf16 %v208_v10 }
  0x5a   : > { %v658_v26 = vpack.c.bf16 %v626_v16, %v626_v16  ;;  %v532_v27 = vrot.slane %v436_v17, 4  ;;  %v336_v28 = vunpack.c.h.bf16 %v208_v10  ;;  %v273_v29 = vunpack.c.l.bf16 %v209_v15  ;;  %v217_v10 = vld [vmem:[%s1336_s20 + $0x1e0] sm:$0xff] }
  0x5b   : > { %v627_v31 = vmax.f32 %v393_v56, %v595_v21  ;;  %v437_v32 = vpack.c.bf16 %v398_v23, %v397_v22  ;;  %v399_v33 = vmax.f32 %v271_v18, %v335_v24  ;;  %v274_v34 = vunpack.c.h.bf16 %v209_v15  ;;  %v721_v15 = vld [vmem:[%s1359_s23 + $0x64] sm:$0xf] }
  0x5c   : > { %v714_v35 = vsel %vm1355_vm2, %v658_v26, %v713_v20  ;;  %v596_v36 = vunpack.c.l.bf16 %v532_v27  ;;  %v400_v37 = vmax.f32 %v272_v19, %v336_v28  ;;  %v337_v38 = vunpack.c.l.bf16 %v211_v25  ;;  %v219_v20 = vld [vmem:[%s1336_s20 + $0x1f0] sm:$0xff] }
  0x5d   : > { %715 = vst [vmem:[%s1359_s23 + $0x54] sm:$0xf] %v714_v35  ;;  %v659_v40 = vpack.c.bf16 %v627_v31, %v627_v31  ;;  %v533_v41 = vrot.slane %v437_v32, 4  ;;  %v338_v42 = vunpack.c.h.bf16 %v211_v25  ;;  %v275_v43 = vunpack.c.l.bf16 %v210_v30  ;;  %v218_v25 = vld [vmem:[%s1336_s20 + $0x1e8] sm:$0xff] }
  0x5e   : > { %v628_v45 = vmax.f32 %v395_v8, %v596_v36  ;;  %v438_v46 = vpack.c.bf16 %v400_v37, %v399_v33  ;;  %v401_v47 = vmax.f32 %v273_v29, %v337_v38  ;;  %v276_v48 = vunpack.c.h.bf16 %v210_v30 }
  0x5f   : > { %716 = vst [vmem:[%s1359_s23 + $0x58] sm:$0xf] %v659_v40  ;;  %v597_v50 = vunpack.c.l.bf16 %v533_v41  ;;  %v402_v51 = vmax.f32 %v274_v34, %v338_v42  ;;  %v339_v52 = vunpack.c.l.bf16 %v212_v39  ;;  %v340_v53 = vunpack.c.h.bf16 %v212_v39  ;;  %v220_v34 = vld [vmem:[%s1336_s20 + $0x1f8] sm:$0xff]  ;;  %v725_v39 = vld [vmem:[%s1359_s23 + $0x6c] sm:$0xf] }
  0x60   : > { %v660_v55 = vpack.c.bf16 %v628_v45, %v628_v45  ;;  %v534_v56 = vrot.slane %v438_v46, 4  ;;  %v277_v57 = vunpack.c.l.bf16 %v213_v44  ;;  %v278_v58 = vunpack.c.h.bf16 %v213_v44 }
  0x61   : > { %v629_v60 = vmax.f32 %v397_v22, %v597_v50  ;;  %v439_v61 = vpack.c.bf16 %v402_v51, %v401_v47  ;;  %v403_v62 = vmax.f32 %v275_v43, %v339_v52  ;;  %v404_v0 = vmax.f32 %v276_v48, %v340_v53 }
  0x62   : > { %v718_v1 = vsel %vm1355_vm2, %v660_v55, %v717_v49  ;;  %v598_v2 = vunpack.c.l.bf16 %v534_v56  ;;  %v341_v3 = vunpack.c.l.bf16 %v215_v54  ;;  %v342_v4 = vunpack.c.h.bf16 %v215_v54 }
  0x63   : > { %719 = vst [vmem:[%s1359_s23 + $0x5c] sm:$0xf] %v718_v1  ;;  %v661_v6 = vpack.c.bf16 %v629_v60, %v629_v60  ;;  %v535_v7 = vrot.slane %v439_v61, 4  ;;  %v440_v8 = vpack.c.bf16 %v404_v0, %v403_v62  ;;  %v279_v9 = vunpack.c.l.bf16 %v214_v59 }
  0x64   : > { %v630_v11 = vmax.f32 %v399_v33, %v598_v2  ;;  %v405_v12 = vmax.f32 %v277_v57, %v341_v3  ;;  %v406_v13 = vmax.f32 %v278_v58, %v342_v4  ;;  %v280_v14 = vunpack.c.h.bf16 %v214_v59  ;;  %v729_v58 = vld [vmem:[%s1359_s23 + $0x74] sm:$0xf]  ;;  %v733_v4 = vld [vmem:[%s1359_s23 + $0x7c] sm:$0xf] }
  0x65   : > { %720 = vst [vmem:[%s1359_s23 + $0x60] sm:$0xf] %v661_v6  ;;  %v599_v16 = vunpack.c.l.bf16 %v535_v7  ;;  %v536_v17 = vrot.slane %v440_v8, 4  ;;  %v343_v18 = vunpack.c.l.bf16 %v216_v5  ;;  %v344_v19 = vunpack.c.h.bf16 %v216_v5 }
  0x66   : > { %v662_v21 = vpack.c.bf16 %v630_v11, %v630_v11  ;;  %v441_v22 = vpack.c.bf16 %v406_v13, %v405_v12  ;;  %v281_v23 = vunpack.c.l.bf16 %v217_v10  ;;  %v282_v24 = vunpack.c.h.bf16 %v217_v10 }
  0x67   : > { %v631_v26 = vmax.f32 %v401_v47, %v599_v16  ;;  %v600_v27 = vunpack.c.l.bf16 %v536_v17  ;;  %v407_v28 = vmax.f32 %v279_v9, %v343_v18  ;;  %v408_v29 = vmax.f32 %v280_v14, %v344_v19 }
  0x68   : > { %v722_v30 = vsel %vm1355_vm2, %v662_v21, %v721_v15  ;;  %v537_v31 = vrot.slane %v441_v22, 4  ;;  %v345_v32 = vunpack.c.l.bf16 %v219_v20  ;;  %v346_v33 = vunpack.c.h.bf16 %v219_v20 }
  0x69   : > { %723 = vst [vmem:[%s1359_s23 + $0x64] sm:$0xf] %v722_v30  ;;  %v663_v35 = vpack.c.bf16 %v631_v26, %v631_v26  ;;  %v632_v36 = vmax.f32 %v403_v62, %v600_v27  ;;  %v442_v37 = vpack.c.bf16 %v408_v29, %v407_v28  ;;  %v283_v38 = vunpack.c.l.bf16 %v218_v25 }
  0x6a   : > { %v601_v40 = vunpack.c.l.bf16 %v537_v31  ;;  %v409_v41 = vmax.f32 %v281_v23, %v345_v32  ;;  %v410_v42 = vmax.f32 %v282_v24, %v346_v33  ;;  %v284_v43 = vunpack.c.h.bf16 %v218_v25 }
  0x6b   : > { %724 = vst [vmem:[%s1359_s23 + $0x68] sm:$0xf] %v663_v35  ;;  %v664_v44 = vpack.c.bf16 %v632_v36, %v632_v36  ;;  %v538_v45 = vrot.slane %v442_v37, 4  ;;  %v347_v46 = vunpack.c.l.bf16 %v220_v34  ;;  %v348_v47 = vunpack.c.h.bf16 %v220_v34 }
  0x6c   : > { %v633_v48 = vmax.f32 %v405_v12, %v601_v40  ;;  %v443_v49 = vpack.c.bf16 %v410_v42, %v409_v41 }
  0x6d   : > { %v726_v50 = vsel %vm1355_vm2, %v664_v44, %v725_v39  ;;  %v602_v51 = vunpack.c.l.bf16 %v538_v45  ;;  %v411_v52 = vmax.f32 %v283_v38, %v347_v46  ;;  %v412_v53 = vmax.f32 %v284_v43, %v348_v47 }
  0x6e   : > { %727 = vst [vmem:[%s1359_s23 + $0x6c] sm:$0xf] %v726_v50  ;;  %v665_v54 = vpack.c.bf16 %v633_v48, %v633_v48  ;;  %v539_v55 = vrot.slane %v443_v49, 4 }
  0x6f   : > { %v634_v56 = vmax.f32 %v407_v28, %v602_v51  ;;  %v444_v57 = vpack.c.bf16 %v412_v53, %v411_v52 }
  0x70   : > { %728 = vst [vmem:[%s1359_s23 + $0x70] sm:$0xf] %v665_v54  ;;  %v603_v59 = vunpack.c.l.bf16 %v539_v55 }
  0x71   : > { %v666_v60 = vpack.c.bf16 %v634_v56, %v634_v56  ;;  %v540_v61 = vrot.slane %v444_v57, 4 }
  0x72   : > { %v635_v62 = vmax.f32 %v409_v41, %v603_v59 }
  0x73   : > { %v730_v0 = vsel %vm1355_vm2, %v666_v60, %v729_v58  ;;  %v604_v1 = vunpack.c.l.bf16 %v540_v61 }
  0x74   : > { %731 = vst [vmem:[%s1359_s23 + $0x74] sm:$0xf] %v730_v0  ;;  %v667_v2 = vpack.c.bf16 %v635_v62, %v635_v62 }
  0x75   : > { %v636_v3 = vmax.f32 %v411_v52, %v604_v1 }
  0x76   : > { %732 = vst [vmem:[%s1359_s23 + $0x78] sm:$0xf] %v667_v2  ;;  %742 = sbr.rel (!%p1324_p4) target bundleno = 187 (0xbb), region = 28 }
  0x77   : > { %v668_v5 = vpack.c.bf16 %v636_v3, %v636_v3 }
  0x79   : > { %v734_v6 = vsel %vm1355_vm2, %v668_v5, %v733_v4 }
  0x7a   : > { %735 = vst [vmem:[%s1359_s23 + $0x7c] sm:$0xf] %v734_v6 }
  0x7b   : > { %s1650_s24 = smov (!%p745_p8, %s744_s24), 16 }
  0x7c   : > { %s1108_s29 = sshll.u32 %s1650_s24, 3  ;;  %s1094_s30 = sshll.u32 %s1650_s24, 1 }
  0x7d   : > { %p1095_p9 = scmp.eq.s32.totalorder %s1108_s29, 0 }
  0x7e   : > { %s1506_s2 = sshrl.u32 (!%p1095_p9), %s1094_s30, 5 }
  0x7f   : > { %756 = sbr.rel (%p1095_p9) target bundleno = 187 (0xbb), region = 32  ;;  %p1096_p10 = scmp.le.s32.totalorder (!%p1095_p9), %s1506_s2, 0 }
  0x84   : > { %1035 = sbr.rel (%p1096_p10) target bundleno = 170 (0xaa), region = 104  ;;  %s1641_s3 = smov (!%p1096_p10), %s1498_s28 }
  0x85   : > { %s1642_s4 = smov (!%p1096_p10), %s1359_s23  ;;  %s1515_s5 = smov (!%p1096_p10), 0  }
  0x86   : > { %s1517_s6 = smov (!%p1096_p10), 0  }
  0x89 LB: >> { %v773_v63 = vld [vmem:[%s1263_s4] sm:$0xf]  ;;  %v775_v7 = vld [vmem:[%s1263_s4 + $0x4] sm:$0xf]  ;;  %v777_v8 = vld [vmem:[%s1263_s4 + $0x8] sm:$0xf]  ;;  %s1271_s6 = sphi %s1517_s6, %s767_s6   ;;  %s1267_s5 = sphi %s1515_s5, %s1645_s5   ;;  %s1263_s4 = sphi %s1642_s4, %s1644_s4   ;;  %s1259_s3 = sphi %s1641_s3, %s1643_s3  }
  0x8a   : >> { %774 = vst [vmem:[%s1259_s3] sm:$0xf] %v773_v63  ;;  %v779_v9 = vld [vmem:[%s1263_s4 + $0xc] sm:$0xf]  ;;  %v781_v10 = vld [vmem:[%s1263_s4 + $0x10] sm:$0xf]  ;;  %s837_s8 = sadd.s32 1, %s1267_s5 }
  0x8b   : >> { %776 = vst [vmem:[%s1259_s3 + $0x4] sm:$0xf] %v775_v7  ;;  %v783_v11 = vld [vmem:[%s1263_s4 + $0x14] sm:$0xf]  ;;  %v785_v12 = vld [vmem:[%s1263_s4 + $0x18] sm:$0xf]  ;;  %p838_p11 = scmp.ge.s32.totalorder %s837_s8, %s1506_s2 }
  0x8c   : >> { %778 = vst [vmem:[%s1259_s3 + $0x8] sm:$0xf] %v777_v8  ;;  %v787_v13 = vld [vmem:[%s1263_s4 + $0x1c] sm:$0xf]  ;;  %v789_v14 = vld [vmem:[%s1263_s4 + $0x20] sm:$0xf] }
  0x8d   : >> { %780 = vst [vmem:[%s1259_s3 + $0xc] sm:$0xf] %v779_v9  ;;  %v791_v15 = vld [vmem:[%s1263_s4 + $0x24] sm:$0xf]  ;;  %v793_v16 = vld [vmem:[%s1263_s4 + $0x28] sm:$0xf] }
  0x8e   : >> { %782 = vst [vmem:[%s1259_s3 + $0x10] sm:$0xf] %v781_v10  ;;  %v795_v17 = vld [vmem:[%s1263_s4 + $0x2c] sm:$0xf]  ;;  %v797_v18 = vld [vmem:[%s1263_s4 + $0x30] sm:$0xf] }
  0x8f   : >> { %784 = vst [vmem:[%s1259_s3 + $0x14] sm:$0xf] %v783_v11  ;;  %v799_v19 = vld [vmem:[%s1263_s4 + $0x34] sm:$0xf]  ;;  %v801_v20 = vld [vmem:[%s1263_s4 + $0x38] sm:$0xf] }
  0x90   : >> { %786 = vst [vmem:[%s1259_s3 + $0x18] sm:$0xf] %v785_v12  ;;  %v803_v21 = vld [vmem:[%s1263_s4 + $0x3c] sm:$0xf]  ;;  %v805_v22 = vld [vmem:[%s1263_s4 + $0x40] sm:$0xf] }
  0x91   : >> { %788 = vst [vmem:[%s1259_s3 + $0x1c] sm:$0xf] %v787_v13  ;;  %v807_v23 = vld [vmem:[%s1263_s4 + $0x44] sm:$0xf]  ;;  %s1652_s8 = smov (%p838_p11, %s837_s8), 0  ;;  %s767_s6 = sadd.s32 1, %s1271_s6  }
  0x92   : >> { %790 = vst [vmem:[%s1259_s3 + $0x20] sm:$0xf] %v789_v14  ;;  %v809_v24 = vld [vmem:[%s1263_s4 + $0x48] sm:$0xf]  ;;  %v811_v25 = vld [vmem:[%s1263_s4 + $0x4c] sm:$0xf]  ;;  %p766_p12 = scmp.ge.s32.totalorder %s767_s6, %s1506_s2  ;;  %s1645_s5 = smov %s1652_s8 }
  0x93   : >> { %792 = vst [vmem:[%s1259_s3 + $0x24] sm:$0xf] %v791_v15  ;;  %s1097_s9 = sshll.u32 %s1652_s8, 7  ;;  %v813_v26 = vld [vmem:[%s1263_s4 + $0x50] sm:$0xf] }
  0x94   : >> { %794 = vst [vmem:[%s1259_s3 + $0x28] sm:$0xf] %v793_v16  ;;  %s1576_s11 = scalar_lea.vmem %s1359_s23, %s1097_s9 [#allocation2]   ;;  %s843_s12 = scalar_lea.vmem %s1498_s28, %s1097_s9   ;;  %v815_v27 = vld [vmem:[%s1263_s4 + $0x54] sm:$0xf]  ;;  %v817_v28 = vld [vmem:[%s1263_s4 + $0x58] sm:$0xf] }
  0x95   : >> { %796 = vst [vmem:[%s1259_s3 + $0x2c] sm:$0xf] %v795_v17  ;;  %v819_v29 = vld [vmem:[%s1263_s4 + $0x5c] sm:$0xf]  ;;  %v821_v30 = vld [vmem:[%s1263_s4 + $0x60] sm:$0xf] }
  0x96   : >> { %798 = vst [vmem:[%s1259_s3 + $0x30] sm:$0xf] %v797_v18  ;;  %v823_v31 = vld [vmem:[%s1263_s4 + $0x64] sm:$0xf]  ;;  %v825_v32 = vld [vmem:[%s1263_s4 + $0x68] sm:$0xf] }
  0x97   : >> { %800 = vst [vmem:[%s1259_s3 + $0x34] sm:$0xf] %v799_v19  ;;  %v827_v33 = vld [vmem:[%s1263_s4 + $0x6c] sm:$0xf]  ;;  %v829_v34 = vld [vmem:[%s1263_s4 + $0x70] sm:$0xf] }
  0x98   : >> { %802 = vst [vmem:[%s1259_s3 + $0x38] sm:$0xf] %v801_v20  ;;  %v831_v35 = vld [vmem:[%s1263_s4 + $0x74] sm:$0xf]  ;;  %v833_v36 = vld [vmem:[%s1263_s4 + $0x78] sm:$0xf] }
  0x99   : >> { %804 = vst [vmem:[%s1259_s3 + $0x3c] sm:$0xf] %v803_v21  ;;  %v835_v37 = vld [vmem:[%s1263_s4 + $0x7c] sm:$0xf]  ;;  %s1644_s4 = smov %s1576_s11 }
  0x9a   : >> { %806 = vst [vmem:[%s1259_s3 + $0x40] sm:$0xf] %v805_v22 }
  0x9b   : >> { %808 = vst [vmem:[%s1259_s3 + $0x44] sm:$0xf] %v807_v23 }
  0x9c   : >> { %810 = vst [vmem:[%s1259_s3 + $0x48] sm:$0xf] %v809_v24 }
  0x9d   : >> { %812 = vst [vmem:[%s1259_s3 + $0x4c] sm:$0xf] %v811_v25 }
  0x9e   : >> { %814 = vst [vmem:[%s1259_s3 + $0x50] sm:$0xf] %v813_v26 }
  0x9f   : >> { %816 = vst [vmem:[%s1259_s3 + $0x54] sm:$0xf] %v815_v27 }
  0xa0   : >> { %818 = vst [vmem:[%s1259_s3 + $0x58] sm:$0xf] %v817_v28 }
  0xa1   : >> { %820 = vst [vmem:[%s1259_s3 + $0x5c] sm:$0xf] %v819_v29 }
  0xa2   : >> { %822 = vst [vmem:[%s1259_s3 + $0x60] sm:$0xf] %v821_v30 }
  0xa3   : >> { %824 = vst [vmem:[%s1259_s3 + $0x64] sm:$0xf] %v823_v31 }
  0xa4   : >> { %826 = vst [vmem:[%s1259_s3 + $0x68] sm:$0xf] %v825_v32 }
  0xa5   : >> { %828 = vst [vmem:[%s1259_s3 + $0x6c] sm:$0xf] %v827_v33  ;;  %769 = sbr.rel (!%p766_p12) target bundleno = 137 (0x89), region = 110 }
  0xa6   : >> { %830 = vst [vmem:[%s1259_s3 + $0x70] sm:$0xf] %v829_v34 }
  0xa7   : >> { %832 = vst [vmem:[%s1259_s3 + $0x74] sm:$0xf] %v831_v35 }
  0xa8   : >> { %834 = vst [vmem:[%s1259_s3 + $0x78] sm:$0xf] %v833_v36 }
  0xa9   : >> { %836 = vst [vmem:[%s1259_s3 + $0x7c] sm:$0xf] %v835_v37  ;;  %s1643_s3 = smov %s843_s12 }
  0xaa PF: > { %s1618_s14 = sand.u32 31, %s1094_s30   ;;  %s1111_s15 = sshll.u32 %s1506_s2, 7 }
  0xab   : > { %s848_s16 = scalar_lea.vmem %s1359_s23, %s1111_s15 [#allocation2]   ;;  %s850_s17 = scalar_lea.vmem %s1498_s28, %s1111_s15  }
  0xac   : > { %p1102_p13 = scmp.le.s32.totalorder %s1618_s14, 0 }
  0xad   : > { %s1273_s18 = smov (!%p1102_p13), %s850_s17   ;;  %s1277_s19 = smov (!%p1102_p13), %s848_s16  }
  0xae   : > { %1049 = sbr.rel (%p1102_p13) target bundleno = 187 (0xbb), region = 115  ;;  %s1281_s20 = smov (!%p1102_p13), 0  }
  0xaf   : > { %s1285_s21 = smov (!%p1102_p13), 0  }
  0xb3 LB: >> { %v860_v38 = vld [vmem:[%s1279_s19] sm:$0xf]  ;;  %s862_s22 = sadd.s32 1, %s1283_s20  ;;  %s854_s21 = sadd.s32 1, %s1287_s21   ;;  %s1287_s21 = sphi %s1285_s21, %s854_s21   ;;  %s1283_s20 = sphi %s1281_s20, %s1282_s20   ;;  %s1279_s19 = sphi %s1277_s19, %s867_s19   ;;  %s1275_s18 = sphi %s1273_s18, %s868_s18  }
  0xb4   : >> { %861 = vst [vmem:[%s1275_s18] sm:$0xf] %v860_v38  ;;  %p863_p0 = scmp.ge.s32.totalorder %s862_s22, %s1618_s14  ;;  %p853_p1 = scmp.ge.s32.totalorder %s854_s21, %s1618_s14 }
  0xb6   : >> { %s1654_s22 = smov (%p863_p0, %s862_s22), 0  ;;  %856 = sbr.rel (!%p853_p1) target bundleno = 179 (0xb3), region = 121 }
  0xb7   : >> { %s1103_s23 = sshll.u32 %s1654_s22, 2  ;;  %s1282_s20 = smov %s1654_s22  }
  0xb8   : >> { %s867_s19 = scalar_lea.vmem %s848_s16, %s1103_s23 [#allocation2]   ;;  %s868_s18 = scalar_lea.vmem %s850_s17, %s1103_s23  }
  0xbb PF: > { %p8_p2 = scmp.ge.s32.totalorder %s1314_s10, 4   ;;  %s1646_s6 = smov %s1251_s7 }
  0xbc   : > { %s1647_s7 = smov %s1322_s13  ;;  %s1648_s8 = smov %s1314_s10 }
  0xbd   :  { %10 = sbr.rel (!%p8_p2) target bundleno = 2 (0x2), region = 132 }

// kernel: cnn_forward.7
= control target key start
LH: loop header
LB: loop body
LE: loop exit
PB: predicated region body
PF: predicated region fallthrough
CT: control target
= control target key end

     0   :  { %s2261_s1 = inlined_call_operand.vmem [shape: bf16[896,128], index: 1, kind: input, shape index: {}]   ;;  %s2262_s2 = inlined_call_operand.vmem [shape: f32[1,128], index: 2, kind: input, shape index: {}]   ;;  %s2263_s0 = inlined_call_operand.vmem [shape: bf16[98,896], index: 0, kind: input, shape index: {}]   ;;  %s2264_s3 = inlined_call_operand.vmem [shape: bf16[98,128], index: 3, kind: output, shape index: {}]  }
   0x1   :  { %v1544_v0 = vld [vmem:[%s2261_s1 + $0x38] sm:$0xff]  ;;  %v1543_v3 = vld [vmem:[%s2261_s1 + $0x30] sm:$0xff]  ;;  %v1542_v6 = vld [vmem:[%s2261_s1 + $0x28] sm:$0xff] }
   0x2   :  { %v1552_v1 = vld [vmem:[%s2261_s1 + $0x78] sm:$0xff]  ;;  %759 = vmatpush.bf16.msra.mxu0 %v1544_v0  ;;  %1628 = vmatpush.bf16.msra.mxu3 %v1544_v0  ;;  %v1551_v4 = vld [vmem:[%s2261_s1 + $0x70] sm:$0xff]  ;;  %v1550_v7 = vld [vmem:[%s2261_s1 + $0x68] sm:$0xff] }
   0x3   :  { %v1560_v2 = vld [vmem:[%s2261_s1 + $0xb8] sm:$0xff]  ;;  %802 = vmatpush.bf16.msra.mxu1 %v1552_v1  ;;  %v1559_v5 = vld [vmem:[%s2261_s1 + $0xb0] sm:$0xff]  ;;  %v1558_v8 = vld [vmem:[%s2261_s1 + $0xa8] sm:$0xff] }
   0x4   :  { %845 = vmatpush.bf16.msra.mxu2 %v1560_v2  ;;  %v1541_v9 = vld [vmem:[%s2261_s1 + $0x20] sm:$0xff]  ;;  %v1540_v12 = vld [vmem:[%s2261_s1 + $0x18] sm:$0xff]  ;;  %v1539_v15 = vld [vmem:[%s2261_s1 + $0x10] sm:$0xff] }
   0x5   :  { %v1549_v10 = vld [vmem:[%s2261_s1 + $0x60] sm:$0xff]  ;;  %v1548_v13 = vld [vmem:[%s2261_s1 + $0x58] sm:$0xff]  ;;  %v1547_v16 = vld [vmem:[%s2261_s1 + $0x50] sm:$0xff] }
   0x6   :  { %760 = vmatpush.bf16.msra.mxu0 %v1543_v3  ;;  %1629 = vmatpush.bf16.msra.mxu3 %v1543_v3  ;;  %v1557_v11 = vld [vmem:[%s2261_s1 + $0xa0] sm:$0xff]  ;;  %v1556_v14 = vld [vmem:[%s2261_s1 + $0x98] sm:$0xff]  ;;  %v1555_v17 = vld [vmem:[%s2261_s1 + $0x90] sm:$0xff] }
   0x7   :  { %803 = vmatpush.bf16.msra.mxu1 %v1551_v4  ;;  %v1538_v18 = vld [vmem:[%s2261_s1 + $0x8] sm:$0xff]  ;;  %v1537_v21 = vld [vmem:[%s2261_s1] sm:$0xff]  ;;  %v1498_v25 = vld [vmem:[%s2263_s0 + $0x18] sm:$0xf0] }
   0x8   :  { %846 = vmatpush.bf16.msra.mxu2 %v1559_v5  ;;  %v1546_v19 = vld [vmem:[%s2261_s1 + $0x48] sm:$0xff]  ;;  %v1545_v22 = vld [vmem:[%s2261_s1 + $0x40] sm:$0xff]  ;;  %v1161_v26 = vld [vmem:[%s2263_s0 + $0x70] sm:$0xf] }
   0x9   :  { %v1554_v20 = vld [vmem:[%s2261_s1 + $0x88] sm:$0xff]  ;;  %v1553_v23 = vld [vmem:[%s2261_s1 + $0x80] sm:$0xff]  ;;  %v1772_v32 = vld [vmem:[%s2261_s1 + $0x1b8] sm:$0xff] }
   0xa   :  { %761 = vmatpush.bf16.msra.mxu0 %v1542_v6  ;;  %1630 = vmatpush.bf16.msra.mxu3 %v1542_v6  ;;  %v1105_v24 = vld [vmem:[%s2263_s0] sm:$0xf]  ;;  %v1512_v27 = vld [vmem:[%s2263_s0 + $0x88] sm:$0xf0]  ;;  %v1495_v28 = vld [vmem:[%s2263_s0 + $0x4] sm:$0xf] }
   0xb   :  { %804 = vmatpush.bf16.msra.mxu1 %v1550_v7  ;;  %v1107_v29 = vld [vmem:[%s2263_s0 + $0x1c] sm:$0xf0]  ;;  %v1113_v30 = vld [vmem:[%s2263_s0 + $0x8] sm:$0xf]  ;;  %v1499_v31 = vld [vmem:[%s2263_s0 + $0x20] sm:$0xf0]  ;;  %v1106_v34 = vor.u32 %v1498_v25, %v1105_v24  ;;  %v1162_v35 = vor.u32 %v1512_v27, %v1161_v26 }
   0xc   :  { %847 = vmatpush.bf16.msra.mxu2 %v1558_v8  ;;  %v1576_v33 = vld [vmem:[%s2261_s1 + $0x138] sm:$0xff]  ;;  %v1110_v36 = vor.u32 %v1495_v28, %v1107_v29  ;;  %v1114_v37 = vor.u32 %v1499_v31, %v1113_v30  ;;  %v1575_v40 = vld [vmem:[%s2261_s1 + $0x130] sm:$0xff]  ;;  %v1574_v44 = vld [vmem:[%s2261_s1 + $0x128] sm:$0xff] }
   0xd   :  { %v1780_v38 = vld [vmem:[%s2261_s1 + $0x178] sm:$0xff]  ;;  %v1792_v41 = vld [vmem:[%s2261_s1 + $0x1b0] sm:$0xff]  ;;  %v1810_v45 = vld [vmem:[%s2261_s1 + $0x1a8] sm:$0xff] }
   0xe   :  { %762 = vmatpush.bf16.msra.mxu0 %v1541_v9  ;;  %1631 = vmatpush.bf16.msra.mxu3 %v1541_v9  ;;  %v1568_v39 = vld [vmem:[%s2261_s1 + $0xf8] sm:$0xff]  ;;  %v1798_v42 = vld [vmem:[%s2261_s1 + $0x170] sm:$0xff]  ;;  %v1566_v46 = vld [vmem:[%s2261_s1 + $0xe8] sm:$0xff] }
   0xf   :  { %805 = vmatpush.bf16.msra.mxu1 %v1549_v10  ;;  %v1567_v43 = vld [vmem:[%s2261_s1 + $0xf0] sm:$0xff]  ;;  %v1819_v47 = vld [vmem:[%s2261_s1 + $0x168] sm:$0xff]  ;;  %v1573_v48 = vld [vmem:[%s2261_s1 + $0x120] sm:$0xff] }
  0x10   :  { %848 = vmatpush.bf16.msra.mxu2 %v1557_v11  ;;  %v1133_v49 = vld [vmem:[%s2263_s0 + $0x38] sm:$0xf]  ;;  %v1831_v50 = vld [vmem:[%s2261_s1 + $0x1a0] sm:$0xff]  ;;  %v1505_v51 = vld [vmem:[%s2263_s0 + $0x50] sm:$0xf0] }
  0x11   :  { %v1189_v52 = vld [vmem:[%s2263_s0 + $0xa8] sm:$0xf]  ;;  %v1519_v53 = vld [vmem:[%s2263_s0 + $0xc0] sm:$0xf0]  ;;  %v1502_v54 = vld [vmem:[%s2263_s0 + $0x3c] sm:$0xf]  ;;  %v1134_v61 = vor.u32 %v1505_v51, %v1133_v49 }
  0x12   :  { %763 = vmatpush.bf16.msra.mxu0 %v1540_v12  ;;  %1632 = vmatpush.bf16.msra.mxu3 %v1540_v12  ;;  %v1135_v55 = vld [vmem:[%s2263_s0 + $0x54] sm:$0xf0]  ;;  %v1141_v56 = vld [vmem:[%s2263_s0 + $0x40] sm:$0xf]  ;;  %v1506_v57 = vld [vmem:[%s2263_s0 + $0x58] sm:$0xf0]  ;;  %v1190_v62 = vor.u32 %v1519_v53, %v1189_v52 }
  0x13   :  { %806 = vmatpush.bf16.msra.mxu1 %v1548_v13  ;;  %v1565_v58 = vld [vmem:[%s2261_s1 + $0xe0] sm:$0xff]  ;;  %v1572_v60 = vld [vmem:[%s2261_s1 + $0x118] sm:$0xff]  ;;  %v1138_v63 = vor.u32 %v1502_v54, %v1135_v55  ;;  %v1142_v0 = vor.u32 %v1506_v57, %v1141_v56  ;;  %v1571_v1 = vld [vmem:[%s2261_s1 + $0x110] sm:$0xff] }
  0x14   :  { %849 = vmatpush.bf16.msra.mxu2 %v1556_v14  ;;  %v1861_v59 = vld [vmem:[%s2261_s1 + $0x160] sm:$0xff]  ;;  %v1564_v2 = vld [vmem:[%s2261_s1 + $0xd8] sm:$0xff]  ;;  %v1570_v5 = vld [vmem:[%s2261_s1 + $0x108] sm:$0xff] }
  0x15   :  { %v1877_v3 = vld [vmem:[%s2261_s1 + $0x198] sm:$0xff]  ;;  %v1563_v6 = vld [vmem:[%s2261_s1 + $0xd0] sm:$0xff]  ;;  %v1569_v7 = vld [vmem:[%s2261_s1 + $0x100] sm:$0xff] }
  0x16   :  { %764 = vmatpush.bf16.msra.mxu0 %v1539_v15  ;;  %1633 = vmatpush.bf16.msra.mxu3 %v1539_v15  ;;  %v1580_v4 = vld [vmem:[%s2261_s1 + $0x158] sm:$0xff]  ;;  %v1217_v8 = vld [vmem:[%s2263_s0 + $0xe0] sm:$0xf]  ;;  %v1509_v10 = vld [vmem:[%s2263_s0 + $0x74] sm:$0xf] }
  0x17   :  { %807 = vmatpush.bf16.msra.mxu1 %v1547_v16  ;;  %v1526_v9 = vld [vmem:[%s2263_s0 + $0xf8] sm:$0xf0]  ;;  %v1121_v11 = vld [vmem:[%s2263_s0 + $0x10] sm:$0xf]  ;;  %v1500_v12 = vld [vmem:[%s2263_s0 + $0x28] sm:$0xf0] }
  0x18   :  { %850 = vmatpush.bf16.msra.mxu2 %v1555_v17  ;;  %v1163_v13 = vld [vmem:[%s2263_s0 + $0x8c] sm:$0xf0]  ;;  %v1169_v14 = vld [vmem:[%s2263_s0 + $0x78] sm:$0xf]  ;;  %v1513_v15 = vld [vmem:[%s2263_s0 + $0x90] sm:$0xf0]  ;;  %v1218_v16 = vor.u32 %v1526_v9, %v1217_v8  ;;  %v1122_v17 = vor.u32 %v1500_v12, %v1121_v11 }
  0x19   :  { %v1245_v24 = vld [vmem:[%s2263_s0 + $0x118] sm:$0xf]  ;;  %v1533_v25 = vld [vmem:[%s2263_s0 + $0x130] sm:$0xf0]  ;;  %v1516_v26 = vld [vmem:[%s2263_s0 + $0xac] sm:$0xf] }
  0x1a   :  { %765 = vmatpush.bf16.msra.mxu0 %v1538_v18  ;;  %1634 = vmatpush.bf16.msra.mxu3 %v1538_v18  ;;  %v1166_v18 = vor.u32 %v1509_v10, %v1163_v13  ;;  %v1149_v27 = vld [vmem:[%s2263_s0 + $0x48] sm:$0xf]  ;;  %v1507_v28 = vld [vmem:[%s2263_s0 + $0x60] sm:$0xf0]  ;;  %v1197_v30 = vld [vmem:[%s2263_s0 + $0xb0] sm:$0xf] }
  0x1b   :  { %808 = vmatpush.bf16.msra.mxu1 %v1546_v19  ;;  %v1170_v19 = vor.u32 %v1513_v15, %v1169_v14  ;;  %v1191_v29 = vld [vmem:[%s2263_s0 + $0xc4] sm:$0xf0]  ;;  %v1520_v31 = vld [vmem:[%s2263_s0 + $0xc8] sm:$0xf0]  ;;  %v1585_v54 = vld [vmem:[%s2261_s1 + $0x180] sm:$0xff] }
  0x1c   :  { %851 = vmatpush.bf16.msra.mxu2 %v1554_v20  ;;  %v1920_v20 = vld [vmem:[%s2261_s1 + $0x190] sm:$0xff]  ;;  %v1577_v55 = vld [vmem:[%s2261_s1 + $0x140] sm:$0xff]  ;;  %v1530_v56 = vld [vmem:[%s2263_s0 + $0x11c] sm:$0xf] }
  0x1d   :  { %v1496_v57 = vld [vmem:[%s2263_s0 + $0xc] sm:$0xf]  ;;  %v1510_v11 = vld [vmem:[%s2263_s0 + $0x7c] sm:$0xf]  ;;  %v1171_v12 = vld [vmem:[%s2263_s0 + $0x94] sm:$0xf0] }
  0x1e   :  { %766 = vmatpush.bf16.msra.mxu0 %v1537_v21  ;;  %1635 = vmatpush.bf16.msra.mxu3 %v1537_v21  ;;  %v1562_v21 = vld [vmem:[%s2261_s1 + $0xc8] sm:$0xff]  ;;  %v1535_v14 = vld [vmem:[%s2263_s0 + $0x140] sm:$0xf0] }
  0x1f   :  { %809 = vmatpush.bf16.msra.mxu1 %v1545_v22  ;;  %v1579_v22 = vld [vmem:[%s2261_s1 + $0x150] sm:$0xff]  ;;  %v1261_v13 = vld [vmem:[%s2263_s0 + $0x128] sm:$0xf]  ;;  %v1504_v15 = vld [vmem:[%s2263_s0 + $0x4c] sm:$0xf] }
  0x20   :  { %852 = vmatpush.bf16.msra.mxu2 %v1553_v23  ;;  %v1561_v23 = vld [vmem:[%s2261_s1 + $0xc0] sm:$0xff] }
  0x21   :  { %767 = vmatmul.bf16.vlgmr.msra.gmra.mxu0 %v1106_v34  ;;  %777 = vmatmul.bf16.vlgmr.msra.gmra.mxu3 %v1162_v35  ;;  %v1150_v34 = vor.u32 %v1507_v28, %v1149_v27  ;;  %v1194_v35 = vor.u32 %v1516_v26, %v1191_v29  ;;  %v1517_v26 = vld [vmem:[%s2263_s0 + $0xb4] sm:$0xf]  ;;  %v1199_v27 = vld [vmem:[%s2263_s0 + $0xcc] sm:$0xf0]  ;;  %v1511_v28 = vld [vmem:[%s2263_s0 + $0x84] sm:$0xf] }
  0x22   :  { %931 = vmatpush.bf16.msrb.mxu0 %v1576_v33  ;;  %810 = vmatmul.bf16.vlgmr.msra.gmra.mxu1 %v1110_v36  ;;  %v1246_v33 = vor.u32 %v1533_v25, %v1245_v24  ;;  %v1198_v36 = vor.u32 %v1520_v31, %v1197_v30  ;;  %v2072_v24 = vld [vmem:[%s2262_s2] ss:$0 sm:$0xff]  ;;  %v1185_v30 = vld [vmem:[%s2263_s0 + $0x88] sm:$0xf]  ;;  %v1515_v31 = vld [vmem:[%s2263_s0 + $0xa0] sm:$0xf0] }
  0x23   :  { %853 = vmatmul.bf16.vlgmr.msra.gmra.mxu2 %v1114_v37  ;;  %1636 = vmatpush.bf16.msrb.mxu1 %v1780_v38  ;;  %v1586_v37 = vld [vmem:[%s2261_s1 + $0x188] sm:$0xff]  ;;  %v1179_v29 = vld [vmem:[%s2263_s0 + $0x9c] sm:$0xf0] }
  0x24   :  { %1644 = vmatpush.bf16.msrb.mxu2 %v1772_v32  ;;  %888 = vmatpush.bf16.msrb.mxu3 %v1568_v39  ;;  %v62_v39 = vld [vmem:[%s2263_s0 + $0x150] sm:$0x11] }
  0x26   :  { %932 = vmatpush.bf16.msrb.mxu0 %v1575_v40  ;;  %v318_v40 = vunpack.c.l.b16 %v62_v39 }
  0x27   :  { %1637 = vmatpush.bf16.msrb.mxu1 %v1798_v42 }
  0x28   :  { %1645 = vmatpush.bf16.msrb.mxu2 %v1792_v41  ;;  %889 = vmatpush.bf16.msrb.mxu3 %v1567_v43  ;;  %v1177_v43 = vld [vmem:[%s2263_s0 + $0x80] sm:$0xf]  ;;  %v367_v49 = vpack.c.b16 %v318_v40, %v318_v40 }
  0x2a   :  { %933 = vmatpush.bf16.msrb.mxu0 %v1574_v44  ;;  %v1514_v44 = vld [vmem:[%s2263_s0 + $0x98] sm:$0xf0] }
  0x2b   :  { %1638 = vmatpush.bf16.msrb.mxu1 %v1819_v47  ;;  %v1178_v51 = vor.u32 %v1514_v44, %v1177_v43 }
  0x2c   :  { %1646 = vmatpush.bf16.msrb.mxu2 %v1810_v45  ;;  %890 = vmatpush.bf16.msrb.mxu3 %v1566_v46  ;;  %v1219_v46 = vld [vmem:[%s2263_s0 + $0xfc] sm:$0xf0] }
  0x2e   :  { %934 = vmatpush.bf16.msrb.mxu0 %v1573_v48  ;;  %v1527_v48 = vld [vmem:[%s2263_s0 + $0x100] sm:$0xf0] }
  0x2f   :  { %1639 = vmatpush.bf16.msrb.mxu1 %v1861_v59 }
  0x30   :  { %1647 = vmatpush.bf16.msrb.mxu2 %v1831_v50  ;;  %891 = vmatpush.bf16.msrb.mxu3 %v1565_v58  ;;  %v1115_v58 = vld [vmem:[%s2263_s0 + $0x24] sm:$0xf0] }
  0x31   :  { %772 = vmatmul.bf16.gmra.mxu0 %v1134_v61  ;;  %782 = vmatmul.bf16.gmra.mxu3 %v1190_v62  ;;  %v1253_v61 = vld [vmem:[%s2263_s0 + $0x120] sm:$0xf]  ;;  %v1534_v62 = vld [vmem:[%s2263_s0 + $0x138] sm:$0xf0] }
  0x32   :  { %935 = vmatpush.bf16.msrb.mxu0 %v1572_v60  ;;  %815 = vmatmul.bf16.gmra.mxu1 %v1138_v63  ;;  %v1247_v60 = vld [vmem:[%s2263_s0 + $0x134] sm:$0xf0]  ;;  %v1118_v63 = vor.u32 %v1496_v57, %v1115_v58  ;;  %v1213_v57 = vld [vmem:[%s2263_s0 + $0xc0] sm:$0xf]  ;;  %v1522_v58 = vld [vmem:[%s2263_s0 + $0xd8] sm:$0xf0] }
  0x33   :  { %858 = vmatmul.bf16.gmra.mxu2 %v1142_v0  ;;  %1640 = vmatpush.bf16.msrb.mxu1 %v1580_v4 }
  0x34   :  { %892 = vmatpush.bf16.msrb.mxu3 %v1564_v2  ;;  %1648 = vmatpush.bf16.msrb.mxu2 %v1877_v3  ;;  %v1254_v2 = vor.u32 %v1534_v62, %v1253_v61 }
  0x36   :  { %936 = vmatpush.bf16.msrb.mxu0 %v1571_v1  ;;  %v1250_v1 = vor.u32 %v1530_v56, %v1247_v60  ;;  %v1207_v56 = vld [vmem:[%s2263_s0 + $0xd4] sm:$0xf0] }
  0x37   :  { %1641 = vmatpush.bf16.msrb.mxu1 %v1579_v22 }
  0x38   :  { %893 = vmatpush.bf16.msrb.mxu3 %v1563_v6  ;;  %1649 = vmatpush.bf16.msrb.mxu2 %v1920_v20  ;;  %v1143_v6 = vld [vmem:[%s2263_s0 + $0x5c] sm:$0xf0] }
  0x3a   :  { %937 = vmatpush.bf16.msrb.mxu0 %v1570_v5  ;;  %v319_v5 = vunpack.c.h.b16 %v62_v39 }
  0x3c   :  { %894 = vmatpush.bf16.msrb.mxu3 %v1562_v21  ;;  %1650 = vmatpush.bf16.msrb.mxu2 %v1586_v37  ;;  %v368_v9 = vpack.c.b16 %v319_v5, %v319_v5 }
  0x3e   :  { %938 = vmatpush.bf16.msrb.mxu0 %v1569_v7  ;;  %v1528_v7 = vld [vmem:[%s2263_s0 + $0x108] sm:$0xf0] }
  0x40   :  { %895 = vmatpush.bf16.msrb.mxu3 %v1561_v23  ;;  %1651 = vmatpush.bf16.msrb.mxu2 %v1585_v54  ;;  %v2067_v23 = vld [vmem:[%s2263_s0 + $0x160] sm:$0x11] }
  0x41   :  { %787 = vmatmul.bf16.gmra.mxu3 %v1218_v16  ;;  %939 = vmatmul.bf16.vlgmr.msrb.gmra.mxu0 %v1122_v17  ;;  %v1151_v16 = vld [vmem:[%s2263_s0 + $0x64] sm:$0xf0]  ;;  %v1157_v17 = vld [vmem:[%s2263_s0 + $0x50] sm:$0xf]  ;;  %v322_v25 = vunpack.c.l.b16 %v2067_v23 }
  0x42   :  { %974 = vmatpush.bf16.msra.mxu0 %v1780_v38  ;;  %820 = vmatmul.bf16.gmra.mxu1 %v1166_v18  ;;  %v1578_v38 = vld [vmem:[%s2261_s1 + $0x148] sm:$0xff]  ;;  %v1154_v21 = vor.u32 %v1504_v15, %v1151_v16  ;;  %v1235_v15 = vld [vmem:[%s2263_s0 + $0x10c] sm:$0xf0]  ;;  %v1241_v16 = vld [vmem:[%s2263_s0 + $0xf8] sm:$0xf] }
  0x43   :  { %863 = vmatmul.bf16.gmra.mxu2 %v1170_v19  ;;  %1642 = vmatpush.bf16.msrb.mxu1 %v1578_v38  ;;  %v1508_v18 = vld [vmem:[%s2263_s0 + $0x68] sm:$0xf0]  ;;  %v1174_v19 = vor.u32 %v1510_v11, %v1171_v12  ;;  %v1255_v11 = vld [vmem:[%s2263_s0 + $0x13c] sm:$0xf0]  ;;  %v1525_v12 = vld [vmem:[%s2263_s0 + $0xf4] sm:$0xf] }
  0x46   :  { %975 = vmatpush.bf16.msra.mxu0 %v1798_v42  ;;  %v1523_v42 = vld [vmem:[%s2263_s0 + $0xe4] sm:$0xf] }
  0x47   :  { %v1222_v52 = vor.u32 %v1523_v42, %v1219_v46  ;;  %1643 = vmatpush.bf16.msrb.mxu1 %v1577_v55 }
  0x4a   :  { %976 = vmatpush.bf16.msra.mxu0 %v1819_v47  ;;  %v1225_v47 = vld [vmem:[%s2263_s0 + $0xe8] sm:$0xf] }
  0x4b   :  { %v1226_v53 = vor.u32 %v1527_v48, %v1225_v47 }
  0x4e   :  { %977 = vmatpush.bf16.msra.mxu0 %v1861_v59  ;;  %v1205_v59 = vld [vmem:[%s2263_s0 + $0xb8] sm:$0xf] }
  0x51   :  { %792 = vmatmul.bf16.gmra.mxu3 %v1246_v33  ;;  %944 = vmatmul.bf16.gmra.mxu0 %v1150_v34  ;;  %v1202_v33 = vor.u32 %v1517_v26, %v1199_v27  ;;  %v371_v34 = vpack.c.b16 %v322_v25, %v322_v25  ;;  %v1238_v27 = vor.u32 %v1525_v12, %v1235_v15 }
  0x52   :  { %978 = vmatpush.bf16.msra.mxu0 %v1580_v4  ;;  %825 = vmatmul.bf16.gmra.mxu1 %v1194_v35  ;;  %v1503_v4 = vld [vmem:[%s2263_s0 + $0x44] sm:$0xf] }
  0x53   :  { %868 = vmatmul.bf16.gmra.mxu2 %v1198_v36  ;;  %v1182_v36 = vor.u32 %v1511_v28, %v1179_v29 }
  0x56   :  { %979 = vmatpush.bf16.msra.mxu0 %v1579_v22  ;;  %v1158_v22 = vor.u32 %v1508_v18, %v1157_v17  ;;  %v1529_v17 = vld [vmem:[%s2263_s0 + $0x110] sm:$0xf0] }
  0x57   :  { %v1242_v28 = vor.u32 %v1529_v17, %v1241_v16 }
  0x5a   :  { %980 = vmatpush.bf16.msra.mxu0 %v1578_v38 }
  0x5e   :  { %981 = vmatpush.bf16.msra.mxu0 %v1577_v55  ;;  %v1518_v55 = vld [vmem:[%s2263_s0 + $0xbc] sm:$0xf] }
  0x61   :  { %797 = vmatmul.bf16.gmra.mxu3 %v367_v49  ;;  %949 = vmatmul.bf16.gmra.mxu0 %v1178_v51  ;;  %v1524_v51 = vld [vmem:[%s2263_s0 + $0xec] sm:$0xf] }
  0x62   :  { %830 = vmatmul.bf16.gmra.mxu1 %v1222_v52  ;;  %1017 = vmatpush.bf16.msrb.mxu0 %v1772_v32  ;;  %v1521_v32 = vld [vmem:[%s2263_s0 + $0xd0] sm:$0xf0]  ;;  %v1227_v52 = vld [vmem:[%s2263_s0 + $0x104] sm:$0xf0] }
  0x63   :  { %873 = vmatmul.bf16.gmra.mxu2 %v1226_v53  ;;  %v1206_v0 = vor.u32 %v1521_v32, %v1205_v59  ;;  %v1497_v53 = vld [vmem:[%s2263_s0 + $0x14] sm:$0xf]  ;;  %v1230_v60 = vor.u32 %v1524_v51, %v1227_v52 }
  0x66   :  { %1018 = vmatpush.bf16.msrb.mxu0 %v1792_v41  ;;  %v2023_v41 = vld [vmem:[%s2263_s0 + $0x158] sm:$0x11] }
  0x6a   :  { %1019 = vmatpush.bf16.msrb.mxu0 %v1810_v45  ;;  %v320_v45 = vunpack.c.l.b16 %v2023_v41 }
  0x6c   :  { %v369_v10 = vpack.c.b16 %v320_v45, %v320_v45 }
  0x6e   :  { %1020 = vmatpush.bf16.msrb.mxu0 %v1831_v50  ;;  %v1233_v50 = vld [vmem:[%s2263_s0 + $0xf0] sm:$0xf] }
  0x6f   :  { %v1234_v8 = vor.u32 %v1528_v7, %v1233_v50 }
  0x71   :  { %896 = vmatmul.bf16.vlgmr.msrb.gmra.mxu3 %v1118_v63  ;;  %954 = vmatmul.bf16.gmra.mxu0 %v1206_v0  ;;  %v1210_v0 = vor.u32 %v1518_v55, %v1207_v56 }
  0x72   :  { %835 = vmatmul.bf16.gmra.mxu1 %v1250_v1  ;;  %1021 = vmatpush.bf16.msrb.mxu0 %v1877_v3  ;;  %v1146_v3 = vor.u32 %v1503_v4, %v1143_v6  ;;  %v1214_v1 = vor.u32 %v1522_v58, %v1213_v57 }
  0x73   :  { %878 = vmatmul.bf16.gmra.mxu2 %v1254_v2 }
  0x76   :  { %1022 = vmatpush.bf16.msrb.mxu0 %v1920_v20  ;;  %v1262_v20 = vor.u32 %v1535_v14, %v1261_v13  ;;  %v1129_v13 = vld [vmem:[%s2263_s0 + $0x18] sm:$0xf]  ;;  %v1501_v14 = vld [vmem:[%s2263_s0 + $0x30] sm:$0xf0] }
  0x7a   :  { %1023 = vmatpush.bf16.msrb.mxu0 %v1586_v37  ;;  %v1186_v37 = vor.u32 %v1515_v31, %v1185_v30 }
  0x7e   :  { %1024 = vmatpush.bf16.msrb.mxu0 %v1585_v54  ;;  %v1123_v54 = vld [vmem:[%s2263_s0 + $0x2c] sm:$0xf0] }
  0x7f   :  { %v1126_v61 = vor.u32 %v1497_v53, %v1123_v54 }
  0x81   :  { %901 = vmatmul.bf16.gmra.mxu3 %v1146_v3  ;;  %959 = vmatmul.bf16.gmra.mxu0 %v1234_v8 }
  0x82   :  { %840 = vmatmul.bf16.gmra.mxu1 %v368_v9 }
  0x83   :  { %883 = vmatmul.bf16.gmra.mxu2 %v369_v10  ;;  %v1531_v10 = vld [vmem:[%s2263_s0 + $0x124] sm:$0xf] }
  0x91   :  { %906 = vmatmul.bf16.gmra.mxu3 %v1174_v19  ;;  %964 = vmatmul.bf16.gmra.mxu0 %v1262_v20  ;;  %v1258_v20 = vor.u32 %v1531_v10, %v1255_v11 }
  0x92   :  { %987 = vmatmul.bf16.vlgmr.msrb.gmra.mxu1 %v1154_v21  ;;  %v1130_v21 = vor.u32 %v1501_v14, %v1129_v13 }
  0x93   :  { %1030 = vmatmul.bf16.vlgmr.msrb.gmra.mxu2 %v1158_v22 }
  0x9e   :  { %v768_v35 = vpop.f32.mrf.mxu0 }
  0x9f   :  { %v769_v38 = vadd.f32 %v2072_v24, %v768_v35  ;;  %v811_v39 = vpop.f32.mrf.mxu1 }
  0xa1   :  { %v812_v40 = vadd.f32 %v811_v39, %v769_v38  ;;  %911 = vmatmul.bf16.gmra.mxu3 %v1202_v33  ;;  %969 = vmatmul.bf16.gmra.mxu0 %v371_v34  ;;  %v321_v39 = vunpack.c.h.b16 %v2023_v41 }
  0xa2   :  { %992 = vmatmul.bf16.gmra.mxu1 %v1182_v36 }
  0xa3   :  { %1035 = vmatmul.bf16.gmra.mxu2 %v1186_v37 }
  0xa4   :  { %v778_v42 = vpop.f32.mrf.mxu3 }
  0xa5   :  { %v779_v22 = vadd.f32 %v2072_v24, %v778_v42  ;;  %v1263_v42 = vld [vmem:[%s2263_s0 + $0x144] sm:$0xf0] }
  0xa6   :  { %v854_v43 = vpop.f32.mrf.mxu2  ;;  %v770_v46 = vpop.f32.mrf.mxu0 }
  0xa7   :  { %v2094_v44 = vadd.f32 %v854_v43, %v812_v40  ;;  %v771_v47 = vadd.f32 %v2072_v24, %v770_v46  ;;  %v813_v48 = vpop.f32.mrf.mxu1  ;;  %v1532_v40 = vld [vmem:[%s2263_s0 + $0x12c] sm:$0xf]  ;;  %v1269_v43 = vld [vmem:[%s2263_s0 + $0x130] sm:$0xf] }
  0xa8   :  { %v1536_v46 = vld [vmem:[%s2263_s0 + $0x148] sm:$0xf0]  ;;  %v1266_v53 = vor.u32 %v1532_v40, %v1263_v42 }
  0xa9   :  { %v814_v49 = vadd.f32 %v813_v48, %v771_v47  ;;  %v1270_v54 = vor.u32 %v1536_v46, %v1269_v43 }
  0xac   :  { %v780_v59 = vpop.f32.mrf.mxu3 }
  0xad   :  { %v781_v34 = vadd.f32 %v2072_v24, %v780_v59 }
  0xae   :  { %v856_v32 = vpop.f32.mrf.mxu2  ;;  %v773_v63 = vpop.f32.mrf.mxu0 }
  0xaf   :  { %v2121_v62 = vadd.f32 %v856_v32, %v814_v49  ;;  %v774_v2 = vadd.f32 %v2072_v24, %v773_v63  ;;  %v816_v4 = vpop.f32.mrf.mxu1  ;;  %v370_v49 = vpack.c.b16 %v321_v39, %v321_v39  ;;  %v65_v63 = vld [vmem:[%s2263_s0 + $0x168] sm:$0x1] }
  0xb1   :  { %v817_v5 = vadd.f32 %v816_v4, %v774_v2  ;;  %916 = vmatmul.bf16.gmra.mxu3 %v1230_v60  ;;  %982 = vmatmul.bf16.vlgmr.msra.gmra.mxu0 %v1126_v61  ;;  %v324_v2 = vunpack.c.l.b16 %v65_v63 }
  0xb2   :  { %997 = vmatmul.bf16.gmra.mxu1 %v1210_v0 }
  0xb3   :  { %1040 = vmatmul.bf16.gmra.mxu2 %v1214_v1  ;;  %v323_v1 = vunpack.c.h.b16 %v2067_v23 }
  0xb4   :  { %v783_v45 = vpop.f32.mrf.mxu3 }
  0xb5   :  { %v784_v41 = vadd.f32 %v2072_v24, %v783_v45 }
  0xb6   :  { %v859_v6 = vpop.f32.mrf.mxu2  ;;  %v775_v7 = vpop.f32.mrf.mxu0 }
  0xb7   :  { %v2124_v50 = vadd.f32 %v859_v6, %v817_v5  ;;  %v776_v3 = vadd.f32 %v2072_v24, %v775_v7  ;;  %v818_v8 = vpop.f32.mrf.mxu1 }
  0xb9   :  { %v819_v9 = vadd.f32 %v818_v8, %v776_v3  ;;  %v372_v3 = vpack.c.b16 %v323_v1, %v323_v1  ;;  %v373_v8 = vpack.c.b16 %v324_v2, %v324_v2 }
  0xbc   :  { %v785_v18 = vpop.f32.mrf.mxu3 }
  0xbd   :  { %v786_v59 = vadd.f32 %v2072_v24, %v785_v18 }
  0xbe   :  { %v861_v19 = vpop.f32.mrf.mxu2  ;;  %v2154_v26 = vpop.f32.mrf.mxu0 }
  0xbf   :  { %v2152_v25 = vadd.f32 %v861_v19, %v819_v9  ;;  %v821_v29 = vpop.f32.mrf.mxu1 }
  0xc0   :  { %v822_v30 = vadd.f32 %v821_v29, %v779_v22 }
  0xc1   :  { %921 = vmatmul.bf16.gmra.mxu3 %v1258_v20  ;;  %1025 = vmatmul.bf16.vlgmr.msrb.gmra.mxu0 %v1130_v21 }
  0xc2   :  { %1002 = vmatmul.bf16.gmra.mxu1 %v1238_v27 }
  0xc3   :  { %1045 = vmatmul.bf16.gmra.mxu2 %v1242_v28 }
  0xc4   :  { %v788_v31 = vpop.f32.mrf.mxu3 }
  0xc5   :  { %v789_v45 = vadd.f32 %v2072_v24, %v788_v31 }
  0xc6   :  { %v864_v33 = vpop.f32.mrf.mxu2  ;;  %v2159_v36 = vpop.f32.mrf.mxu0 }
  0xc7   :  { %v2157_v35 = vadd.f32 %v864_v33, %v822_v30  ;;  %v823_v37 = vpop.f32.mrf.mxu1 }
  0xc8   :  { %v824_v38 = vadd.f32 %v823_v37, %v781_v34 }
  0xcc   :  { %v790_v47 = vpop.f32.mrf.mxu3 }
  0xcd   :  { %v791_v13 = vadd.f32 %v2072_v24, %v790_v47 }
  0xce   :  { %v866_v48 = vpop.f32.mrf.mxu2  ;;  %v2177_v52 = vpop.f32.mrf.mxu0 }
  0xcf   :  { %v2175_v51 = vadd.f32 %v866_v48, %v824_v38  ;;  %v826_v55 = vpop.f32.mrf.mxu1 }
  0xd0   :  { %v827_v56 = vadd.f32 %v826_v55, %v784_v41 }
  0xd1   :  { %926 = vmatmul.bf16.gmra.mxu3 %v370_v49 }
  0xd2   :  { %1007 = vmatmul.bf16.gmra.mxu1 %v1266_v53 }
  0xd3   :  { %1050 = vmatmul.bf16.gmra.mxu2 %v1270_v54 }
  0xd4   :  { %v793_v57 = vpop.f32.mrf.mxu3 }
  0xd5   :  { %v794_v19 = vadd.f32 %v2072_v24, %v793_v57 }
  0xd6   :  { %v869_v58 = vpop.f32.mrf.mxu2  ;;  %v947_v60 = vpop.f32.mrf.mxu0 }
  0xd7   :  { %v2180_v32 = vadd.f32 %v869_v58, %v827_v56  ;;  %v828_v61 = vpop.f32.mrf.mxu1 }
  0xd8   :  { %v829_v0 = vadd.f32 %v828_v61, %v786_v59 }
  0xdc   :  { %v795_v4 = vpop.f32.mrf.mxu3 }
  0xdd   :  { %v796_v31 = vadd.f32 %v2072_v24, %v795_v4 }
  0xde   :  { %v871_v5 = vpop.f32.mrf.mxu2  ;;  %v950_v7 = vpop.f32.mrf.mxu0 }
  0xdf   :  { %v2187_v6 = vadd.f32 %v871_v5, %v829_v0  ;;  %v831_v9 = vpop.f32.mrf.mxu1 }
  0xe0   :  { %v832_v10 = vadd.f32 %v831_v9, %v789_v45 }
  0xe2   :  { %1012 = vmatmul.bf16.gmra.mxu1 %v372_v3 }
  0xe3   :  { %1055 = vmatmul.bf16.gmra.mxu2 %v373_v8 }
  0xe4   :  { %v798_v11 = vpop.f32.mrf.mxu3 }
  0xe5   :  { %v799_v46 = vadd.f32 %v2072_v24, %v798_v11 }
  0xe6   :  { %v874_v12 = vpop.f32.mrf.mxu2  ;;  %v952_v23 = vpop.f32.mrf.mxu0 }
  0xe7   :  { %v2190_v14 = vadd.f32 %v874_v12, %v832_v10  ;;  %v833_v15 = vpop.f32.mrf.mxu1 }
  0xe8   :  { %v834_v16 = vadd.f32 %v833_v15, %v791_v13 }
  0xec   :  { %v800_v17 = vpop.f32.mrf.mxu3 }
  0xee   :  { %v876_v18 = vpop.f32.mrf.mxu2  ;;  %v955_v21 = vpop.f32.mrf.mxu0 }
  0xef   :  { %v2193_v20 = vadd.f32 %v876_v18, %v834_v16  ;;  %v836_v22 = vpop.f32.mrf.mxu1 }
  0xf0   :  { %v837_v27 = vadd.f32 %v836_v22, %v794_v19 }
  0xf4   :  { %v897_v28 = vpop.f32.mrf.mxu3 }
  0xf5   :  { %v898_v30 = vadd.f32 %v897_v28, %v2094_v44 }
  0xf6   :  { %v879_v29 = vpop.f32.mrf.mxu2  ;;  %v957_v34 = vpop.f32.mrf.mxu0 }
  0xf7   :  { %v2197_v33 = vadd.f32 %v879_v29, %v837_v27  ;;  %v838_v37 = vpop.f32.mrf.mxu1  ;;  %v2200_v38 = vadd.f32 %v2154_v26, %v898_v30 }
  0xf8   :  { %v839_v39 = vadd.f32 %v838_v37, %v796_v31 }
  0xfc   :  { %v899_v40 = vpop.f32.mrf.mxu3 }
  0xfd   :  { %v900_v43 = vadd.f32 %v899_v40, %v2121_v62 }
  0xfe   :  { %v881_v42 = vpop.f32.mrf.mxu2  ;;  %v2206_v48 = vpop.f32.mrf.mxu0 }
  0xff   :  { %v2204_v47 = vadd.f32 %v881_v42, %v839_v39  ;;  %v841_v44 = vpop.f32.mrf.mxu1  ;;  %v2209_v49 = vadd.f32 %v2159_v36, %v900_v43 }
 0x100   :  { %v842_v41 = vadd.f32 %v841_v44, %v799_v46 }
 0x104   :  { %v902_v53 = vpop.f32.mrf.mxu3 }
 0x105   :  { %v903_v26 = vadd.f32 %v902_v53, %v2124_v50 }
 0x106   :  { %v884_v54 = vpop.f32.mrf.mxu2  ;;  %v2214_v56 = vpop.f32.mrf.mxu0 }
 0x107   :  { %v2212_v55 = vadd.f32 %v884_v54, %v842_v41  ;;  %v843_v62 = vpop.f32.mrf.mxu1  ;;  %v946_v24 = vadd.f32 %v2177_v52, %v903_v26 }
 0x10c   :  { %v904_v57 = vpop.f32.mrf.mxu3 }
 0x10d   :  { %v905_v59 = vadd.f32 %v904_v57, %v2152_v25 }
 0x10e   :  { %v886_v58 = vpop.f32.mrf.mxu2  ;;  %v2218_v61 = vpop.f32.mrf.mxu0 }
 0x10f   :  { %v988_v36 = vpop.f32.mrf.mxu1  ;;  %v948_v63 = vadd.f32 %v947_v60, %v905_v59 }
 0x110   :  { %v989_v45 = vadd.f32 %v988_v36, %v946_v24 }
 0x114   :  { %v907_v0 = vpop.f32.mrf.mxu3 }
 0x115   :  { %v908_v1 = vadd.f32 %v907_v0, %v2157_v35 }
 0x116   :  { %v1031_v2 = vpop.f32.mrf.mxu2  ;;  %v2221_v50 = vpop.f32.mrf.mxu0 }
 0x117   :  { %v990_v4 = vpop.f32.mrf.mxu1  ;;  %v951_v5 = vadd.f32 %v950_v7, %v908_v1  ;;  %v1032_v3 = vadd.f32 %v1031_v2, %v989_v45 }
 0x118   :  { %v991_v8 = vadd.f32 %v990_v4, %v948_v63 }
 0x119   :  { %v1062_v13 = vmax.f32 %v1032_v3, 0.0 }
 0x11c   :  { %v909_v52 = vpop.f32.mrf.mxu3 }
 0x11d   :  { %v910_v9 = vadd.f32 %v909_v52, %v2175_v51 }
 0x11e   :  { %v1033_v10 = vpop.f32.mrf.mxu2  ;;  %v2224_v11 = vpop.f32.mrf.mxu0 }
 0x11f   :  { %v1034_v25 = vadd.f32 %v1033_v10, %v991_v8  ;;  %v993_v12 = vpop.f32.mrf.mxu1  ;;  %v953_v60 = vadd.f32 %v952_v23, %v910_v9 }
 0x120   :  { %v994_v22 = vadd.f32 %v993_v12, %v951_v5 }
 0x121   :  { %v1063_v15 = vmax.f32 %v1034_v25, 0.0 }
 0x123   :  { %v1601_v35 = vpack.c.bf16 %v1063_v15, %v1062_v13 }
 0x124   :  { %v912_v7 = vpop.f32.mrf.mxu3 }
 0x125   :  { %1623 = vst [vmem:[%s2264_s3 + $0x8] sm:$0xff] %v1601_v35   ;;  %v913_v16 = vadd.f32 %v912_v7, %v2180_v32 }
 0x126   :  { %v1036_v17 = vpop.f32.mrf.mxu2  ;;  %v972_v18 = vpop.f32.mrf.mxu0 }
 0x127   :  { %v995_v19 = vpop.f32.mrf.mxu1  ;;  %v956_v51 = vadd.f32 %v955_v21, %v913_v16  ;;  %v1037_v27 = vadd.f32 %v1036_v17, %v994_v22 }
 0x128   :  { %v996_v28 = vadd.f32 %v995_v19, %v953_v60 }
 0x129   :  { %v1064_v42 = vmax.f32 %v1037_v27, 0.0 }
 0x12c   :  { %v914_v29 = vpop.f32.mrf.mxu3 }
 0x12d   :  { %v915_v23 = vadd.f32 %v914_v29, %v2187_v6 }
 0x12e   :  { %v1038_v30 = vpop.f32.mrf.mxu2  ;;  %v983_v37 = vpop.f32.mrf.mxu0 }
 0x12f   :  { %v1039_v31 = vadd.f32 %v1038_v30, %v996_v28  ;;  %v998_v39 = vpop.f32.mrf.mxu1  ;;  %v958_v40 = vadd.f32 %v957_v34, %v915_v23  ;;  %v984_v2 = vadd.f32 %v983_v37, %v2200_v38 }
 0x130   :  { %v999_v54 = vadd.f32 %v998_v39, %v956_v51 }
 0x131   :  { %v1065_v43 = vmax.f32 %v1039_v31, 0.0 }
 0x133   :  { %v1606_v46 = vpack.c.bf16 %v1065_v43, %v1064_v42 }
 0x134   :  { %v917_v32 = vpop.f32.mrf.mxu3 }
 0x135   :  { %1624 = vst [vmem:[%s2264_s3 + $0x10] sm:$0xff] %v1606_v46   ;;  %v918_v21 = vadd.f32 %v917_v32, %v2190_v14 }
 0x136   :  { %v1041_v44 = vpop.f32.mrf.mxu2  ;;  %v985_v41 = vpop.f32.mrf.mxu0 }
 0x137   :  { %v1000_v53 = vpop.f32.mrf.mxu1  ;;  %v961_v6 = vadd.f32 %v2206_v48, %v918_v21  ;;  %v1042_v26 = vadd.f32 %v1041_v44, %v999_v54  ;;  %v986_v4 = vadd.f32 %v985_v41, %v2209_v49 }
 0x138   :  { %v1001_v62 = vadd.f32 %v1000_v53, %v958_v40 }
 0x139   :  { %v1066_v0 = vmax.f32 %v1042_v26, 0.0 }
 0x13c   :  { %v919_v24 = vpop.f32.mrf.mxu3 }
 0x13d   :  { %v920_v34 = vadd.f32 %v919_v24, %v2193_v20 }
 0x13e   :  { %v1043_v57 = vpop.f32.mrf.mxu2  ;;  %v1026_v59 = vpop.f32.mrf.mxu0 }
 0x13f   :  { %v1044_v58 = vadd.f32 %v1043_v57, %v1001_v62  ;;  %v1003_v36 = vpop.f32.mrf.mxu1  ;;  %v963_v63 = vadd.f32 %v2214_v56, %v920_v34  ;;  %v1027_v5 = vadd.f32 %v1026_v59, %v984_v2 }
 0x140   :  { %v1004_v25 = vadd.f32 %v1003_v36, %v961_v6 }
 0x141   :  { %v1067_v1 = vmax.f32 %v1044_v58, 0.0  ;;  %v1060_v9 = vmax.f32 %v1027_v5, 0.0 }
 0x143   :  { %v1611_v14 = vpack.c.bf16 %v1067_v1, %v1066_v0 }
 0x144   :  { %v922_v48 = vpop.f32.mrf.mxu3 }
 0x145   :  { %1625 = vst [vmem:[%s2264_s3 + $0x18] sm:$0xff] %v1611_v14   ;;  %v923_v20 = vadd.f32 %v922_v48, %v2197_v33 }
 0x146   :  { %v1046_v45 = vpop.f32.mrf.mxu2  ;;  %v1028_v3 = vpop.f32.mrf.mxu0 }
 0x147   :  { %v1005_v8 = vpop.f32.mrf.mxu1  ;;  %v1029_v52 = vadd.f32 %v1028_v3, %v986_v4  ;;  %v966_v56 = vadd.f32 %v2218_v61, %v923_v20  ;;  %v1047_v12 = vadd.f32 %v1046_v45, %v1004_v25 }
 0x148   :  { %v1006_v60 = vadd.f32 %v1005_v8, %v963_v63 }
 0x149   :  { %v1061_v10 = vmax.f32 %v1029_v52, 0.0  ;;  %v1068_v16 = vmax.f32 %v1047_v12, 0.0 }
 0x14b   :  { %v1596_v38 = vpack.c.bf16 %v1061_v10, %v1060_v9 }
 0x14c   :  { %v924_v13 = vpop.f32.mrf.mxu3 }
 0x14d   :  { %1597 = vst [vmem:[%s2264_s3] sm:$0xff] %v1596_v38   ;;  %v925_v49 = vadd.f32 %v924_v13, %v2204_v47 }
 0x14e   :  { %v1048_v33 = vpop.f32.mrf.mxu2 }
 0x14f   :  { %v1049_v15 = vadd.f32 %v1048_v33, %v1006_v60  ;;  %v1008_v35 = vpop.f32.mrf.mxu1  ;;  %v968_v7 = vadd.f32 %v2221_v50, %v925_v49 }
 0x150   :  { %v1009_v47 = vadd.f32 %v1008_v35, %v966_v56 }
 0x151   :  { %v1069_v61 = vmax.f32 %v1049_v15, 0.0 }
 0x153   :  { %v1616_v17 = vpack.c.bf16 %v1069_v61, %v1068_v16 }
 0x154   :  { %v927_v18 = vpop.f32.mrf.mxu3 }
 0x155   :  { %1626 = vst [vmem:[%s2264_s3 + $0x20] sm:$0xff] %v1616_v17   ;;  %v928_v19 = vadd.f32 %v927_v18, %v2212_v55 }
 0x156   :  { %v1051_v51 = vpop.f32.mrf.mxu2 }
 0x157   :  { %v1010_v22 = vpop.f32.mrf.mxu1  ;;  %v971_v27 = vadd.f32 %v2224_v11, %v928_v19  ;;  %v1052_v28 = vadd.f32 %v1051_v51, %v1009_v47 }
 0x158   :  { %v1011_v29 = vadd.f32 %v1010_v22, %v968_v7 }
 0x159   :  { %v1070_v37 = vmax.f32 %v1052_v28, 0.0 }
 0x15c   :  { %v929_v23 = vpop.f32.mrf.mxu3 }
 0x15e   :  { %v1053_v30 = vpop.f32.mrf.mxu2 }
 0x15f   :  { %v1054_v50 = vadd.f32 %v1053_v30, %v1011_v29  ;;  %v1013_v31 = vpop.f32.mrf.mxu1 }
 0x160   :  { %v1014_v42 = vadd.f32 %v1013_v31, %v971_v27 }
 0x161   :  { %v1071_v39 = vmax.f32 %v1054_v50, 0.0 }
 0x163   :  { %v1621_v40 = vpack.c.bf16 %v1071_v39, %v1070_v37 }
 0x165   :  { %1627 = vst [vmem:[%s2264_s3 + $0x28] sm:$0xff] %v1621_v40  }
 0x166   :  { %v1056_v55 = vpop.f32.mrf.mxu2 }
 0x167   :  { %v1057_v43 = vadd.f32 %v1056_v55, %v1014_v42  ;;  %v1015_v46 = vpop.f32.mrf.mxu1 }
 0x169   :  { %v1072_v32 = vmax.f32 %v1057_v43, 0.0 }
 0x16b   :  { %v1085_v11 = vpack.c.bf16 %v1072_v32, %v1072_v32 }
 0x16d   :  { %1098 = vst [vmem:[%s2264_s3 + $0x30] sm:$0x1] %v1085_v11 }
 0x16e   :  { %v1058_v21 = vpop.f32.mrf.mxu2 }

// kernel: cnn_forward.8
= control target key start
LH: loop header
LB: loop body
LE: loop exit
PB: predicated region body
PF: predicated region fallthrough
CT: control target
= control target key end

     0   :  { %vm125_vm0 = vcmask 1041408   ;;  %vm126_vm1 = vsmask.f32 1280  ;;  %s260_s0 = inlined_call_operand.vmem [shape: bf16[6,2,3,256], index: 0, kind: input, shape index: {}]   ;;  %s261_s1 = inlined_call_operand.vmem [shape: bf16[6,3,128], index: 1, kind: output, shape index: {}]  }
   0x1   :  { %v151_v0 = vld [vmem:[%s260_s0] sm:$0xff]   ;;  %v174_v1 = vld [vmem:[%s260_s0 + $0x8] sm:$0xff]   ;;  %v175_v2 = vld [vmem:[%s260_s0 + $0x10] sm:$0xff]  }
   0x2   :  { %v152_v3 = vunpack.c.l.bf16 %v151_v0  ;;  %v153_v4 = vunpack.c.h.bf16 %v151_v0  ;;  %v156_v5 = vunpack.c.l.bf16 %v174_v1  ;;  %v157_v6 = vunpack.c.h.bf16 %v174_v1  ;;  %v176_v7 = vld [vmem:[%s260_s0 + $0x18] sm:$0xff]   ;;  %v177_v12 = vld [vmem:[%s260_s0 + $0x20] sm:$0xff]   ;;  %v178_v17 = vld [vmem:[%s260_s0 + $0x28] sm:$0xff]  }
   0x3   :  { %v160_v8 = vunpack.c.l.bf16 %v175_v2  ;;  %v161_v9 = vunpack.c.h.bf16 %v175_v2  ;;  %v164_v10 = vunpack.c.l.bf16 %v176_v7  ;;  %v165_v11 = vunpack.c.h.bf16 %v176_v7  ;;  %v128_v42 = vld [vmem:[%s261_s1] sm:$0x3]  ;;  %vm211_vm2 = vmand %vm125_vm0, %vm126_vm1  ;;  %v131_v50 = vld [vmem:[%s261_s1 + $0x2] sm:$0x3] }
   0x4   :  { %v32_v13 = vmax.f32 %v152_v3, %v153_v4  ;;  %v33_v14 = vmax.f32 %v156_v5, %v157_v6  ;;  %v168_v18 = vunpack.c.l.bf16 %v177_v12  ;;  %v169_v19 = vunpack.c.h.bf16 %v177_v12  ;;  %v134_v58 = vld [vmem:[%s261_s1 + $0x4] sm:$0x3]  ;;  %v137_v62 = vld [vmem:[%s261_s1 + $0x6] sm:$0x3]  ;;  %v140_v7 = vld [vmem:[%s261_s1 + $0x8] sm:$0x3] }
   0x5   :  { %v34_v15 = vmax.f32 %v160_v8, %v161_v9  ;;  %v35_v16 = vmax.f32 %v164_v10, %v165_v11  ;;  %v172_v20 = vunpack.c.l.bf16 %v178_v17  ;;  %v173_v21 = vunpack.c.h.bf16 %v178_v17  ;;  %v143_v12 = vld [vmem:[%s261_s1 + $0xa] sm:$0x3] }
   0x6   :  { %44 = vst [vmem:[#allocation1] ss:$2 sm:$0xff] %v32_v13  ;;  %v36_v22 = vmax.f32 %v168_v18, %v169_v19 }
   0x7   :  { %48 = vst [vmem:[#allocation1 + $0x10] ss:$2 sm:$0xff] %v33_v14  ;;  %v37_v23 = vmax.f32 %v172_v20, %v173_v21 }
   0x8   :  { %52 = vst [vmem:[#allocation1 + $0x20] ss:$2 sm:$0xff] %v34_v15 }
   0x9   :  { %56 = vst [vmem:[#allocation1 + $0x30] ss:$2 sm:$0xff] %v35_v16 }
   0xd   :  { %v45_v24 = vld.sshfl [vmem:[#allocation1] sm:$0xff pattern:$0x75316420]  ;;  %v46_v25 = vld.sshfl [vmem:[#allocation1 + $0x8] sm:$0xff pattern:$0x75316420] }
   0xe   :  { %59 = vst [vmem:[#allocation1] ss:$2 sm:$0xff] %v36_v22  ;;  %v77_v26 = vpack.c.bf16 %v46_v25, %v45_v24  ;;  %v49_v27 = vld.sshfl [vmem:[#allocation1 + $0x10] sm:$0xff pattern:$0x75316420] }
   0xf   :  { %v50_v28 = vld.sshfl [vmem:[#allocation1 + $0x18] sm:$0xff pattern:$0x75316420]  ;;  %v53_v29 = vld.sshfl [vmem:[#allocation1 + $0x20] sm:$0xff pattern:$0x75316420] }
  0x10   :  { %v95_v30 = vrot.slane %v77_v26, 4  ;;  %62 = vst [vmem:[#allocation1 + $0x10] ss:$2 sm:$0xff] %v37_v23  ;;  %v78_v31 = vpack.c.bf16 %v50_v28, %v49_v27  ;;  %v54_v32 = vld.sshfl [vmem:[#allocation1 + $0x28] sm:$0xff pattern:$0x75316420] }
  0x11   :  { %v79_v33 = vpack.c.bf16 %v54_v32, %v53_v29  ;;  %v57_v34 = vld.sshfl [vmem:[#allocation1 + $0x30] sm:$0xff pattern:$0x75316420]  ;;  %v58_v35 = vld.sshfl [vmem:[#allocation1 + $0x38] sm:$0xff pattern:$0x75316420] }
  0x12   :  { %v107_v36 = vunpack.c.l.bf16 %v95_v30  ;;  %v96_v37 = vrot.slane %v78_v31, 4  ;;  %v80_v38 = vpack.c.bf16 %v58_v35, %v57_v34 }
  0x13   :  { %v97_v39 = vrot.slane %v79_v33, 4 }
  0x14   :  { %v113_v40 = vmax.f32 %v45_v24, %v107_v36  ;;  %v108_v41 = vunpack.c.l.bf16 %v96_v37  ;;  %v98_v43 = vrot.slane %v80_v38, 4 }
  0x15   :  { %v109_v45 = vunpack.c.l.bf16 %v97_v39  ;;  %v60_v46 = vld.sshfl [vmem:[#allocation1] sm:$0xff pattern:$0x75316420]  ;;  %v61_v47 = vld.sshfl [vmem:[#allocation1 + $0x8] sm:$0xff pattern:$0x75316420] }
  0x16   :  { %v114_v48 = vmax.f32 %v49_v27, %v108_v41  ;;  %v119_v49 = vpack.c.bf16 %v113_v40, %v113_v40  ;;  %v110_v51 = vunpack.c.l.bf16 %v98_v43  ;;  %v81_v52 = vpack.c.bf16 %v61_v47, %v60_v46 }
  0x17   :  { %v115_v53 = vmax.f32 %v53_v29, %v109_v45  ;;  %v63_v54 = vld.sshfl [vmem:[#allocation1 + $0x10] sm:$0xff pattern:$0x75316420]  ;;  %v64_v55 = vld.sshfl [vmem:[#allocation1 + $0x18] sm:$0xff pattern:$0x75316420] }
  0x18   :  { %v129_v56 = vsel %vm211_vm2, %v119_v49, %v128_v42  ;;  %v120_v57 = vpack.c.bf16 %v114_v48, %v114_v48  ;;  %v116_v59 = vmax.f32 %v57_v34, %v110_v51  ;;  %v99_v60 = vrot.slane %v81_v52, 4 }
  0x19   :  { %130 = vst [vmem:[%s261_s1] sm:$0x3] %v129_v56  ;;  %v121_v61 = vpack.c.bf16 %v115_v53, %v115_v53  ;;  %v82_v63 = vpack.c.bf16 %v64_v55, %v63_v54 }
  0x1a   :  { %v132_v0 = vsel %vm211_vm2, %v120_v57, %v131_v50  ;;  %v122_v1 = vpack.c.bf16 %v116_v59, %v116_v59  ;;  %v111_v2 = vunpack.c.l.bf16 %v99_v60 }
  0x1b   :  { %133 = vst [vmem:[%s261_s1 + $0x2] sm:$0x3] %v132_v0  ;;  %v135_v3 = vsel %vm211_vm2, %v121_v61, %v134_v58  ;;  %v100_v4 = vrot.slane %v82_v63, 4 }
  0x1c   :  { %136 = vst [vmem:[%s261_s1 + $0x4] sm:$0x3] %v135_v3  ;;  %v138_v5 = vsel %vm211_vm2, %v122_v1, %v137_v62  ;;  %v117_v6 = vmax.f32 %v60_v46, %v111_v2 }
  0x1d   :  { %139 = vst [vmem:[%s261_s1 + $0x6] sm:$0x3] %v138_v5  ;;  %v112_v8 = vunpack.c.l.bf16 %v100_v4 }
  0x1e   :  { %v123_v9 = vpack.c.bf16 %v117_v6, %v117_v6 }
  0x1f   :  { %v118_v10 = vmax.f32 %v63_v54, %v112_v8 }
  0x20   :  { %v141_v11 = vsel %vm211_vm2, %v123_v9, %v140_v7 }
  0x21   :  { %142 = vst [vmem:[%s261_s1 + $0x8] sm:$0x3] %v141_v11  ;;  %v124_v13 = vpack.c.bf16 %v118_v10, %v118_v10 }
  0x23   :  { %v144_v14 = vsel %vm211_vm2, %v124_v13, %v143_v12 }
  0x24   :  { %145 = vst [vmem:[%s261_s1 + $0xa] sm:$0x3] %v144_v14 }

// kernel: cnn_forward.9
= control target key start
LH: loop header
LB: loop body
LE: loop exit
PB: predicated region body
PF: predicated region fallthrough
CT: control target
= control target key end

     0   :  { %s1390_s0 = inlined_call_operand.vmem [shape: bf16[2,1152], index: 0, kind: input, shape index: {}]   ;;  %s1391_s1 = inlined_call_operand.vmem [shape: bf16[1152,128], index: 1, kind: input, shape index: {}]   ;;  %s1392_s2 = inlined_call_operand.vmem [shape: f32[1,128], index: 2, kind: input, shape index: {}]   ;;  %s1393_s3 = inlined_call_operand.hbm [shape: f32[2,128], index: 3, kind: output, shape index: {}]  }
   0x1   :  { %v1048_v0 = vld [vmem:[%s1391_s1 + $0x38] sm:$0xff]  ;;  %v1047_v4 = vld [vmem:[%s1391_s1 + $0x30] sm:$0xff]  ;;  %v1046_v8 = vld [vmem:[%s1391_s1 + $0x28] sm:$0xff] }
   0x2   :  { %v1064_v1 = vld [vmem:[%s1391_s1 + $0xb8] sm:$0xff]  ;;  %619 = vmatpush.bf16.msra.mxu0 %v1048_v0  ;;  %v1063_v5 = vld [vmem:[%s1391_s1 + $0xb0] sm:$0xff]  ;;  %v1062_v9 = vld [vmem:[%s1391_s1 + $0xa8] sm:$0xff] }
   0x3   :  { %v1072_v2 = vld [vmem:[%s1391_s1 + $0xf8] sm:$0xff]  ;;  %645 = vmatpush.bf16.msra.mxu2 %v1064_v1  ;;  %v1071_v6 = vld [vmem:[%s1391_s1 + $0xf0] sm:$0xff]  ;;  %v1070_v10 = vld [vmem:[%s1391_s1 + $0xe8] sm:$0xff] }
   0x4   :  { %v1056_v3 = vld [vmem:[%s1391_s1 + $0x78] sm:$0xff]  ;;  %658 = vmatpush.bf16.msra.mxu3 %v1072_v2  ;;  %v1055_v7 = vld [vmem:[%s1391_s1 + $0x70] sm:$0xff]  ;;  %v1054_v11 = vld [vmem:[%s1391_s1 + $0x68] sm:$0xff] }
   0x5   :  { %632 = vmatpush.bf16.msra.mxu1 %v1056_v3  ;;  %v1045_v12 = vld [vmem:[%s1391_s1 + $0x20] sm:$0xff]  ;;  %v1044_v16 = vld [vmem:[%s1391_s1 + $0x18] sm:$0xff]  ;;  %v1043_v21 = vld [vmem:[%s1391_s1 + $0x10] sm:$0xff] }
   0x6   :  { %620 = vmatpush.bf16.msra.mxu0 %v1047_v4  ;;  %v1061_v13 = vld [vmem:[%s1391_s1 + $0xa0] sm:$0xff]  ;;  %v1060_v17 = vld [vmem:[%s1391_s1 + $0x98] sm:$0xff]  ;;  %v1059_v22 = vld [vmem:[%s1391_s1 + $0x90] sm:$0xff] }
   0x7   :  { %646 = vmatpush.bf16.msra.mxu2 %v1063_v5  ;;  %v1069_v14 = vld [vmem:[%s1391_s1 + $0xe0] sm:$0xff]  ;;  %v1068_v18 = vld [vmem:[%s1391_s1 + $0xd8] sm:$0xff] }
   0x8   :  { %659 = vmatpush.bf16.msra.mxu3 %v1071_v6  ;;  %v1053_v15 = vld [vmem:[%s1391_s1 + $0x60] sm:$0xff]  ;;  %v1052_v19 = vld [vmem:[%s1391_s1 + $0x58] sm:$0xff] }
   0x9   :  { %633 = vmatpush.bf16.msra.mxu1 %v1055_v7  ;;  %v15_v20 = vld [vmem:[%s1390_s0] sm:$0xff] }
   0xa   :  { %621 = vmatpush.bf16.msra.mxu0 %v1046_v8  ;;  %166 = vst [vmem:[#allocation1] ss:$9 sm:$0xff] %v15_v20 }
   0xb   :  { %647 = vmatpush.bf16.msra.mxu2 %v1062_v9 }
   0xc   :  { %660 = vmatpush.bf16.msra.mxu3 %v1070_v10 }
   0xd   :  { %634 = vmatpush.bf16.msra.mxu1 %v1054_v11 }
   0xe   :  { %622 = vmatpush.bf16.msra.mxu0 %v1045_v12 }
   0xf   :  { %648 = vmatpush.bf16.msra.mxu2 %v1061_v13 }
  0x10   :  { %661 = vmatpush.bf16.msra.mxu3 %v1069_v14 }
  0x11   :  { %635 = vmatpush.bf16.msra.mxu1 %v1053_v15 }
  0x12   :  { %623 = vmatpush.bf16.msra.mxu0 %v1044_v16 }
  0x13   :  { %649 = vmatpush.bf16.msra.mxu2 %v1060_v17 }
  0x14   :  { %8 = vsyncpa [#allocation3], 0  ;;  %662 = vmatpush.bf16.msra.mxu3 %v1068_v18  ;;  %v1067_v23 = vld [vmem:[%s1391_s1 + $0xd0] sm:$0xff]  ;;  %v1042_v25 = vld [vmem:[%s1391_s1 + $0x8] sm:$0xff] }
  0x15   :  { %636 = vmatpush.bf16.msra.mxu1 %v1052_v19  ;;  %v1051_v24 = vld [vmem:[%s1391_s1 + $0x50] sm:$0xff]  ;;  %v1058_v26 = vld [vmem:[%s1391_s1 + $0x88] sm:$0xff]  ;;  %v1041_v29 = vld [vmem:[%s1391_s1] sm:$0xff] }
  0x16   :  { %624 = vmatpush.bf16.msra.mxu0 %v1043_v21  ;;  %v1066_v27 = vld [vmem:[%s1391_s1 + $0xc8] sm:$0xff]  ;;  %v1057_v30 = vld [vmem:[%s1391_s1 + $0x80] sm:$0xff]  ;;  %v1080_v31 = vld [vmem:[%s1391_s1 + $0x138] sm:$0xff] }
  0x17   :  { %650 = vmatpush.bf16.msra.mxu2 %v1059_v22  ;;  %v1050_v28 = vld [vmem:[%s1391_s1 + $0x48] sm:$0xff]  ;;  %v1096_v32 = vld [vmem:[%s1391_s1 + $0x1b8] sm:$0xff]  ;;  %v1065_v33 = vld [vmem:[%s1391_s1 + $0xc0] sm:$0xff] }
  0x18   :  { %663 = vmatpush.bf16.msra.mxu3 %v1067_v23  ;;  %v1049_v34 = vld [vmem:[%s1391_s1 + $0x40] sm:$0xff]  ;;  %v1104_v35 = vld [vmem:[%s1391_s1 + $0x1f8] sm:$0xff]  ;;  %v1079_v37 = vld [vmem:[%s1391_s1 + $0x130] sm:$0xff] }
  0x19   :  { %637 = vmatpush.bf16.msra.mxu1 %v1051_v24  ;;  %v1088_v36 = vld [vmem:[%s1391_s1 + $0x178] sm:$0xff]  ;;  %v1095_v38 = vld [vmem:[%s1391_s1 + $0x1b0] sm:$0xff]  ;;  %v167_v40 = vld [vmem:[#allocation1] sm:$0xff] }
  0x1a   :  { %625 = vmatpush.bf16.msra.mxu0 %v1042_v25  ;;  %v169_v39 = vld [vmem:[#allocation1 + $0x12] sm:$0xff]  ;;  %v170_v43 = vld [vmem:[#allocation1 + $0x1b] sm:$0xff]  ;;  %v168_v44 = vld [vmem:[#allocation1 + $0x9] sm:$0xff] }
  0x1b   :  { %651 = vmatpush.bf16.msra.mxu2 %v1058_v26  ;;  %v1103_v41 = vld [vmem:[%s1391_s1 + $0x1f0] sm:$0xff]  ;;  %v1078_v45 = vld [vmem:[%s1391_s1 + $0x128] sm:$0xff]  ;;  %v174_v49 = vld [vmem:[#allocation1 + $0x3f] sm:$0xff] }
  0x1c   :  { %664 = vmatpush.bf16.msra.mxu3 %v1066_v27  ;;  %v1087_v42 = vld [vmem:[%s1391_s1 + $0x170] sm:$0xff]  ;;  %v1094_v46 = vld [vmem:[%s1391_s1 + $0x1a8] sm:$0xff]  ;;  %v1077_v54 = vld [vmem:[%s1391_s1 + $0x120] sm:$0xff] }
  0x1d   :  { %638 = vmatpush.bf16.msra.mxu1 %v1050_v28  ;;  %v173_v47 = vld [vmem:[#allocation1 + $0x36] sm:$0xff]  ;;  %v171_v48 = vld [vmem:[#allocation1 + $0x24] sm:$0xff]  ;;  %v172_v51 = vld [vmem:[#allocation1 + $0x2d] sm:$0xff] }
  0x1e   :  { %626 = vmatpush.bf16.msra.mxu0 %v1041_v29  ;;  %v16_v50 = vld [vmem:[%s1390_s0 + $0x8] sm:$0x1]  ;;  %v1093_v55 = vld [vmem:[%s1391_s1 + $0x1a0] sm:$0xff]  ;;  %v1076_v58 = vld [vmem:[%s1391_s1 + $0x118] sm:$0xff] }
  0x1f   :  { %652 = vmatpush.bf16.msra.mxu2 %v1057_v30  ;;  %v1102_v52 = vld [vmem:[%s1391_s1 + $0x1e8] sm:$0xff]  ;;  %176 = vst [vmem:[#allocation1] ss:$9 sm:$0xff] %v16_v50  ;;  %v1101_v56 = vld [vmem:[%s1391_s1 + $0x1e0] sm:$0xff]  ;;  %v1092_v59 = vld [vmem:[%s1391_s1 + $0x198] sm:$0xff] }
  0x20   :  { %665 = vmatpush.bf16.msra.mxu3 %v1065_v33  ;;  %v1086_v53 = vld [vmem:[%s1391_s1 + $0x168] sm:$0xff]  ;;  %v1085_v57 = vld [vmem:[%s1391_s1 + $0x160] sm:$0xff]  ;;  %v1100_v60 = vld [vmem:[%s1391_s1 + $0x1d8] sm:$0xff] }
  0x21   :  { %639 = vmatpush.bf16.msra.mxu1 %v1049_v34  ;;  %627 = vmatmul.bf16.vlgmr.msra.gmra.mxu0 %v167_v40  ;;  %v1084_v61 = vld [vmem:[%s1391_s1 + $0x158] sm:$0xff]  ;;  %v1075_v62 = vld [vmem:[%s1391_s1 + $0x110] sm:$0xff]  ;;  %v1074_v2 = vld [vmem:[%s1391_s1 + $0x108] sm:$0xff] }
  0x22   :  { %671 = vmatpush.bf16.msrb.mxu0 %v1080_v31  ;;  %653 = vmatmul.bf16.vlgmr.msra.gmra.mxu2 %v169_v39  ;;  %v1091_v63 = vld [vmem:[%s1391_s1 + $0x190] sm:$0xff]  ;;  %v1090_v3 = vld [vmem:[%s1391_s1 + $0x188] sm:$0xff]  ;;  %v1073_v6 = vld [vmem:[%s1391_s1 + $0x100] sm:$0xff] }
  0x23   :  { %697 = vmatpush.bf16.msrb.mxu2 %v1096_v32  ;;  %666 = vmatmul.bf16.vlgmr.msra.gmra.mxu3 %v170_v43  ;;  %v1099_v0 = vld [vmem:[%s1391_s1 + $0x1d0] sm:$0xff]  ;;  %v1098_v4 = vld [vmem:[%s1391_s1 + $0x1c8] sm:$0xff]  ;;  %v1089_v7 = vld [vmem:[%s1391_s1 + $0x180] sm:$0xff] }
  0x24   :  { %710 = vmatpush.bf16.msrb.mxu3 %v1104_v35  ;;  %640 = vmatmul.bf16.vlgmr.msra.gmra.mxu1 %v168_v44  ;;  %v1083_v1 = vld [vmem:[%s1391_s1 + $0x150] sm:$0xff]  ;;  %v1082_v5 = vld [vmem:[%s1391_s1 + $0x148] sm:$0xff]  ;;  %v1112_v8 = vld [vmem:[%s1391_s1 + $0x238] sm:$0xff] }
  0x25   :  { %684 = vmatpush.bf16.msrb.mxu1 %v1088_v36  ;;  %v1097_v9 = vld [vmem:[%s1391_s1 + $0x1c0] sm:$0xff]  ;;  %v1111_v11 = vld [vmem:[%s1391_s1 + $0x230] sm:$0xff]  ;;  %v1110_v12 = vld [vmem:[%s1391_s1 + $0x228] sm:$0xff] }
  0x26   :  { %672 = vmatpush.bf16.msrb.mxu0 %v1079_v37  ;;  %v1081_v10 = vld [vmem:[%s1391_s1 + $0x140] sm:$0xff]  ;;  %v1108_v14 = vld [vmem:[%s1391_s1 + $0x218] sm:$0xff]  ;;  %v1107_v15 = vld [vmem:[%s1391_s1 + $0x210] sm:$0xff] }
  0x27   :  { %698 = vmatpush.bf16.msrb.mxu2 %v1095_v38  ;;  %v1109_v13 = vld [vmem:[%s1391_s1 + $0x220] sm:$0xff]  ;;  %v1106_v16 = vld [vmem:[%s1391_s1 + $0x208] sm:$0xff] }
  0x28   :  { %711 = vmatpush.bf16.msrb.mxu3 %v1103_v41  ;;  %v1105_v17 = vld [vmem:[%s1391_s1 + $0x200] sm:$0xff]  ;;  %s1141_s1 = smov [#allocation2]  }
  0x29   :  { %685 = vmatpush.bf16.msrb.mxu1 %v1087_v42  ;;  %v177_v18 = vld [vmem:[#allocation1] sm:$0xff]  ;;  %s742_s25 = sshll.u32 %s1141_s1, 4  ;;  %s743_s25 = int_to_ptr.vmem [resolvable:$true] %s742_s25 }
  0x2a   :  { %673 = vmatpush.bf16.msrb.mxu0 %v1078_v45  ;;  %v1114_v27 = vld [vmem:[%s1392_s2] ss:$0 sm:$0xff]  ;;  %s744_s2 = sshll.u32 %s1393_s3, 4  ;;  %s745_s2 = int_to_ptr.hbm [resolvable:$true] %s744_s2 }
  0x2b   :  { %699 = vmatpush.bf16.msrb.mxu2 %v1094_v46 }
  0x2c   :  { %712 = vmatpush.bf16.msrb.mxu3 %v1102_v52 }
  0x2d   :  { %686 = vmatpush.bf16.msrb.mxu1 %v1086_v53 }
  0x2e   :  { %674 = vmatpush.bf16.msrb.mxu0 %v1077_v54 }
  0x2f   :  { %700 = vmatpush.bf16.msrb.mxu2 %v1093_v55 }
  0x30   :  { %713 = vmatpush.bf16.msrb.mxu3 %v1101_v56 }
  0x31   :  { %687 = vmatpush.bf16.msrb.mxu1 %v1085_v57 }
  0x32   :  { %675 = vmatpush.bf16.msrb.mxu0 %v1076_v58 }
  0x33   :  { %701 = vmatpush.bf16.msrb.mxu2 %v1092_v59 }
  0x34   :  { %714 = vmatpush.bf16.msrb.mxu3 %v1100_v60 }
  0x35   :  { %688 = vmatpush.bf16.msrb.mxu1 %v1084_v61 }
  0x36   :  { %676 = vmatpush.bf16.msrb.mxu0 %v1075_v62 }
  0x37   :  { %702 = vmatpush.bf16.msrb.mxu2 %v1091_v63 }
  0x38   :  { %715 = vmatpush.bf16.msrb.mxu3 %v1099_v0 }
  0x39   :  { %689 = vmatpush.bf16.msrb.mxu1 %v1083_v1 }
  0x3a   :  { %677 = vmatpush.bf16.msrb.mxu0 %v1074_v2 }
  0x3b   :  { %703 = vmatpush.bf16.msrb.mxu2 %v1090_v3 }
  0x3c   :  { %716 = vmatpush.bf16.msrb.mxu3 %v1098_v4 }
  0x3d   :  { %690 = vmatpush.bf16.msrb.mxu1 %v1082_v5 }
  0x3e   :  { %678 = vmatpush.bf16.msrb.mxu0 %v1073_v6 }
  0x3f   :  { %704 = vmatpush.bf16.msrb.mxu2 %v1089_v7 }
  0x40   :  { %717 = vmatpush.bf16.msrb.mxu3 %v1097_v9 }
  0x41   :  { %691 = vmatpush.bf16.msrb.mxu1 %v1081_v10  ;;  %679 = vmatmul.bf16.vlgmr.msrb.gmra.mxu0 %v171_v48 }
  0x42   :  { %723 = vmatpush.bf16.msra.mxu0 %v1112_v8  ;;  %705 = vmatmul.bf16.vlgmr.msrb.gmra.mxu2 %v173_v47 }
  0x43   :  { %718 = vmatmul.bf16.vlgmr.msrb.gmra.mxu3 %v174_v49 }
  0x44   :  { %692 = vmatmul.bf16.vlgmr.msrb.gmra.mxu1 %v172_v51 }
  0x46   :  { %724 = vmatpush.bf16.msra.mxu0 %v1111_v11 }
  0x4a   :  { %725 = vmatpush.bf16.msra.mxu0 %v1110_v12 }
  0x4e   :  { %726 = vmatpush.bf16.msra.mxu0 %v1109_v13 }
  0x52   :  { %727 = vmatpush.bf16.msra.mxu0 %v1108_v14 }
  0x56   :  { %728 = vmatpush.bf16.msra.mxu0 %v1107_v15 }
  0x5a   :  { %729 = vmatpush.bf16.msra.mxu0 %v1106_v16 }
  0x5e   :  { %730 = vmatpush.bf16.msra.mxu0 %v1105_v17 }
  0x61   :  { %731 = vmatmul.bf16.vlgmr.msra.gmra.mxu0 %v177_v18 }
  0x9e   :  { %v628_v19 = vpop.f32.mrf.mxu0 }
  0x9f   :  { %v629_v28 = vadd.f32 %v1114_v27, %v628_v19 }
  0xa1   :  { %v641_v20 = vpop.f32.mrf.mxu1 }
  0xa2   :  { %v642_v31 = vadd.f32 %v641_v20, %v629_v28 }
  0xa5   :  { %v654_v21 = vpop.f32.mrf.mxu2 }
  0xa6   :  { %v667_v22 = vpop.f32.mrf.mxu3  ;;  %v630_v23 = vpop.f32.mrf.mxu0  ;;  %v655_v33 = vadd.f32 %v654_v21, %v642_v31 }
  0xa8   :  { %v668_v37 = vadd.f32 %v667_v22, %v655_v33 }
  0xa9   :  { %v643_v24 = vpop.f32.mrf.mxu1 }
  0xad   :  { %v656_v25 = vpop.f32.mrf.mxu2 }
  0xae   :  { %v669_v26 = vpop.f32.mrf.mxu3 }
  0xbe   :  { %v680_v29 = vpop.f32.mrf.mxu0 }
  0xbf   :  { %v681_v39 = vadd.f32 %v680_v29, %v668_v37 }
  0xc1   :  { %v693_v30 = vpop.f32.mrf.mxu1 }
  0xc2   :  { %v694_v41 = vadd.f32 %v693_v30, %v681_v39 }
  0xc5   :  { %v706_v32 = vpop.f32.mrf.mxu2 }
  0xc6   :  { %v719_v34 = vpop.f32.mrf.mxu3  ;;  %v682_v35 = vpop.f32.mrf.mxu0  ;;  %v707_v42 = vadd.f32 %v706_v32, %v694_v41 }
  0xc8   :  { %v720_v43 = vadd.f32 %v719_v34, %v707_v42 }
  0xc9   :  { %v695_v36 = vpop.f32.mrf.mxu1 }
  0xcd   :  { %v708_v38 = vpop.f32.mrf.mxu2 }
  0xce   :  { %v721_v40 = vpop.f32.mrf.mxu3 }
  0xde   :  { %v732_v44 = vpop.f32.mrf.mxu0 }
  0xdf   :  { %v733_v45 = vadd.f32 %v732_v44, %v720_v43 }
  0xe1   :  { %736 = vst [vmem:[#allocation2] sm:$0x3] %v733_v45 }
  0xe2   :  { %747 = dma.vmem_to_hbm [thread:$0]  %s743_s25, 32, %s745_s2, [#allocation3]  }
  0xe6   :  { %v734_v46 = vpop.f32.mrf.mxu0 }
  0xe7   :  { %1139 = dma.done.wait [#allocation3], 32  }
  0xe8   :  { %1140 = vsyncadd [#allocation3], 4294967264 }
  0xe9   :  { %752 = vsyncpa [#allocation3], 1 }

</bundles_post_ra>
